<compile_context>
chip_gen: v7x
topology: tpu7x:2x2x1
jax: 0.10.0
libtpu: 0.0.40
codegen_flags: <defaults>
</compile_context>

<pallas_src>
import functools

import jax
import jax.numpy as jnp
from jax.experimental import pallas as pl
from jax.experimental.pallas import tpu as pltpu

_BN_EPS = 1e-5


def _round_up(n, m):
    return ((n + m - 1) // m) * m


@functools.lru_cache(maxsize=None)
def _compiler_params(grid_rank):
    # Derive the VMEM budget per TPU generation instead of hard-coding 64 MiB
    # (64 MiB is the *entire* physical VMEM of a v7x TensorCore): use <= 3/4 of
    # physical capacity, capped at 96 MiB  =>  ~48 MiB on v7x, 96 MiB on
    # v5e/v6e, leaving headroom for double-buffers and compiler scratch.
    limit = None
    try:
        cap = getattr(pltpu.get_tpu_info(), "vmem_capacity_bytes", None)
        if cap:
            limit = min(int(cap) * 3 // 4, 96 * 1024 * 1024)
    except Exception:
        limit = None  # fall back to the compiler default
    return pltpu.CompilerParams(
        dimension_semantics=("parallel",) * grid_rank,
        vmem_limit_bytes=limit,
    )


# ----------------------------------------------------------------------------
# Pallas kernel: fused implicit-GEMM conv + folded-BN bias + optional ReLU.
# ----------------------------------------------------------------------------
def _conv_bn_act_kernel(*refs, n_phase, taps, ho, wo, apply_relu):
    """refs = (*phase_refs, w_ref, b_ref, o_ref, acc_ref).

    phase_refs[p] : (1, Hs_p, Ws_p, Cin_p)  bf16  stride-phase view of padded x
    w_ref         : (k, k, Cin_p, tn)       bf16  HWIO weights * BN scale
    b_ref         : (1, tn)                 f32   BN bias
    o_ref         : (1, ho*wo, tn)          f32
    acc_ref       : (ho*wo, tn)             f32   VMEM accumulator scratch
    """
    phase_refs = refs[:n_phase]
    w_ref, b_ref, o_ref, acc_ref = refs[n_phase:]
    m = ho * wo

    # Static tap loop: k*k shifted (m, Cin) x (Cin, tn) MXU matmuls, f32 accum.
    for t, (p, r0, c0, di, dj) in enumerate(taps):
        xt = phase_refs[p][0, r0:r0 + ho, c0:c0 + wo, :]       # (ho, wo, Cin_p)
        xt = xt.reshape(m, xt.shape[-1])                       # (m, Cin_p)
        wt = w_ref[di, dj]                                     # (Cin_p, tn)
        part = jnp.dot(xt, wt, preferred_element_type=jnp.float32)
        if t == 0:
            acc_ref[...] = part
        else:
            acc_ref[...] += part

    y = acc_ref[...] + b_ref[...]                              # f32 epilogue
    if apply_relu:
        y = jnp.maximum(y, 0.0)
    o_ref[0] = y.astype(o_ref.dtype)


# ----------------------------------------------------------------------------
# Wrapper: BN folding, channel padding, stride-phase views, pallas_call.
# ----------------------------------------------------------------------------
def _fused_conv_bn_act(x_nhwc, params, k, s, act):
    N, H, W, Cin = x_nhwc.shape
    w = params["w"]                                   # (Cout, Cin, k, k) OIHW
    Cout = w.shape[0]
    pad = (k - 1) // 2
    Hp, Wp = H + 2 * pad, W + 2 * pad
    assert Hp >= k and Wp >= k
    Ho = (Hp - k) // s + 1
    Wo = (Wp - k) // s + 1
    m = Ho * Wo

    Cin_p = _round_up(Cin, 8)
    Cout_p = _round_up(Cout, 128)                     # lane-dense output tiles
    tn = 256 if Cout_p % 256 == 0 else 128
    n_co = Cout_p // tn

    # Fold BN (inference running stats) scale into weights; bias stays f32.
    scale = params["gamma"] * jax.lax.rsqrt(params["var"] + _BN_EPS)
    bias = params["beta"] - params["mean"] * scale
    w_hwio = jnp.transpose(w, (2, 3, 1, 0)) * scale           # (k, k, Cin, Cout)
    w_hwio = jnp.pad(w_hwio, ((0, 0), (0, 0), (0, Cin_p - Cin), (0, Cout_p - Cout)))
    w_bf16 = w_hwio.astype(jnp.bfloat16)
    bias_p = jnp.pad(bias, (0, Cout_p - Cout)).reshape(1, Cout_p).astype(jnp.float32)

    # Pad activation (channels + conv halo) once, cast to bf16 for the MXU.
    xp = jnp.pad(x_nhwc, ((0, 0), (pad, pad), (pad, pad), (0, Cin_p - Cin)))
    xp = xp.astype(jnp.bfloat16)

    # Phase decomposition: the sh*sw strided sub-grids of xp partition it, so
    # total HBM bytes == the padded input once (no k*k im2col duplication).
    phase_ids, phases, taps = {}, [], []
    for di in range(k):
        for dj in range(k):
            ph = (di % s, dj % s)
            if ph not in phase_ids:
                phase_ids[ph] = len(phases)
                phases.append(xp[:, ph[0]::s, ph[1]::s, :])
            taps.append((phase_ids[ph], di // s, dj // s, di, dj))

    in_specs = []
    for arr in phases:
        hs, ws = arr.shape[1], arr.shape[2]
        in_specs.append(pl.BlockSpec((1, hs, ws, Cin_p), lambda n, co: (n, 0, 0, 0)))
    in_specs.append(pl.BlockSpec((k, k, Cin_p, tn), lambda n, co: (0, 0, 0, co)))
    in_specs.append(pl.BlockSpec((1, tn), lambda n, co: (0, co)))
    out_spec = pl.BlockSpec((1, m, tn), lambda n, co: (n, 0, co))

    flops = 2 * N * m * k * k * Cin_p * Cout_p
    bytes_accessed = (sum(int(a.size) for a in phases) * 2
                      + int(w_bf16.size) * 2 + int(bias_p.size) * 4
                      + N * m * Cout_p * 4)

    kernel = functools.partial(
        _conv_bn_act_kernel, n_phase=len(phases), taps=tuple(taps),
        ho=Ho, wo=Wo, apply_relu=(act == "relu"))

    # TODO(synk): for very large Ho*Wo (huge feature maps) add a spatial grid
    # axis with halo handling; per-image blocks are ample for rec-ResNet sizes.
    out = pl.pallas_call(
        kernel,
        out_shape=jax.ShapeDtypeStruct((N, m, Cout_p), jnp.float32),
        grid=(N, n_co),
        in_specs=in_specs,
        out_specs=out_spec,
        scratch_shapes=[pltpu.VMEM((m, tn), jnp.float32)],
        compiler_params=_compiler_params(2),
        cost_estimate=pl.CostEstimate(flops=flops, transcendentals=0,
                                      bytes_accessed=bytes_accessed),
    )(*phases, w_bf16, bias_p)

    out = out.reshape(N, Ho, Wo, Cout_p)[..., :Cout]
    return out


# ----------------------------------------------------------------------------
# Plain-JAX glue: vd-mode AvgPool2d(kernel=stride, stride=stride, ceil_mode=True)
# ----------------------------------------------------------------------------
def _avg_pool_ceil_nhwc(x, s):
    # kernel_size == stride == s, padding=0, ceil_mode=True.  PyTorch divides
    # each (possibly boundary-clipped) window by its in-bounds element count.
    if s == 1:
        return x
    N, H, W, C = x.shape
    Ho = -(-H // s)
    Wo = -(-W // s)
    xs = jnp.pad(x, ((0, 0), (0, Ho * s - H), (0, Wo * s - W), (0, 0)))
    sums = xs.reshape(N, Ho, s, Wo, s, C).sum(axis=(2, 4))
    hcnt = jnp.minimum(s, H - jnp.arange(Ho) * s).astype(x.dtype)
    wcnt = jnp.minimum(s, W - jnp.arange(Wo) * s).astype(x.dtype)
    cnt = hcnt[:, None] * wcnt[None, :]
    return sums / cnt[None, :, :, None]


# ----------------------------------------------------------------------------
# ConvBNLayer forward (NCHW in / NCHW out, matching the PyTorch module).
# ----------------------------------------------------------------------------
@functools.partial(jax.jit,
                   static_argnames=("kernel_size", "stride", "groups",
                                    "is_vd_mode", "act"))
def conv_bn_layer(x_nchw, params, *, kernel_size, stride=1, groups=1,
                  is_vd_mode=False, act=None):
    if groups != 1:
        # TODO(synk): grouped conv (groups > 1) not implemented; ResNet-vd uses groups=1.
        raise NotImplementedError("groups > 1 not supported")
    if act not in (None, "relu"):
        raise NotImplementedError(act)
    x = jnp.transpose(x_nchw, (0, 2, 3, 1)).astype(jnp.float32)   # NHWC
    if is_vd_mode:
        x = _avg_pool_ceil_nhwc(x, int(stride))
        conv_stride = 1
    else:
        conv_stride = int(stride)
    y = _fused_conv_bn_act(x, params, int(kernel_size), conv_stride, act)
    return jnp.transpose(y, (0, 3, 1, 2))                         # NCHW


# ----------------------------------------------------------------------------
# Pure-JAX reference (lax.conv) for correctness checking.
# ----------------------------------------------------------------------------
def conv_bn_layer_reference(x_nchw, params, *, kernel_size, stride=1,
                            is_vd_mode=False, act=None):
    x = jnp.transpose(x_nchw, (0, 2, 3, 1)).astype(jnp.float32)
    if is_vd_mode:
        x = _avg_pool_ceil_nhwc(x, int(stride))
        conv_stride = 1
    else:
        conv_stride = int(stride)
    scale = params["gamma"] * jax.lax.rsqrt(params["var"] + _BN_EPS)
    bias = params["beta"] - params["mean"] * scale
    w = jnp.transpose(params["w"], (2, 3, 1, 0)) * scale          # (k,k,Cin,Cout)
    pad = (kernel_size - 1) // 2
    xb = x.astype(jnp.bfloat16).astype(jnp.float32)               # match kernel quantization
    wb = w.astype(jnp.bfloat16).astype(jnp.float32)
    y = jax.lax.conv_general_dilated(
        xb, wb, (conv_stride, conv_stride), ((pad, pad), (pad, pad)),
        dimension_numbers=("NHWC", "HWIO", "NHWC"),
        preferred_element_type=jnp.float32)
    y = y + bias
    if act == "relu":
        y = jnp.maximum(y, 0.0)
    return jnp.transpose(y, (0, 3, 1, 2))


# ----------------------------------------------------------------------------
# Deterministic synthetic parameters + smoke test.
# ----------------------------------------------------------------------------
def init_conv_bn_params(key, in_channels, out_channels, kernel_size):
    kw, kg, kb, km, kv = jax.random.split(key, 5)
    fan_in = in_channels * kernel_size * kernel_size
    return dict(
        w=jax.random.normal(kw, (out_channels, in_channels, kernel_size,
                                 kernel_size), jnp.float32) / jnp.sqrt(fan_in),
        gamma=1.0 + 0.1 * jax.random.normal(kg, (out_channels,), jnp.float32),
        beta=0.1 * jax.random.normal(kb, (out_channels,), jnp.float32),
        mean=0.1 * jax.random.normal(km, (out_channels,), jnp.float32),
        var=1.0 + 0.1 * jnp.abs(jax.random.normal(kv, (out_channels,), jnp.float32)),
    )


if __name__ == "__main__":
    key = jax.random.PRNGKey(0)
    k_x, k_p = jax.random.split(key)
    N, C, H, W = 2, 4, 16, 16
    x = jax.random.normal(k_x, (N, C, H, W), jnp.float32)

    configs = [
        dict(out_channels=64, kernel_size=3, stride=1, is_vd_mode=False, act="relu"),
        dict(out_channels=64, kernel_size=3, stride=2, is_vd_mode=False, act="relu"),
        dict(out_channels=128, kernel_size=1, stride=2, is_vd_mode=True, act=None),
    ]
    for i, cfg in enumerate(configs):
        p = init_conv_bn_params(jax.random.fold_in(k_p, i), C,
                                cfg["out_channels"], cfg["kernel_size"])
        out = conv_bn_layer(x, p, kernel_size=cfg["kernel_size"],
                            stride=cfg["stride"], is_vd_mode=cfg["is_vd_mode"],
                            act=cfg["act"])
        out = jax.block_until_ready(out)
        ref = conv_bn_layer_reference(x, p, kernel_size=cfg["kernel_size"],
                                      stride=cfg["stride"],
                                      is_vd_mode=cfg["is_vd_mode"],
                                      act=cfg["act"])
        assert out.shape == ref.shape, (out.shape, ref.shape)
        err = float(jnp.max(jnp.abs(out - ref)))
        assert err < 2e-2, f"config {i}: max abs err {err}"
    print("KERNEL_OK")
</pallas_src>

<mosaic_0001>
module attributes {stable_mosaic.version = 11 : i64} {
  func.func @_conv_bn_act_kernel(%arg0: i32, %arg1: i32, %arg2: memref<1x18x18x8xbf16, #tpu.memory_space<vmem>>, %arg3: memref<3x3x8x128xbf16, #tpu.memory_space<vmem>>, %arg4: memref<1x128xf32, #tpu.memory_space<vmem>>, %arg5: memref<1x256x128xf32, #tpu.memory_space<vmem>>, %arg6: memref<256x128xf32, #tpu.memory_space<vmem>>) attributes {dimension_semantics = [#tpu.dimension_semantics<parallel>, #tpu.dimension_semantics<parallel>], iteration_bounds = array<i64: 2, 1>, scalar_prefetch = 0 : i64, scratch_operands = 1 : i64, tpu.core_type = #tpu.core_type<tc>, window_params = [{transform_indices = @transform_0, window_bounds = array<i64: 1, 18, 18, 8>}, {transform_indices = @transform_1, window_bounds = array<i64: 3, 3, 8, 128>}, {transform_indices = @transform_2, window_bounds = array<i64: 1, 128>}, {transform_indices = @transform_3, window_bounds = array<i64: 1, 256, 128>}]} {
    %c0 = arith.constant 0 : index
    %c0_0 = arith.constant 0 : index
    %c0_1 = arith.constant 0 : index
    %c0_2 = arith.constant 0 : index
    %0 = vector.load %arg2[%c0, %c0_0, %c0_1, %c0_2] : memref<1x18x18x8xbf16, #tpu.memory_space<vmem>>, vector<1x16x16x8xbf16>
    %1 = vector.shape_cast %0 : vector<1x16x16x8xbf16> to vector<16x16x8xbf16>
    %2 = vector.shape_cast %1 : vector<16x16x8xbf16> to vector<256x8xbf16>
    %c0_3 = arith.constant 0 : index
    %c0_4 = arith.constant 0 : index
    %c0_5 = arith.constant 0 : index
    %c0_6 = arith.constant 0 : index
    %3 = vector.load %arg3[%c0_3, %c0_4, %c0_5, %c0_6] : memref<3x3x8x128xbf16, #tpu.memory_space<vmem>>, vector<1x1x8x128xbf16>
    %4 = vector.shape_cast %3 : vector<1x1x8x128xbf16> to vector<8x128xbf16>
    %cst = arith.constant dense<0.000000e+00> : vector<256x128xf32>
    %5 = tpu.matmul %2, %4, %cst {dimension_numbers = #tpu.dot_dimension_numbers<[1], [0], [0], [1], [0, 0, 1, 1], [], []>} : vector<256x8xbf16>, vector<8x128xbf16>, vector<256x128xf32> -> vector<256x128xf32>
    %c0_7 = arith.constant 0 : index
    %c0_8 = arith.constant 0 : index
    %6 = vector.load %arg6[%c0_7, %c0_8] : memref<256x128xf32, #tpu.memory_space<vmem>>, vector<256x128xf32>
    tpu.vector_store %arg6[%c0_7, %c0_8], %5 {strides = array<i32>} : memref<256x128xf32, #tpu.memory_space<vmem>>, vector<256x128xf32>,
    %c0_9 = arith.constant 0 : index
    %c0_10 = arith.constant 0 : index
    %c1 = arith.constant 1 : index
    %c0_11 = arith.constant 0 : index
    %7 = vector.load %arg2[%c0_9, %c0_10, %c1, %c0_11] : memref<1x18x18x8xbf16, #tpu.memory_space<vmem>>, vector<1x16x16x8xbf16>
    %8 = vector.shape_cast %7 : vector<1x16x16x8xbf16> to vector<16x16x8xbf16>
    %9 = vector.shape_cast %8 : vector<16x16x8xbf16> to vector<256x8xbf16>
    %c0_12 = arith.constant 0 : index
    %c1_13 = arith.constant 1 : index
    %c0_14 = arith.constant 0 : index
    %c0_15 = arith.constant 0 : index
    %10 = vector.load %arg3[%c0_12, %c1_13, %c0_14, %c0_15] : memref<3x3x8x128xbf16, #tpu.memory_space<vmem>>, vector<1x1x8x128xbf16>
    %11 = vector.shape_cast %10 : vector<1x1x8x128xbf16> to vector<8x128xbf16>
    %cst_16 = arith.constant dense<0.000000e+00> : vector<256x128xf32>
    %12 = tpu.matmul %9, %11, %cst_16 {dimension_numbers = #tpu.dot_dimension_numbers<[1], [0], [0], [1], [0, 0, 1, 1], [], []>} : vector<256x8xbf16>, vector<8x128xbf16>, vector<256x128xf32> -> vector<256x128xf32>
    %c0_17 = arith.constant 0 : index
    %c0_18 = arith.constant 0 : index
    %13 = vector.load %arg6[%c0_17, %c0_18] : memref<256x128xf32, #tpu.memory_space<vmem>>, vector<256x128xf32>
    %14 = arith.addf %13, %12 : vector<256x128xf32>
    %c0_19 = arith.constant 0 : index
    %c0_20 = arith.constant 0 : index
    %15 = vector.load %arg6[%c0_19, %c0_20] : memref<256x128xf32, #tpu.memory_space<vmem>>, vector<256x128xf32>
    tpu.vector_store %arg6[%c0_19, %c0_20], %14 {strides = array<i32>} : memref<256x128xf32, #tpu.memory_space<vmem>>, vector<256x128xf32>,
    %c0_21 = arith.constant 0 : index
    %c0_22 = arith.constant 0 : index
    %c2 = arith.constant 2 : index
    %c0_23 = arith.constant 0 : index
    %16 = vector.load %arg2[%c0_21, %c0_22, %c2, %c0_23] : memref<1x18x18x8xbf16, #tpu.memory_space<vmem>>, vector<1x16x16x8xbf16>
    %17 = vector.shape_cast %16 : vector<1x16x16x8xbf16> to vector<16x16x8xbf16>
    %18 = vector.shape_cast %17 : vector<16x16x8xbf16> to vector<256x8xbf16>
    %c0_24 = arith.constant 0 : index
    %c2_25 = arith.constant 2 : index
    %c0_26 = arith.constant 0 : index
    %c0_27 = arith.constant 0 : index
    %19 = vector.load %arg3[%c0_24, %c2_25, %c0_26, %c0_27] : memref<3x3x8x128xbf16, #tpu.memory_space<vmem>>, vector<1x1x8x128xbf16>
    %20 = vector.shape_cast %19 : vector<1x1x8x128xbf16> to vector<8x128xbf16>
    %cst_28 = arith.constant dense<0.000000e+00> : vector<256x128xf32>
    %21 = tpu.matmul %18, %20, %cst_28 {dimension_numbers = #tpu.dot_dimension_numbers<[1], [0], [0], [1], [0, 0, 1, 1], [], []>} : vector<256x8xbf16>, vector<8x128xbf16>, vector<256x128xf32> -> vector<256x128xf32>
    %c0_29 = arith.constant 0 : index
    %c0_30 = arith.constant 0 : index
    %22 = vector.load %arg6[%c0_29, %c0_30] : memref<256x128xf32, #tpu.memory_space<vmem>>, vector<256x128xf32>
    %23 = arith.addf %22, %21 : vector<256x128xf32>
    %c0_31 = arith.constant 0 : index
    %c0_32 = arith.constant 0 : index
    %24 = vector.load %arg6[%c0_31, %c0_32] : memref<256x128xf32, #tpu.memory_space<vmem>>, vector<256x128xf32>
    tpu.vector_store %arg6[%c0_31, %c0_32], %23 {strides = array<i32>} : memref<256x128xf32, #tpu.memory_space<vmem>>, vector<256x128xf32>,
    %c0_33 = arith.constant 0 : index
    %c1_34 = arith.constant 1 : index
    %c0_35 = arith.constant 0 : index
    %c0_36 = arith.constant 0 : index
    %25 = vector.load %arg2[%c0_33, %c1_34, %c0_35, %c0_36] : memref<1x18x18x8xbf16, #tpu.memory_space<vmem>>, vector<1x16x16x8xbf16>
    %26 = vector.shape_cast %25 : vector<1x16x16x8xbf16> to vector<16x16x8xbf16>
    %27 = vector.shape_cast %26 : vector<16x16x8xbf16> to vector<256x8xbf16>
    %c1_37 = arith.constant 1 : index
    %c0_38 = arith.constant 0 : index
    %c0_39 = arith.constant 0 : index
    %c0_40 = arith.constant 0 : index
    %28 = vector.load %arg3[%c1_37, %c0_38, %c0_39, %c0_40] : memref<3x3x8x128xbf16, #tpu.memory_space<vmem>>, vector<1x1x8x128xbf16>
    %29 = vector.shape_cast %28 : vector<1x1x8x128xbf16> to vector<8x128xbf16>
    %cst_41 = arith.constant dense<0.000000e+00> : vector<256x128xf32>
    %30 = tpu.matmul %27, %29, %cst_41 {dimension_numbers = #tpu.dot_dimension_numbers<[1], [0], [0], [1], [0, 0, 1, 1], [], []>} : vector<256x8xbf16>, vector<8x128xbf16>, vector<256x128xf32> -> vector<256x128xf32>
    %c0_42 = arith.constant 0 : index
    %c0_43 = arith.constant 0 : index
    %31 = vector.load %arg6[%c0_42, %c0_43] : memref<256x128xf32, #tpu.memory_space<vmem>>, vector<256x128xf32>
    %32 = arith.addf %31, %30 : vector<256x128xf32>
    %c0_44 = arith.constant 0 : index
    %c0_45 = arith.constant 0 : index
    %33 = vector.load %arg6[%c0_44, %c0_45] : memref<256x128xf32, #tpu.memory_space<vmem>>, vector<256x128xf32>
    tpu.vector_store %arg6[%c0_44, %c0_45], %32 {strides = array<i32>} : memref<256x128xf32, #tpu.memory_space<vmem>>, vector<256x128xf32>,
    %c0_46 = arith.constant 0 : index
    %c1_47 = arith.constant 1 : index
    %c1_48 = arith.constant 1 : index
    %c0_49 = arith.constant 0 : index
    %34 = vector.load %arg2[%c0_46, %c1_47, %c1_48, %c0_49] : memref<1x18x18x8xbf16, #tpu.memory_space<vmem>>, vector<1x16x16x8xbf16>
    %35 = vector.shape_cast %34 : vector<1x16x16x8xbf16> to vector<16x16x8xbf16>
    %36 = vector.shape_cast %35 : vector<16x16x8xbf16> to vector<256x8xbf16>
    %c1_50 = arith.constant 1 : index
    %c1_51 = arith.constant 1 : index
    %c0_52 = arith.constant 0 : index
    %c0_53 = arith.constant 0 : index
    %37 = vector.load %arg3[%c1_50, %c1_51, %c0_52, %c0_53] : memref<3x3x8x128xbf16, #tpu.memory_space<vmem>>, vector<1x1x8x128xbf16>
    %38 = vector.shape_cast %37 : vector<1x1x8x128xbf16> to vector<8x128xbf16>
    %cst_54 = arith.constant dense<0.000000e+00> : vector<256x128xf32>
    %39 = tpu.matmul %36, %38, %cst_54 {dimension_numbers = #tpu.dot_dimension_numbers<[1], [0], [0], [1], [0, 0, 1, 1], [], []>} : vector<256x8xbf16>, vector<8x128xbf16>, vector<256x128xf32> -> vector<256x128xf32>
    %c0_55 = arith.constant 0 : index
    %c0_56 = arith.constant 0 : index
    %40 = vector.load %arg6[%c0_55, %c0_56] : memref<256x128xf32, #tpu.memory_space<vmem>>, vector<256x128xf32>
    %41 = arith.addf %40, %39 : vector<256x128xf32>
    %c0_57 = arith.constant 0 : index
    %c0_58 = arith.constant 0 : index
    %42 = vector.load %arg6[%c0_57, %c0_58] : memref<256x128xf32, #tpu.memory_space<vmem>>, vector<256x128xf32>
    tpu.vector_store %arg6[%c0_57, %c0_58], %41 {strides = array<i32>} : memref<256x128xf32, #tpu.memory_space<vmem>>, vector<256x128xf32>,
    %c0_59 = arith.constant 0 : index
    %c1_60 = arith.constant 1 : index
    %c2_61 = arith.constant 2 : index
    %c0_62 = arith.constant 0 : index
    %43 = vector.load %arg2[%c0_59, %c1_60, %c2_61, %c0_62] : memref<1x18x18x8xbf16, #tpu.memory_space<vmem>>, vector<1x16x16x8xbf16>
    %44 = vector.shape_cast %43 : vector<1x16x16x8xbf16> to vector<16x16x8xbf16>
    %45 = vector.shape_cast %44 : vector<16x16x8xbf16> to vector<256x8xbf16>
    %c1_63 = arith.constant 1 : index
    %c2_64 = arith.constant 2 : index
    %c0_65 = arith.constant 0 : index
    %c0_66 = arith.constant 0 : index
    %46 = vector.load %arg3[%c1_63, %c2_64, %c0_65, %c0_66] : memref<3x3x8x128xbf16, #tpu.memory_space<vmem>>, vector<1x1x8x128xbf16>
    %47 = vector.shape_cast %46 : vector<1x1x8x128xbf16> to vector<8x128xbf16>
    %cst_67 = arith.constant dense<0.000000e+00> : vector<256x128xf32>
    %48 = tpu.matmul %45, %47, %cst_67 {dimension_numbers = #tpu.dot_dimension_numbers<[1], [0], [0], [1], [0, 0, 1, 1], [], []>} : vector<256x8xbf16>, vector<8x128xbf16>, vector<256x128xf32> -> vector<256x128xf32>
    %c0_68 = arith.constant 0 : index
    %c0_69 = arith.constant 0 : index
    %49 = vector.load %arg6[%c0_68, %c0_69] : memref<256x128xf32, #tpu.memory_space<vmem>>, vector<256x128xf32>
    %50 = arith.addf %49, %48 : vector<256x128xf32>
    %c0_70 = arith.constant 0 : index
    %c0_71 = arith.constant 0 : index
    %51 = vector.load %arg6[%c0_70, %c0_71] : memref<256x128xf32, #tpu.memory_space<vmem>>, vector<256x128xf32>
    tpu.vector_store %arg6[%c0_70, %c0_71], %50 {strides = array<i32>} : memref<256x128xf32, #tpu.memory_space<vmem>>, vector<256x128xf32>,
    %c0_72 = arith.constant 0 : index
    %c2_73 = arith.constant 2 : index
    %c0_74 = arith.constant 0 : index
    %c0_75 = arith.constant 0 : index
    %52 = vector.load %arg2[%c0_72, %c2_73, %c0_74, %c0_75] : memref<1x18x18x8xbf16, #tpu.memory_space<vmem>>, vector<1x16x16x8xbf16>
    %53 = vector.shape_cast %52 : vector<1x16x16x8xbf16> to vector<16x16x8xbf16>
    %54 = vector.shape_cast %53 : vector<16x16x8xbf16> to vector<256x8xbf16>
    %c2_76 = arith.constant 2 : index
    %c0_77 = arith.constant 0 : index
    %c0_78 = arith.constant 0 : index
    %c0_79 = arith.constant 0 : index
    %55 = vector.load %arg3[%c2_76, %c0_77, %c0_78, %c0_79] : memref<3x3x8x128xbf16, #tpu.memory_space<vmem>>, vector<1x1x8x128xbf16>
    %56 = vector.shape_cast %55 : vector<1x1x8x128xbf16> to vector<8x128xbf16>
    %cst_80 = arith.constant dense<0.000000e+00> : vector<256x128xf32>
    %57 = tpu.matmul %54, %56, %cst_80 {dimension_numbers = #tpu.dot_dimension_numbers<[1], [0], [0], [1], [0, 0, 1, 1], [], []>} : vector<256x8xbf16>, vector<8x128xbf16>, vector<256x128xf32> -> vector<256x128xf32>
    %c0_81 = arith.constant 0 : index
    %c0_82 = arith.constant 0 : index
    %58 = vector.load %arg6[%c0_81, %c0_82] : memref<256x128xf32, #tpu.memory_space<vmem>>, vector<256x128xf32>
    %59 = arith.addf %58, %57 : vector<256x128xf32>
    %c0_83 = arith.constant 0 : index
    %c0_84 = arith.constant 0 : index
    %60 = vector.load %arg6[%c0_83, %c0_84] : memref<256x128xf32, #tpu.memory_space<vmem>>, vector<256x128xf32>
    tpu.vector_store %arg6[%c0_83, %c0_84], %59 {strides = array<i32>} : memref<256x128xf32, #tpu.memory_space<vmem>>, vector<256x128xf32>,
    %c0_85 = arith.constant 0 : index
    %c2_86 = arith.constant 2 : index
    %c1_87 = arith.constant 1 : index
    %c0_88 = arith.constant 0 : index
    %61 = vector.load %arg2[%c0_85, %c2_86, %c1_87, %c0_88] : memref<1x18x18x8xbf16, #tpu.memory_space<vmem>>, vector<1x16x16x8xbf16>
    %62 = vector.shape_cast %61 : vector<1x16x16x8xbf16> to vector<16x16x8xbf16>
    %63 = vector.shape_cast %62 : vector<16x16x8xbf16> to vector<256x8xbf16>
    %c2_89 = arith.constant 2 : index
    %c1_90 = arith.constant 1 : index
    %c0_91 = arith.constant 0 : index
    %c0_92 = arith.constant 0 : index
    %64 = vector.load %arg3[%c2_89, %c1_90, %c0_91, %c0_92] : memref<3x3x8x128xbf16, #tpu.memory_space<vmem>>, vector<1x1x8x128xbf16>
    %65 = vector.shape_cast %64 : vector<1x1x8x128xbf16> to vector<8x128xbf16>
    %cst_93 = arith.constant dense<0.000000e+00> : vector<256x128xf32>
    %66 = tpu.matmul %63, %65, %cst_93 {dimension_numbers = #tpu.dot_dimension_numbers<[1], [0], [0], [1], [0, 0, 1, 1], [], []>} : vector<256x8xbf16>, vector<8x128xbf16>, vector<256x128xf32> -> vector<256x128xf32>
    %c0_94 = arith.constant 0 : index
    %c0_95 = arith.constant 0 : index
    %67 = vector.load %arg6[%c0_94, %c0_95] : memref<256x128xf32, #tpu.memory_space<vmem>>, vector<256x128xf32>
    %68 = arith.addf %67, %66 : vector<256x128xf32>
    %c0_96 = arith.constant 0 : index
    %c0_97 = arith.constant 0 : index
    %69 = vector.load %arg6[%c0_96, %c0_97] : memref<256x128xf32, #tpu.memory_space<vmem>>, vector<256x128xf32>
    tpu.vector_store %arg6[%c0_96, %c0_97], %68 {strides = array<i32>} : memref<256x128xf32, #tpu.memory_space<vmem>>, vector<256x128xf32>,
    %c0_98 = arith.constant 0 : index
    %c2_99 = arith.constant 2 : index
    %c2_100 = arith.constant 2 : index
    %c0_101 = arith.constant 0 : index
    %70 = vector.load %arg2[%c0_98, %c2_99, %c2_100, %c0_101] : memref<1x18x18x8xbf16, #tpu.memory_space<vmem>>, vector<1x16x16x8xbf16>
    %71 = vector.shape_cast %70 : vector<1x16x16x8xbf16> to vector<16x16x8xbf16>
    %72 = vector.shape_cast %71 : vector<16x16x8xbf16> to vector<256x8xbf16>
    %c2_102 = arith.constant 2 : index
    %c2_103 = arith.constant 2 : index
    %c0_104 = arith.constant 0 : index
    %c0_105 = arith.constant 0 : index
    %73 = vector.load %arg3[%c2_102, %c2_103, %c0_104, %c0_105] : memref<3x3x8x128xbf16, #tpu.memory_space<vmem>>, vector<1x1x8x128xbf16>
    %74 = vector.shape_cast %73 : vector<1x1x8x128xbf16> to vector<8x128xbf16>
    %cst_106 = arith.constant dense<0.000000e+00> : vector<256x128xf32>
    %75 = tpu.matmul %72, %74, %cst_106 {dimension_numbers = #tpu.dot_dimension_numbers<[1], [0], [0], [1], [0, 0, 1, 1], [], []>} : vector<256x8xbf16>, vector<8x128xbf16>, vector<256x128xf32> -> vector<256x128xf32>
    %c0_107 = arith.constant 0 : index
    %c0_108 = arith.constant 0 : index
    %76 = vector.load %arg6[%c0_107, %c0_108] : memref<256x128xf32, #tpu.memory_space<vmem>>, vector<256x128xf32>
    %77 = arith.addf %76, %75 : vector<256x128xf32>
    %c0_109 = arith.constant 0 : index
    %c0_110 = arith.constant 0 : index
    %78 = vector.load %arg6[%c0_109, %c0_110] : memref<256x128xf32, #tpu.memory_space<vmem>>, vector<256x128xf32>
    tpu.vector_store %arg6[%c0_109, %c0_110], %77 {strides = array<i32>} : memref<256x128xf32, #tpu.memory_space<vmem>>, vector<256x128xf32>,
    %c0_111 = arith.constant 0 : index
    %c0_112 = arith.constant 0 : index
    %79 = vector.load %arg6[%c0_111, %c0_112] : memref<256x128xf32, #tpu.memory_space<vmem>>, vector<256x128xf32>
    %c0_113 = arith.constant 0 : index
    %c0_114 = arith.constant 0 : index
    %80 = vector.load %arg4[%c0_113, %c0_114] : memref<1x128xf32, #tpu.memory_space<vmem>>, vector<1x128xf32>
    %81 = vector.broadcast %80 : vector<1x128xf32> to vector<256x128xf32>
    %82 = arith.addf %79, %81 : vector<256x128xf32>
    %cst_115 = arith.constant 0.000000e+00 : f32
    %83 = vector.broadcast %cst_115 : f32 to vector<256x128xf32>
    %84 = arith.maximumf %82, %83 : vector<256x128xf32>
    %c0_116 = arith.constant 0 : index
    %c0_117 = arith.constant 0 : index
    %c0_118 = arith.constant 0 : index
    %85 = vector.load %arg5[%c0_116, %c0_117, %c0_118] : memref<1x256x128xf32, #tpu.memory_space<vmem>>, vector<1x256x128xf32>
    %86 = vector.shape_cast %85 : vector<1x256x128xf32> to vector<256x128xf32>
    %87 = vector.shape_cast %84 : vector<256x128xf32> to vector<1x256x128xf32>
    tpu.vector_store %arg5[%c0_116, %c0_117, %c0_118], %87 {strides = array<i32>} : memref<1x256x128xf32, #tpu.memory_space<vmem>>, vector<1x256x128xf32>,
    return
  }
  func.func @transform_0(%arg0: i32, %arg1: i32) -> (i32, i32, i32, i32) {
    %c0_i32 = arith.constant 0 : i32
    %c0_i32_0 = arith.constant 0 : i32
    %c0_i32_1 = arith.constant 0 : i32
    %c0_i32_2 = arith.constant 0 : i32
    return %arg0, %c0_i32, %c0_i32_0, %c0_i32_1 : i32, i32, i32, i32
  }
  func.func @transform_1(%arg0: i32, %arg1: i32) -> (i32, i32, i32, i32) {
    %c0_i32 = arith.constant 0 : i32
    %c0_i32_0 = arith.constant 0 : i32
    %c0_i32_1 = arith.constant 0 : i32
    %c0_i32_2 = arith.constant 0 : i32
    return %c0_i32, %c0_i32_0, %c0_i32_1, %arg1 : i32, i32, i32, i32
  }
  func.func @transform_2(%arg0: i32, %arg1: i32) -> (i32, i32) {
    %c0_i32 = arith.constant 0 : i32
    %c0_i32_0 = arith.constant 0 : i32
    return %c0_i32, %arg1 : i32, i32
  }
  func.func @transform_3(%arg0: i32, %arg1: i32) -> (i32, i32, i32) {
    %c0_i32 = arith.constant 0 : i32
    %c0_i32_0 = arith.constant 0 : i32
    return %arg0, %c0_i32, %arg1 : i32, i32, i32
  }
}

</mosaic_0001>

<bundles_post_ra>
// kernel: conv_bn_layer.1
= control target key start
LH: loop header
LB: loop body
LE: loop exit
PB: predicated region body
PF: predicated region fallthrough
CT: control target
= control target key end

     0   :  { %s7201_s12 = smov 0   ;;  %s7203_s13 = smov 0   ;;  %s8572_s0 = inlined_call_operand.vmem [shape: bf16[2,18,18,8], index: 0, kind: input, shape index: {}]   ;;  %s8573_s1 = inlined_call_operand.vmem [shape: bf16[3,3,8,128], index: 1, kind: input, shape index: {}]   ;;  %s8574_s2 = inlined_call_operand.vmem [shape: f32[1,128], index: 2, kind: input, shape index: {}]   ;;  %s8575_s3 = inlined_call_operand.vmem [shape: f32[2,256,128], index: 3, kind: output, shape index: {}]  }
   0x1   :  { %s7205_s14 = smov 0  }
   0x2 LB: > { %s25_s15 = sadd.s32 1, %s7175_s13  ;;  %p5748_p0 = scmp.ge.s32.totalorder %s7179_s14, 1  ;;  %s7179_s14 = sphi %s7205_s14, %s13_s14   ;;  %s7175_s13 = sphi %s7203_s13, %s8581_s13   ;;  %s7171_s12 = sphi %s7201_s12, %s8580_s12  }
   0x3   : > { %p27_p1 = scmp.ge.s32.totalorder %s25_s15, 2  ;;  %p168_p2 = scmp.lt.s32.totalorder %s7179_s14, 3 }
   0x5   : > { %s8583_s15 = smov (%p27_p1, %s25_s15), 0  ;;  %p169_p3 = pnand %p5748_p0, %p168_p2 }
   0x6   : > { %v255_v0 = vld [vmem:[%s8573_s1] sm:$0xf] (!%p169_p3)  ;;  %vm385_vm0 = vcmask (!%p169_p3), 1043456   ;;  %p202_p4 = scmp.lt.s32.totalorder (!%p169_p3), %s7171_s12, 1  ;;  %v5979_v2 = vld [vmem:[%s8573_s1 + $0x10] sm:$0xf] (!%p169_p3) }
   0x7   : > { %172 = sbr.rel (%p169_p3) target bundleno = 543 (0x21f), region = 32  ;;  %7073 = vmatprep.subr.msk.bf16.mxu1 (!%p169_p3), %vm385_vm0, %v255_v0  ;;  %v387_v1 = vsel (!%p169_p3), %vm385_vm0, %v255_v0, 0  ;;  %v5784_v3 = vld [vmem:[%s8573_s1 + $0x4] sm:$0xf] (!%p169_p3)  ;;  %7077 = vmatprep.subr.msk.bf16.mxu0 (!%p169_p3), %vm385_vm0, %v5979_v2  ;;  %v7234_v4 = vsel (!%p169_p3), %vm385_vm0, %v5979_v2, 0  ;;  %vm336_vm1 = vcmask (!%p169_p3), 64512  }
   0x8   : > { %6510 = vmatpush3.bf16.msra.mxu1 (!%p169_p3), %v387_v1  ;;  %6646 = vmatpush3.bf16.msra.mxu0 (!%p169_p3), %v7234_v4  ;;  %v6076_v5 = vld [vmem:[%s8573_s1 + $0x14] sm:$0xf] (!%p169_p3)  ;;  %vm630_vm2 = vsmask.f32 (!%p169_p3), 3328  ;;  %vm631_vm3 = vsmask.f32 (!%p169_p3), 7440 }
   0x9   : > { %7074 = vmatprep.subr.msk.bf16.mxu1 (!%p169_p3), %vm385_vm0, %v5784_v3  ;;  %7079 = vmatprep.subr.msk.bf16.mxu0 (!%p169_p3), %vm385_vm0, %v6076_v5  ;;  %v7251_v6 = vld [vmem:[%s8573_s1 + $0x18] sm:$0xf] (!%p169_p3)  ;;  %v5833_v7 = vld [vmem:[%s8573_s1 + $0x8] sm:$0xf] (!%p169_p3)  ;;  %v7259_v8 = vld [vmem:[%s8573_s1 + $0x1c] sm:$0xf] (!%p169_p3) }
   0xa   : > { %v1116_v10 = vsel (!%p169_p3), %vm385_vm0, %v5784_v3, 0  ;;  %v7265_v12 = vsel (!%p169_p3), %vm385_vm0, %v6076_v5, 0  ;;  %v7271_v14 = vsel (!%p169_p3), %vm385_vm0, %v7251_v6, 0  ;;  %v7275_v15 = vsel (!%p169_p3), %vm385_vm0, %v5833_v7, 0  ;;  %vm7293_vm4 = vmor (!%p169_p3), %vm630_vm2, %vm631_vm3 }
   0xb   : > { %v7279_v16 = vsel (!%p169_p3), %vm385_vm0, %v7259_v8, 0  ;;  %vm1471_vm5 = vcmask (!%p169_p3), 1042432   ;;  %vm1472_vm6 = vcmask (!%p169_p3), 1046532  }
   0xc   : > { %vm7368_vm7 = vmor (!%p169_p3), %vm1471_vm5, %vm1472_vm6 }
   0xe   : > { %s8585_s12 = smov (!%p202_p4, %s7171_s12), 1 }
   0xf   : > { %s7083_s24 = smul.u32 216, %s8585_s12  ;;  %s6355_s19 = sshll.u32 %s8585_s12, 8 }
  0x10   : > { %s8494_s22 = scalar_lea.vmem %s8575_s3, %s6355_s19 }
  0x11   : > { %s7246_s27 = scalar_lea.vmem %s8572_s0, %s7083_s24 }
  0x12   : > { %v7108_v9 = vld [vmem:[%s7246_s27] sm:$0xff]   ;;  %v7109_v11 = vld [vmem:[%s7246_s27 + $0xc] sm:$0xff]   ;;  %v7110_v13 = vld [vmem:[%s7246_s27 + $0x18] sm:$0xff]  }
  0x13   : > { %6511 = vmatprep.mubr.msk.bf16.mxu1 %vm336_vm1, %v7108_v9  ;;  %v5931_v17 = vld [vmem:[%s7246_s27 + $0xc] sm:$0xf]  ;;  %v5932_v18 = vld [vmem:[%s7246_s27 + $0x10] sm:$0xf]  ;;  %v5933_v19 = vld [vmem:[%s7246_s27 + $0x14] sm:$0x1] }
  0x14   : > { %6512 = vmatmul.mubr.msk.bf16.vlgmr.msra.gmra.mrb[0].mxu1 %vm336_vm1, %v7109_v11  ;;  %v7111_v20 = vld [vmem:[%s7246_s27 + $0x24] sm:$0xff]   ;;  %v2416_v21 = vshrl.u32 %v5931_v17, 16  ;;  %v2419_v22 = vshll.u32 %v5931_v17, 16  ;;  %v2425_v23 = vshll.u32 %v5932_v18, 16  ;;  %v2429_v24 = vshrl.u32 %v5932_v18, 16  ;;  %v7112_v42 = vld [vmem:[%s7246_s27 + $0x30] sm:$0xff]  }
  0x15   : > { %6515 = vmatprep.mubr.msk.bf16.mxu1 %vm336_vm1, %v7110_v13  ;;  %6544 = vmatpush3.bf16.msra.mxu1 %v1116_v10  ;;  %v5934_v25 = vld [vmem:[%s7246_s27 + $0x18] sm:$0xf]  ;;  %v2435_v26 = vshll.u32 %v5933_v19, 16  ;;  %v5935_v27 = vld [vmem:[%s7246_s27 + $0x1c] sm:$0xf] }
  0x16   : > { %7075 = vmatprep.subr.msk.bf16.mxu1 %vm385_vm0, %v5833_v7  ;;  %v5936_v28 = vld [vmem:[%s7246_s27 + $0x20] sm:$0x1]  ;;  %v2440_v29 = vshrl.u32 %v5934_v25, 16  ;;  %v2418_v30 = vrot.slane %v2416_v21, 4  ;;  %v2421_v31 = vrot.slane %v2419_v22, 5  ;;  %v2427_v32 = vrot.slane %v2425_v23, 5 }
  0x17   : > { %v2431_v33 = vrot.slane %v2429_v24, 4  ;;  %v2437_v34 = vrot.slane %v2435_v26, 5  ;;  %v2443_v36 = vshll.u32 %v5934_v25, 16  ;;  %v2449_v37 = vshll.u32 %v5935_v27, 16  ;;  %v5937_v46 = vld [vmem:[%s7246_s27 + $0x24] sm:$0xf] }
  0x18   : > { %v2442_v35 = vrot.slane %v2440_v29, 4  ;;  %v2422_v38 = vor.u32 %v2421_v31, %v2418_v30  ;;  %v2453_v40 = vshrl.u32 %v5935_v27, 16  ;;  %v2459_v41 = vshll.u32 %v5936_v28, 16  ;;  %v5938_v51 = vld [vmem:[%s7246_s27 + $0x28] sm:$0xf]  ;;  %v7113_v60 = vld [vmem:[%s7246_s27 + $0x3c] sm:$0xff]  }
  0x19   : > { %v2432_v39 = vor.u32 %v2431_v33, %v2427_v32  ;;  %v2445_v44 = vrot.slane %v2443_v36, 5  ;;  %v2451_v45 = vrot.slane %v2449_v37, 5  ;;  %v5939_v53 = vld [vmem:[%s7246_s27 + $0x2c] sm:$0x1]  ;;  %v2464_v54 = vshrl.u32 %v5937_v46, 16 }
  0x1a   : > { %v2423_v47 = vrot.slane %v2422_v38, 4  ;;  %v2455_v49 = vrot.slane %v2453_v40, 4  ;;  %v2461_v50 = vrot.slane %v2459_v41, 5  ;;  %v2467_v55 = vshll.u32 %v5937_v46, 16  ;;  %v5940_v62 = vld [vmem:[%s7246_s27 + $0x30] sm:$0xf] }
  0x1b   : > { %v2433_v48 = vrot.slane %v2432_v39, 4  ;;  %v2446_v52 = vor.u32 %v2445_v44, %v2442_v35  ;;  %v2473_v56 = vshll.u32 %v5938_v51, 16  ;;  %v2477_v61 = vshrl.u32 %v5938_v51, 16  ;;  %v5941_v63 = vld [vmem:[%s7246_s27 + $0x34] sm:$0xf]  ;;  %v7114_v7 = vld [vmem:[%s7246_s27 + $0x48] sm:$0xff]  }
  0x1c   : > { %6516 = vmatmul.mubr.msk.bf16.gmra.mrb[4].mxu1 %vm336_vm1, %v7111_v20  ;;  %v2428_v57 = vsel %vm7293_vm4, %v2423_v47, %v2427_v32  ;;  %v2456_v59 = vor.u32 %v2455_v49, %v2451_v45  ;;  %v2466_v2 = vrot.slane %v2464_v54, 4  ;;  %v2469_v3 = vrot.slane %v2467_v55, 5  ;;  %v5942_v5 = vld [vmem:[%s7246_s27 + $0x38] sm:$0x1]  ;;  %v5943_v25 = vld [vmem:[%s7246_s27 + $0x3c] sm:$0xf] }
  0x1d   : > { %6519 = vmatprep.mubr.msk.bf16.mxu1 %vm336_vm1, %v7112_v42  ;;  %v2438_v58 = vsel %vm7293_vm4, %v2433_v48, %v2437_v34  ;;  %v2447_v1 = vrot.slane %v2446_v52, 4  ;;  %v2475_v10 = vrot.slane %v2473_v56, 5  ;;  %v2479_v11 = vrot.slane %v2477_v61, 4  ;;  %v5944_v30 = vld [vmem:[%s7246_s27 + $0x40] sm:$0xf]  ;;  %v7115_v49 = vld [vmem:[%s7246_s27 + $0x54] sm:$0xff]  }
  0x1e   : > { %v5980_v0 = vcombine.low %v2428_v57, %v2438_v58  ;;  %v2457_v9 = vrot.slane %v2456_v59, 4  ;;  %v2483_v13 = vshll.u32 %v5939_v53, 16  ;;  %v2470_v18 = vor.u32 %v2469_v3, %v2466_v2  ;;  %v5945_v37 = vld [vmem:[%s7246_s27 + $0x44] sm:$0x1]  ;;  %v5946_v40 = vld [vmem:[%s7246_s27 + $0x48] sm:$0xf] }
  0x1f   : > { %v2452_v17 = vsel %vm7293_vm4, %v2447_v1, %v2451_v45  ;;  %v2488_v19 = vshrl.u32 %v5940_v62, 16  ;;  %v2491_v20 = vshll.u32 %v5940_v62, 16  ;;  %v2480_v22 = vor.u32 %v2479_v11, %v2475_v10  ;;  %v5947_v46 = vld [vmem:[%s7246_s27 + $0x4c] sm:$0xf]  ;;  %v5948_v52 = vld [vmem:[%s7246_s27 + $0x50] sm:$0x1] }
  0x20   : > { %6647 = vmatprep.mubr.msk.bf16.mxu0 %vm336_vm1, %v5980_v0  ;;  %v2462_v21 = vsel %vm7293_vm4, %v2457_v9, %v2461_v50  ;;  %v2485_v23 = vrot.slane %v2483_v13, 5  ;;  %v2497_v24 = vshll.u32 %v5941_v63, 16  ;;  %v2471_v27 = vrot.slane %v2470_v18, 4  ;;  %v7116_v56 = vld [vmem:[%s7246_s27 + $0x60] sm:$0xff]   ;;  %v5950_v13 = vld [vmem:[%s7246_s27 + $0x58] sm:$0xf] }
  0x21   : > { %v5981_v26 = vcombine.low %v2452_v17, %v2462_v21  ;;  %v2490_v28 = vrot.slane %v2488_v19, 4  ;;  %v2493_v29 = vrot.slane %v2491_v20, 5  ;;  %v2481_v31 = vrot.slane %v2480_v22, 4  ;;  %v5951_v21 = vld [vmem:[%s7246_s27 + $0x5c] sm:$0x1] }
  0x22   : > { %v2499_v32 = vrot.slane %v2497_v24, 5  ;;  %v2501_v33 = vshrl.u32 %v5941_v63, 16  ;;  %v2507_v34 = vshll.u32 %v5942_v5, 16  ;;  %v2476_v35 = vsel %vm7293_vm4, %v2471_v27, %v2475_v10  ;;  %v5949_v5 = vld [vmem:[%s7246_s27 + $0x54] sm:$0xf] }
  0x23   : > { %6648 = vmatmul.mubr.msk.bf16.vlgmr.msra.gmra.mrb[0].mxu0 %vm336_vm1, %v5981_v26  ;;  %v2494_v36 = vor.u32 %v2493_v29, %v2490_v28  ;;  %v2512_v38 = vshrl.u32 %v5943_v25, 16  ;;  %v2515_v39 = vshll.u32 %v5943_v25, 16  ;;  %v2486_v41 = vsel %vm7293_vm4, %v2481_v31, %v2485_v23  ;;  %v5952_v22 = vld [vmem:[%s7246_s27 + $0x60] sm:$0xf]  ;;  %v5953_v27 = vld [vmem:[%s7246_s27 + $0x64] sm:$0xf] }
  0x24   : > { %6520 = vmatmul.mubr.msk.bf16.gmra.mrb[8].mxu1 %vm336_vm1, %v7113_v60  ;;  %6680 = vmatpush3.bf16.msra.mxu0 %v7265_v12  ;;  %v2503_v42 = vrot.slane %v2501_v33, 4  ;;  %v2509_v44 = vrot.slane %v2507_v34, 5  ;;  %v2521_v45 = vshll.u32 %v5944_v30, 16  ;;  %v5982_v47 = vcombine.low %v2476_v35, %v2486_v41 }
  0x25   : > { %6523 = vmatprep.mubr.msk.bf16.mxu1 %vm336_vm1, %v7114_v7  ;;  %v2495_v48 = vrot.slane %v2494_v36, 4  ;;  %v2514_v50 = vrot.slane %v2512_v38, 4  ;;  %v2517_v51 = vrot.slane %v2515_v39, 5  ;;  %7080 = vmatprep.subr.msk.bf16.mxu0 %vm385_vm0, %v7251_v6  ;;  %v2525_v12 = vshrl.u32 %v5944_v30, 16  ;;  %v7117_v30 = vld [vmem:[%s7246_s27 + $0x6c] sm:$0xff]   ;;  %v7118_v38 = vld [vmem:[%s7246_s27 + $0x78] sm:$0xff]  }
  0x26   : > { %v2504_v53 = vor.u32 %v2503_v42, %v2499_v32  ;;  %v2523_v54 = vrot.slane %v2521_v45, 5  ;;  %v2531_v55 = vshll.u32 %v5945_v37, 16  ;;  %6651 = vmatprep.mubr.msk.bf16.mxu0 %vm336_vm1, %v5982_v47  ;;  %v2536_v59 = vshrl.u32 %v5946_v40, 16  ;;  %v5954_v37 = vld [vmem:[%s7246_s27 + $0x68] sm:$0x1] }
  0x27   : > { %v2500_v57 = vsel %vm7293_vm4, %v2495_v48, %v2499_v32  ;;  %v2518_v58 = vor.u32 %v2517_v51, %v2514_v50  ;;  %v2539_v60 = vshll.u32 %v5946_v40, 16  ;;  %v2527_v62 = vrot.slane %v2525_v12, 4 }
  0x28   : > { %v2505_v61 = vrot.slane %v2504_v53, 4  ;;  %v2533_v63 = vrot.slane %v2531_v55, 5  ;;  %v2545_v0 = vshll.u32 %v5947_v46, 16  ;;  %v2538_v1 = vrot.slane %v2536_v59, 4  ;;  %v6016_v59 = vld [vmem:[%s7246_s27 + $0x1c] sm:$0xf] }
  0x29   : > { %v2519_v6 = vrot.slane %v2518_v58, 4  ;;  %v2541_v2 = vrot.slane %v2539_v60, 5  ;;  %v2549_v3 = vshrl.u32 %v5947_v46, 16  ;;  %v2528_v9 = vor.u32 %v2527_v62, %v2523_v54  ;;  %v6015_v58 = vld [vmem:[%s7246_s27 + $0x18] sm:$0xe] }
  0x2a   : > { %v2510_v7 = vsel %vm7293_vm4, %v2505_v61, %v2509_v44  ;;  %v2547_v10 = vrot.slane %v2545_v0, 5  ;;  %v2555_v11 = vshll.u32 %v5948_v52, 16  ;;  %v2560_v25 = vshrl.u32 %v5949_v5, 16  ;;  %v6012_v44 = vld [vmem:[%s7246_s27 + $0xc] sm:$0xe] }
  0x2b   : > { %v5983_v17 = vcombine.low %v2500_v57, %v2510_v7  ;;  %v2524_v18 = vsel %vm7293_vm4, %v2519_v6, %v2523_v54  ;;  %v2542_v19 = vor.u32 %v2541_v2, %v2538_v1  ;;  %v2551_v20 = vrot.slane %v2549_v3, 4  ;;  %v6014_v54 = vld [vmem:[%s7246_s27 + $0x14] sm:$0x1]  ;;  %v6017_v6 = vld [vmem:[%s7246_s27 + $0x20] sm:$0x1]  ;;  %v7119_v3 = vld [vmem:[%s7246_s27 + $0x84] sm:$0xff]  }
  0x2c   : > { %6524 = vmatmul.mubr.msk.bf16.gmra.mrb[12].mxu1 %vm336_vm1, %v7115_v49  ;;  %v2529_v23 = vrot.slane %v2528_v9, 4  ;;  %v2557_v24 = vrot.slane %v2555_v11, 5  ;;  %v2563_v26 = vshll.u32 %v5949_v5, 16  ;;  %v2569_v31 = vshll.u32 %v5950_v13, 16  ;;  %v6013_v49 = vld [vmem:[%s7246_s27 + $0x10] sm:$0xf] }
  0x2d   : > { %6527 = vmatprep.mubr.msk.bf16.mxu1 %vm336_vm1, %v7116_v56  ;;  %6652 = vmatmul.mubr.msk.bf16.gmra.mrb[4].mxu0 %vm336_vm1, %v5983_v17  ;;  %v2543_v28 = vrot.slane %v2542_v19, 4  ;;  %v2552_v29 = vor.u32 %v2551_v20, %v2547_v10  ;;  %v2573_v32 = vshrl.u32 %v5950_v13, 16  ;;  %v2562_v34 = vrot.slane %v2560_v25, 4 }
  0x2e   : > { %v2534_v33 = vsel %vm7293_vm4, %v2529_v23, %v2533_v63  ;;  %v2565_v35 = vrot.slane %v2563_v26, 5  ;;  %v2579_v36 = vshll.u32 %v5951_v21, 16  ;;  %v2571_v42 = vrot.slane %v2569_v31, 5  ;;  %v6018_v21 = vld [vmem:[%s7246_s27 + $0x24] sm:$0xe]  ;;  %v7120_v26 = vld [vmem:[%s7246_s27 + $0x90] sm:$0xff]  }
  0x2f   : > { %v5984_v39 = vcombine.low %v2524_v18, %v2534_v33  ;;  %v2548_v40 = vsel %vm7293_vm4, %v2543_v28, %v2547_v10  ;;  %v2553_v41 = vrot.slane %v2552_v29, 4  ;;  %v2575_v46 = vrot.slane %v2573_v32, 4 }
  0x30   : > { %v2566_v45 = vor.u32 %v2565_v35, %v2562_v34  ;;  %v2581_v47 = vrot.slane %v2579_v36, 5  ;;  %v2584_v48 = vshrl.u32 %v5952_v22, 16  ;;  %v2587_v51 = vshll.u32 %v5952_v22, 16  ;;  %v6021_v36 = vld [vmem:[%s7246_s27 + $0x30] sm:$0xe] }
  0x31   : > { %6655 = vmatprep.mubr.msk.bf16.mxu0 %vm336_vm1, %v5984_v39  ;;  %v2558_v50 = vsel %vm7293_vm4, %v2553_v41, %v2557_v24  ;;  %v2593_v52 = vshll.u32 %v5953_v27, 16  ;;  %v2597_v53 = vshrl.u32 %v5953_v27, 16  ;;  %v2576_v56 = vor.u32 %v2575_v46, %v2571_v42  ;;  %v6019_v27 = vld [vmem:[%s7246_s27 + $0x28] sm:$0xf] }
  0x32   : > { %v5985_v12 = vcombine.low %v2548_v40, %v2558_v50  ;;  %v2567_v55 = vrot.slane %v2566_v45, 4  ;;  %v2586_v57 = vrot.slane %v2584_v48, 4  ;;  %v2589_v60 = vrot.slane %v2587_v51, 5  ;;  %v6024_v50 = vld [vmem:[%s7246_s27 + $0x3c] sm:$0xe] }
  0x33   : > { %v2595_v61 = vrot.slane %v2593_v52, 5  ;;  %v2599_v62 = vrot.slane %v2597_v53, 4  ;;  %v2603_v63 = vshll.u32 %v5954_v37, 16  ;;  %v2577_v2 = vrot.slane %v2576_v56, 4  ;;  %v6022_v37 = vld [vmem:[%s7246_s27 + $0x34] sm:$0xf] }
  0x34   : > { %6528 = vmatmul.mubr.msk.bf16.gmra.mrb[16].mxu1 %vm336_vm1, %v7117_v30  ;;  %v2572_v1 = vsel %vm7293_vm4, %v2567_v55, %v2571_v42  ;;  %v6060_v5 = vrot.slane %v6012_v44, 9  ;;  %v3255_v7 = vrot.slane %v6013_v49, 5  ;;  %v2590_v9 = vor.u32 %v2589_v60, %v2586_v57  ;;  %v6020_v30 = vld [vmem:[%s7246_s27 + $0x2c] sm:$0x1]  ;;  %v6025_v51 = vld [vmem:[%s7246_s27 + $0x40] sm:$0xf] }
  0x35   : > { %6531 = vmatprep.mubr.msk.bf16.mxu1 %vm336_vm1, %v7118_v38  ;;  %6656 = vmatmul.mubr.msk.bf16.gmra.mrb[8].mxu0 %vm336_vm1, %v5985_v12  ;;  %v2600_v10 = vor.u32 %v2599_v62, %v2595_v61  ;;  %v2605_v11 = vrot.slane %v2603_v63, 5  ;;  %v3258_v13 = vrot.slane %v6014_v54, 5  ;;  %v2582_v17 = vsel %vm7293_vm4, %v2577_v2, %v2581_v47  ;;  %v6023_v38 = vld [vmem:[%s7246_s27 + $0x38] sm:$0x1]  ;;  %v7121_v52 = vld [vmem:[%s7246_s27 + $0x9c] sm:$0xff]  }
  0x36   : > { %v3256_v18 = vsel %vm7368_vm7, %v6060_v5, %v3255_v7  ;;  %v3257_v19 = vrot.slane %v3255_v7, 4  ;;  %v6061_v20 = vrot.slane %v6015_v58, 9  ;;  %v5986_v22 = vcombine.low %v2572_v1, %v2582_v17  ;;  %v6026_v55 = vld [vmem:[%s7246_s27 + $0x44] sm:$0x1]  ;;  %v6027_v56 = vld [vmem:[%s7246_s27 + $0x48] sm:$0xe] }
  0x37   : > { %v2591_v23 = vrot.slane %v2590_v9, 4  ;;  %v2601_v24 = vrot.slane %v2600_v10, 4  ;;  %v3262_v25 = vrot.slane %v6016_v59, 5  ;;  %v3265_v29 = vrot.slane %v6017_v6, 5  ;;  %v7122_v58 = vld [vmem:[%s7246_s27 + $0xa8] sm:$0xff]  }
  0x38   : > { %v3259_v28 = vsel %vm7368_vm7, %v3257_v19, %v3258_v13  ;;  %v6062_v31 = vrot.slane %v6018_v21, 9  ;;  %v3269_v32 = vrot.slane %v6019_v27, 5  ;;  %6659 = vmatprep.mubr.msk.bf16.mxu0 %vm336_vm1, %v5986_v22  ;;  %v3272_v44 = vrot.slane %v6020_v30, 5  ;;  %v6028_v62 = vld [vmem:[%s7246_s27 + $0x4c] sm:$0xf] }
  0x39   : > { %v2596_v33 = vsel %vm7293_vm4, %v2591_v23, %v2595_v61  ;;  %v2606_v34 = vsel %vm7293_vm4, %v2601_v24, %v2605_v11  ;;  %v6077_v35 = vcombine.low %v3256_v18, %v3259_v28  ;;  %v3263_v40 = vsel %vm7368_vm7, %v6061_v20, %v3262_v25  ;;  %v6029_v1 = vld [vmem:[%s7246_s27 + $0x50] sm:$0x1]  ;;  %v582_v5 = vld [vmem:[%s7246_s27] sm:$0xf]  ;;  %v583_v13 = vld [vmem:[%s7246_s27 + $0x4] sm:$0xf] }
  0x3a   : > { %v5987_v39 = vcombine.low %v2596_v33, %v2606_v34  ;;  %v3264_v41 = vrot.slane %v3262_v25, 4  ;;  %v3271_v42 = vrot.slane %v3269_v32, 4  ;;  %v6063_v45 = vrot.slane %v6021_v36, 9  ;;  %v584_v17 = vld [vmem:[%s7246_s27 + $0x8] sm:$0x1] }
  0x3b   : > { %v3276_v46 = vrot.slane %v6022_v37, 5  ;;  %v3279_v47 = vrot.slane %v6023_v38, 5  ;;  %v3270_v49 = vsel %vm7368_vm7, %v6062_v31, %v3269_v32  ;;  %v6064_v59 = vrot.slane %v6024_v50, 9  ;;  %v585_v22 = vld [vmem:[%s7246_s27 + $0xc] sm:$0xf] }
  0x3c   : > { %6532 = vmatmul.mubr.msk.bf16.gmra.mrb[20].mxu1 %vm336_vm1, %v7119_v3  ;;  %v3266_v48 = vsel %vm7368_vm7, %v3264_v41, %v3265_v29  ;;  %v3273_v53 = vsel %vm7368_vm7, %v3271_v42, %v3272_v44  ;;  %v3283_v60 = vrot.slane %v6025_v51, 5  ;;  %v3286_v61 = vrot.slane %v6026_v55, 5  ;;  %v586_v27 = vld [vmem:[%s7246_s27 + $0x10] sm:$0xf]  ;;  %v587_v32 = vld [vmem:[%s7246_s27 + $0x14] sm:$0x1] }
  0x3d   : > { %6535 = vmatprep.mubr.msk.bf16.mxu1 %vm336_vm1, %v7120_v26  ;;  %6660 = vmatmul.mubr.msk.bf16.gmra.mrb[12].mxu0 %vm336_vm1, %v5987_v39  ;;  %v7411_v54 = vsel %vm7368_vm7, %v6063_v45, %v3276_v46  ;;  %v3278_v12 = vrot.slane %v3276_v46, 4  ;;  %v6078_v57 = vcombine.low %v3263_v40, %v3266_v48  ;;  %v6079_v63 = vcombine.low %v3270_v49, %v3273_v53  ;;  %v6030_v33 = vld [vmem:[%s7246_s27 + $0x54] sm:$0xe]  ;;  %v6031_v38 = vld [vmem:[%s7246_s27 + $0x58] sm:$0xf] }
  0x3e   : > { %6681 = vmatprep.mubr.msk.bf16.mxu0 %vm336_vm1, %v6077_v35  ;;  %v6065_v2 = vrot.slane %v6027_v56, 9  ;;  %v3290_v3 = vrot.slane %v6028_v62, 5  ;;  %v7428_v9 = vsel %vm7368_vm7, %v6064_v59, %v3283_v60  ;;  %v3285_v10 = vrot.slane %v3283_v60, 4  ;;  %v6032_v44 = vld [vmem:[%s7246_s27 + $0x5c] sm:$0x1]  ;;  %v7123_v45 = vld [vmem:[%s7246_s27 + $0xb4] sm:$0xff]  }
  0x3f   : > { %v7420_v6 = vsel %vm7368_vm7, %v3278_v12, %v3279_v47  ;;  %v3293_v11 = vrot.slane %v6029_v1, 5  ;;  %v634_v20 = vshrl.u32 %v582_v5, 16  ;;  %v637_v21 = vshll.u32 %v582_v5, 16  ;;  %v6033_v50 = vld [vmem:[%s7246_s27 + $0x60] sm:$0xe] }
  0x40   : > { %v6080_v7 = vcombine.low %v7411_v54, %v7420_v6  ;;  %v7434_v18 = vsel %vm7368_vm7, %v6065_v2, %v3290_v3  ;;  %v3292_v19 = vrot.slane %v3290_v3, 4  ;;  %v7440_v23 = vsel %vm7368_vm7, %v3285_v10, %v3286_v61  ;;  %v6034_v55 = vld [vmem:[%s7246_s27 + $0x64] sm:$0xf]  ;;  %v6035_v59 = vld [vmem:[%s7246_s27 + $0x68] sm:$0x1] }
  0x41   : > { %v643_v24 = vshll.u32 %v583_v13, 16  ;;  %v647_v25 = vshrl.u32 %v583_v13, 16  ;;  %v653_v26 = vshll.u32 %v584_v17, 16  ;;  %v6081_v28 = vcombine.low %v7428_v9, %v7440_v23  ;;  %v588_v1 = vld [vmem:[%s7246_s27 + $0x18] sm:$0xf] }
  0x42   : > { %v7448_v29 = vsel %vm7368_vm7, %v3292_v19, %v3293_v11  ;;  %v636_v30 = vrot.slane %v634_v20, 4  ;;  %v639_v31 = vrot.slane %v637_v21, 5  ;;  %v658_v40 = vshrl.u32 %v585_v22, 16  ;;  %v589_v19 = vld [vmem:[%s7246_s27 + $0x1c] sm:$0xf] }
  0x43   : > { %v6082_v34 = vcombine.low %v7434_v18, %v7448_v29  ;;  %v645_v35 = vrot.slane %v643_v24, 5  ;;  %v649_v36 = vrot.slane %v647_v25, 4  ;;  %v655_v37 = vrot.slane %v653_v26, 5  ;;  %v593_v9 = vld [vmem:[%s7246_s27 + $0x2c] sm:$0x1] }
  0x44   : > { %6536 = vmatmul.mubr.msk.bf16.gmra.mrb[24].mxu1 %vm336_vm1, %v7121_v52  ;;  %v640_v39 = vor.u32 %v639_v31, %v636_v30  ;;  %v661_v41 = vshll.u32 %v585_v22, 16  ;;  %v667_v42 = vshll.u32 %v586_v27, 16  ;;  %v671_v47 = vshrl.u32 %v586_v27, 16  ;;  %v590_v22 = vld [vmem:[%s7246_s27 + $0x20] sm:$0x1] }
  0x45   : > { %6539 = vmatprep.mubr.msk.bf16.mxu1 %vm336_vm1, %v7122_v58  ;;  %6682 = vmatmul.mubr.msk.bf16.vlgmr.msra.gmra.mrb[0].mxu0 %vm336_vm1, %v6078_v57  ;;  %v650_v46 = vor.u32 %v649_v36, %v645_v35  ;;  %v677_v48 = vshll.u32 %v587_v32, 16  ;;  %v6066_v49 = vrot.slane %v6030_v33, 9  ;;  %v660_v52 = vrot.slane %v658_v40, 4  ;;  %v591_v32 = vld [vmem:[%s7246_s27 + $0x24] sm:$0xf] }
  0x46   : > { %6714 = vmatpush3.bf16.msra.mxu0 %v7271_v14  ;;  %6685 = vmatprep.mubr.msk.bf16.mxu0 %vm336_vm1, %v6079_v63  ;;  %v641_v51 = vrot.slane %v640_v39, 4  ;;  %v663_v53 = vrot.slane %v661_v41, 5  ;;  %v669_v12 = vrot.slane %v667_v42, 5  ;;  %v673_v14 = vrot.slane %v671_v47, 4  ;;  %v6036_v23 = vld [vmem:[%s7246_s27 + $0x6c] sm:$0xe] }
  0x47   : > { %7081 = vmatprep.subr.msk.bf16.mxu0 %vm385_vm0, %v7259_v8  ;;  %v651_v56 = vrot.slane %v650_v46, 4  ;;  %v679_v57 = vrot.slane %v677_v48, 5  ;;  %v3297_v58 = vrot.slane %v6031_v38, 5  ;;  %v3300_v62 = vrot.slane %v6032_v44, 5  ;;  %v6037_v44 = vld [vmem:[%s7246_s27 + $0x70] sm:$0xf] }
  0x48   : > { %v646_v60 = vsel %vm7293_vm4, %v641_v51, %v645_v35  ;;  %v664_v61 = vor.u32 %v663_v53, %v660_v52  ;;  %v6067_v63 = vrot.slane %v6033_v50, 9  ;;  %v674_v8 = vor.u32 %v673_v14, %v669_v12  ;;  %v592_v35 = vld [vmem:[%s7246_s27 + $0x28] sm:$0xf]  ;;  %v6039_v50 = vld [vmem:[%s7246_s27 + $0x78] sm:$0xe] }
  0x49   : > { %v656_v2 = vsel %vm7293_vm4, %v651_v56, %v655_v37  ;;  %v7473_v3 = vsel %vm7368_vm7, %v6066_v49, %v3297_v58  ;;  %v3299_v5 = vrot.slane %v3297_v58, 4  ;;  %v3304_v13 = vrot.slane %v6034_v55, 5  ;;  %v6040_v55 = vld [vmem:[%s7246_s27 + $0x7c] sm:$0xf] }
  0x4a   : > { %v5785_v10 = vcombine.low %v646_v60, %v656_v2  ;;  %v665_v11 = vrot.slane %v664_v61, 4  ;;  %v3307_v17 = vrot.slane %v6035_v59, 5  ;;  %v675_v20 = vrot.slane %v674_v8, 4  ;;  %v6041_v59 = vld [vmem:[%s7246_s27 + $0x80] sm:$0x1] }
  0x4b   : > { %v3301_v21 = vsel %vm7368_vm7, %v3299_v5, %v3300_v62  ;;  %v682_v24 = vshrl.u32 %v588_v1, 16  ;;  %v685_v25 = vshll.u32 %v588_v1, 16  ;;  %v7489_v30 = vsel %vm7368_vm7, %v6067_v63, %v3304_v13  ;;  %v594_v1 = vld [vmem:[%s7246_s27 + $0x30] sm:$0xf] }
  0x4c   : > { %6540 = vmatmul.mubr.msk.bf16.gmra.mrb[28].mxu1 %vm336_vm1, %v7123_v45  ;;  %v670_v26 = vsel %vm7293_vm4, %v665_v11, %v669_v12  ;;  %v6083_v27 = vcombine.low %v7473_v3, %v3301_v21  ;;  %v3306_v31 = vrot.slane %v3304_v13, 4  ;;  %v680_v54 = vsel %vm7293_vm4, %v675_v20, %v679_v57  ;;  %v6038_v45 = vld [vmem:[%s7246_s27 + $0x74] sm:$0x1] }
  0x4d   : > { %6686 = vmatmul.mubr.msk.bf16.gmra.mrb[4].mxu0 %vm336_vm1, %v6080_v7  ;;  %6545 = vmatprep.mubr.msk.bf16.mxu1 %vm336_vm1, %v5785_v10  ;;  %v684_v6 = vrot.slane %v682_v24, 4  ;;  %v687_v7 = vrot.slane %v685_v25, 5  ;;  %v691_v33 = vshll.u32 %v589_v19, 16  ;;  %v5786_v36 = vcombine.low %v670_v26, %v680_v54  ;;  %v596_v25 = vld [vmem:[%s7246_s27 + $0x38] sm:$0x1] }
  0x4e   : > { %6689 = vmatprep.mubr.msk.bf16.mxu0 %vm336_vm1, %v6081_v28  ;;  %v7501_v37 = vsel %vm7368_vm7, %v3306_v31, %v3307_v17  ;;  %v695_v38 = vshrl.u32 %v589_v19, 16  ;;  %v701_v39 = vshll.u32 %v590_v22, 16  ;;  %v706_v42 = vshrl.u32 %v591_v32, 16  ;;  %v597_v26 = vld [vmem:[%s7246_s27 + $0x3c] sm:$0xf] }
  0x4f   : > { %v6084_v28 = vcombine.low %v7489_v30, %v7501_v37  ;;  %v688_v40 = vor.u32 %v687_v7, %v684_v6  ;;  %v693_v41 = vrot.slane %v691_v33, 5  ;;  %v709_v48 = vshll.u32 %v591_v32, 16 }
  0x50   : > { %v697_v46 = vrot.slane %v695_v38, 4  ;;  %v703_v47 = vrot.slane %v701_v39, 5  ;;  %v715_v49 = vshll.u32 %v592_v35, 16  ;;  %v708_v52 = vrot.slane %v706_v42, 4 }
  0x51   : > { %v689_v51 = vrot.slane %v688_v40, 4  ;;  %v719_v53 = vshrl.u32 %v592_v35, 16  ;;  %v725_v12 = vshll.u32 %v593_v9, 16  ;;  %v711_v14 = vrot.slane %v709_v48, 5 }
  0x52   : > { %v698_v56 = vor.u32 %v697_v46, %v693_v41  ;;  %v717_v57 = vrot.slane %v715_v49, 5  ;;  %v6068_v58 = vrot.slane %v6036_v23, 9  ;;  %v3311_v63 = vrot.slane %v6037_v44, 5  ;;  %v599_v23 = vld [vmem:[%s7246_s27 + $0x44] sm:$0x1] }
  0x53   : > { %v694_v60 = vsel %vm7293_vm4, %v689_v51, %v693_v41  ;;  %v721_v61 = vrot.slane %v719_v53, 4  ;;  %v727_v62 = vrot.slane %v725_v12, 5  ;;  %v712_v8 = vor.u32 %v711_v14, %v708_v52  ;;  %v6042_v41 = vld [vmem:[%s7246_s27 + $0x84] sm:$0xe] }
  0x54   : > { %6546 = vmatmul.mubr.msk.bf16.vlgmr.msra.gmra.mrb[0].mxu1 %vm336_vm1, %v5786_v36  ;;  %v699_v2 = vrot.slane %v698_v56, 4  ;;  %v3314_v3 = vrot.slane %v6038_v45, 5  ;;  %v6069_v5 = vrot.slane %v6039_v50, 9  ;;  %v3312_v10 = vsel %vm7368_vm7, %v6068_v58, %v3311_v63  ;;  %v598_v36 = vld [vmem:[%s7246_s27 + $0x40] sm:$0xf] }
  0x55   : > { %6578 = vmatpush3.bf16.msra.mxu1 %v7275_v15  ;;  %6690 = vmatmul.mubr.msk.bf16.gmra.mrb[8].mxu0 %vm336_vm1, %v6082_v34  ;;  %v722_v15 = vor.u32 %v721_v61, %v717_v57  ;;  %v3313_v11 = vrot.slane %v3311_v63, 4  ;;  %v3318_v13 = vrot.slane %v6040_v55, 5  ;;  %v713_v18 = vrot.slane %v712_v8, 4  ;;  %v595_v34 = vld [vmem:[%s7246_s27 + $0x34] sm:$0xf] }
  0x56   : > { %6693 = vmatprep.mubr.msk.bf16.mxu0 %vm336_vm1, %v6083_v27  ;;  %v704_v17 = vsel %vm7293_vm4, %v699_v2, %v703_v47  ;;  %v3321_v29 = vrot.slane %v6041_v59, 5  ;;  %v730_v19 = vshrl.u32 %v594_v1, 16  ;;  %v733_v7 = vshll.u32 %v594_v1, 16  ;;  %v6043_v47 = vld [vmem:[%s7246_s27 + $0x88] sm:$0xf] }
  0x57   : > { %v5787_v20 = vcombine.low %v694_v60, %v704_v17  ;;  %v723_v21 = vrot.slane %v722_v15, 4  ;;  %v3315_v22 = vsel %vm7368_vm7, %v3313_v11, %v3314_v3  ;;  %v7531_v24 = vsel %vm7368_vm7, %v6069_v5, %v3318_v13  ;;  %v6044_v56 = vld [vmem:[%s7246_s27 + $0x8c] sm:$0x1]  ;;  %v6047_v3 = vld [vmem:[%s7246_s27 + $0x98] sm:$0x1] }
  0x58   : > { %v718_v27 = vsel %vm7293_vm4, %v713_v18, %v717_v57  ;;  %v6085_v31 = vcombine.low %v3312_v10, %v3315_v22  ;;  %v3320_v32 = vrot.slane %v3318_v13, 4  ;;  %v732_v54 = vrot.slane %v730_v19, 4  ;;  %v6045_v57 = vld [vmem:[%s7246_s27 + $0x90] sm:$0xe]  ;;  %v600_v5 = vld [vmem:[%s7246_s27 + $0x48] sm:$0xf] }
  0x59   : > { %6549 = vmatprep.mubr.msk.bf16.mxu1 %vm336_vm1, %v5787_v20  ;;  %v728_v6 = vsel %vm7293_vm4, %v723_v21, %v727_v62  ;;  %v739_v33 = vshll.u32 %v595_v34, 16  ;;  %v743_v35 = vshrl.u32 %v595_v34, 16  ;;  %v749_v9 = vshll.u32 %v596_v25, 16  ;;  %v6046_v62 = vld [vmem:[%s7246_s27 + $0x94] sm:$0xf] }
  0x5a   : > { %v5788_v38 = vcombine.low %v718_v27, %v728_v6  ;;  %v3322_v39 = vsel %vm7368_vm7, %v3320_v32, %v3321_v29  ;;  %v754_v40 = vshrl.u32 %v597_v26, 16  ;;  %v735_v44 = vrot.slane %v733_v7, 5  ;;  %v601_v19 = vld [vmem:[%s7246_s27 + $0x4c] sm:$0xf] }
  0x5b   : > { %v6086_v42 = vcombine.low %v7531_v24, %v3322_v39  ;;  %v741_v45 = vrot.slane %v739_v33, 5  ;;  %v745_v46 = vrot.slane %v743_v35, 4  ;;  %v751_v48 = vrot.slane %v749_v9, 5  ;;  %v602_v24 = vld [vmem:[%s7246_s27 + $0x50] sm:$0x1] }
  0x5c   : > { %6550 = vmatmul.mubr.msk.bf16.gmra.mrb[4].mxu1 %vm336_vm1, %v5788_v38  ;;  %v756_v49 = vrot.slane %v754_v40, 4  ;;  %v757_v50 = vshll.u32 %v597_v26, 16  ;;  %v763_v51 = vshll.u32 %v598_v36, 16  ;;  %v736_v52 = vor.u32 %v735_v44, %v732_v54  ;;  %v603_v54 = vld [vmem:[%s7246_s27 + $0x54] sm:$0xf] }
  0x5d   : > { %6694 = vmatmul.mubr.msk.bf16.gmra.mrb[12].mxu0 %vm336_vm1, %v6084_v28  ;;  %v746_v53 = vor.u32 %v745_v46, %v741_v45  ;;  %v767_v12 = vshrl.u32 %v598_v36, 16  ;;  %v773_v55 = vshll.u32 %v599_v23, 16  ;;  %v6070_v28 = vrot.slane %v6042_v41, 9  ;;  %v604_v36 = vld [vmem:[%s7246_s27 + $0x58] sm:$0xf] }
  0x5e   : > { %6697 = vmatprep.mubr.msk.bf16.mxu0 %vm336_vm1, %v6085_v31  ;;  %v759_v30 = vrot.slane %v757_v50, 5  ;;  %v765_v37 = vrot.slane %v763_v51, 5  ;;  %v3325_v14 = vrot.slane %v6043_v47, 5  ;;  %v737_v58 = vrot.slane %v736_v52, 4  ;;  %v605_v40 = vld [vmem:[%s7246_s27 + $0x5c] sm:$0x1] }
  0x5f   : > { %v747_v59 = vrot.slane %v746_v53, 4  ;;  %v769_v60 = vrot.slane %v767_v12, 4  ;;  %v775_v61 = vrot.slane %v773_v55, 5  ;;  %v3328_v8 = vrot.slane %v6044_v56, 5  ;;  %v6048_v41 = vld [vmem:[%s7246_s27 + $0x9c] sm:$0xe] }
  0x60   : > { %v760_v63 = vor.u32 %v759_v30, %v756_v49  ;;  %v3326_v1 = vsel %vm7368_vm7, %v6070_v28, %v3325_v14  ;;  %v3327_v2 = vrot.slane %v3325_v14, 4  ;;  %v742_v15 = vsel %vm7293_vm4, %v737_v58, %v741_v45  ;;  %v6049_v47 = vld [vmem:[%s7246_s27 + $0xa0] sm:$0xf]  ;;  %v6050_v52 = vld [vmem:[%s7246_s27 + $0xa4] sm:$0x1] }
  0x61   : > { %v752_v10 = vsel %vm7293_vm4, %v747_v59, %v751_v48  ;;  %v770_v11 = vor.u32 %v769_v60, %v765_v37  ;;  %v6071_v13 = vrot.slane %v6045_v57, 9  ;;  %v3332_v34 = vrot.slane %v6046_v62, 5  ;;  %v6051_v30 = vld [vmem:[%s7246_s27 + $0xa8] sm:$0xe]  ;;  %v6052_v58 = vld [vmem:[%s7246_s27 + $0xac] sm:$0xf] }
  0x62   : > { %v5789_v17 = vcombine.low %v742_v15, %v752_v10  ;;  %v761_v18 = vrot.slane %v760_v63, 4  ;;  %v3329_v29 = vsel %vm7368_vm7, %v3327_v2, %v3328_v8  ;;  %v3335_v22 = vrot.slane %v6047_v3, 5  ;;  %v6053_v63 = vld [vmem:[%s7246_s27 + $0xb0] sm:$0x1]  ;;  %v607_v15 = vld [vmem:[%s7246_s27 + $0x64] sm:$0xf] }
  0x63   : > { %v771_v20 = vrot.slane %v770_v11, 4  ;;  %v6087_v21 = vcombine.low %v3326_v1, %v3329_v29  ;;  %v778_v25 = vshrl.u32 %v600_v5, 16  ;;  %v3333_v27 = vsel %vm7368_vm7, %v6071_v13, %v3332_v34 }
  0x64   : > { %6553 = vmatprep.mubr.msk.bf16.mxu1 %vm336_vm1, %v5789_v17  ;;  %v766_v26 = vsel %vm7293_vm4, %v761_v18, %v765_v37  ;;  %v3334_v31 = vrot.slane %v3332_v34, 4  ;;  %v781_v32 = vshll.u32 %v600_v5, 16  ;;  %v787_v33 = vshll.u32 %v601_v19, 16  ;;  %v606_v5 = vld [vmem:[%s7246_s27 + $0x60] sm:$0xf] }
  0x65   : > { %6698 = vmatmul.mubr.msk.bf16.gmra.mrb[16].mxu0 %vm336_vm1, %v6086_v42  ;;  %v776_v6 = vsel %vm7293_vm4, %v771_v20, %v775_v61  ;;  %v780_v7 = vrot.slane %v778_v25, 4  ;;  %v791_v35 = vshrl.u32 %v601_v19, 16  ;;  %v797_v23 = vshll.u32 %v602_v24, 16  ;;  %v608_v18 = vld [vmem:[%s7246_s27 + $0x68] sm:$0x1] }
  0x66   : > { %6701 = vmatprep.mubr.msk.bf16.mxu0 %vm336_vm1, %v6087_v21  ;;  %v5790_v38 = vcombine.low %v766_v26, %v776_v6  ;;  %v3336_v39 = vsel %vm7368_vm7, %v3334_v31, %v3335_v22  ;;  %v783_v9 = vrot.slane %v781_v32, 5  ;;  %v789_v44 = vrot.slane %v787_v33, 5  ;;  %v609_v21 = vld [vmem:[%s7246_s27 + $0x6c] sm:$0xf]  ;;  %v610_v6 = vld [vmem:[%s7246_s27 + $0x70] sm:$0xf] }
  0x67   : > { %v6088_v42 = vcombine.low %v3333_v27, %v3336_v39  ;;  %v793_v45 = vrot.slane %v791_v35, 4  ;;  %v802_v46 = vshrl.u32 %v603_v54, 16  ;;  %v799_v49 = vrot.slane %v797_v23, 5 }
  0x68   : > { %6554 = vmatmul.mubr.msk.bf16.gmra.mrb[8].mxu1 %vm336_vm1, %v5790_v38  ;;  %v784_v48 = vor.u32 %v783_v9, %v780_v7  ;;  %v805_v50 = vshll.u32 %v603_v54, 16  ;;  %v811_v51 = vshll.u32 %v604_v36, 16  ;;  %v815_v55 = vshrl.u32 %v604_v36, 16  ;;  %v611_v38 = vld [vmem:[%s7246_s27 + $0x74] sm:$0x1] }
  0x69   : > { %v794_v53 = vor.u32 %v793_v45, %v789_v44  ;;  %v804_v12 = vrot.slane %v802_v46, 4  ;;  %v821_v56 = vshll.u32 %v605_v40, 16  ;;  %v6072_v57 = vrot.slane %v6048_v41, 9  ;;  %v6054_v41 = vld [vmem:[%s7246_s27 + $0xb4] sm:$0xe] }
  0x6a   : > { %v785_v37 = vrot.slane %v784_v48, 4  ;;  %v807_v28 = vrot.slane %v805_v50, 5  ;;  %v813_v14 = vrot.slane %v811_v51, 5  ;;  %v817_v60 = vrot.slane %v815_v55, 4  ;;  %v6056_v48 = vld [vmem:[%s7246_s27 + $0xbc] sm:$0x1] }
  0x6b   : > { %v795_v59 = vrot.slane %v794_v53, 4  ;;  %v823_v61 = vrot.slane %v821_v56, 5  ;;  %v3339_v62 = vrot.slane %v6049_v47, 5  ;;  %v3342_v8 = vrot.slane %v6050_v52, 5 }
  0x6c   : > { %v790_v1 = vsel %vm7293_vm4, %v785_v37, %v789_v44  ;;  %v808_v2 = vor.u32 %v807_v28, %v804_v12  ;;  %v6073_v3 = vrot.slane %v6051_v30, 9  ;;  %v818_v11 = vor.u32 %v817_v60, %v813_v14  ;;  %v6058_v12 = vld [vmem:[%s7246_s27 + $0xc4] sm:$0xf]  ;;  %v6059_v28 = vld [vmem:[%s7246_s27 + $0xc8] sm:$0x1] }
  0x6d   : > { %6702 = vmatmul.mubr.msk.bf16.gmra.mrb[20].mxu0 %vm336_vm1, %v6088_v42  ;;  %v800_v10 = vsel %vm7293_vm4, %v795_v59, %v799_v49  ;;  %v3340_v13 = vsel %vm7368_vm7, %v6072_v57, %v3339_v62  ;;  %v3341_v17 = vrot.slane %v3339_v62, 4  ;;  %v3346_v19 = vrot.slane %v6052_v58, 5  ;;  %v6055_v42 = vld [vmem:[%s7246_s27 + $0xb8] sm:$0xf]  ;;  %v6057_v49 = vld [vmem:[%s7246_s27 + $0xc0] sm:$0xe] }
  0x6e   : > { %v5791_v29 = vcombine.low %v790_v1, %v800_v10  ;;  %v809_v34 = vrot.slane %v808_v2, 4  ;;  %v3349_v20 = vrot.slane %v6053_v63, 5  ;;  %v819_v22 = vrot.slane %v818_v11, 4 }
  0x6f   : > { %v3343_v24 = vsel %vm7368_vm7, %v3341_v17, %v3342_v8  ;;  %v826_v25 = vshrl.u32 %v606_v5, 16  ;;  %v829_v26 = vshll.u32 %v606_v5, 16  ;;  %v3347_v32 = vsel %vm7368_vm7, %v6073_v3, %v3346_v19  ;;  %v613_v17 = vld [vmem:[%s7246_s27 + $0x7c] sm:$0xf] }
  0x70   : > { %6557 = vmatprep.mubr.msk.bf16.mxu1 %vm336_vm1, %v5791_v29  ;;  %v814_v27 = vsel %vm7293_vm4, %v809_v34, %v813_v14  ;;  %v6089_v31 = vcombine.low %v3340_v13, %v3343_v24  ;;  %v3348_v54 = vrot.slane %v3346_v19, 4  ;;  %v824_v7 = vsel %vm7293_vm4, %v819_v22, %v823_v61  ;;  %v612_v14 = vld [vmem:[%s7246_s27 + $0x78] sm:$0xf]  ;;  %v614_v19 = vld [vmem:[%s7246_s27 + $0x80] sm:$0x1] }
  0x71   : > { %v828_v33 = vrot.slane %v826_v25, 4  ;;  %v831_v35 = vrot.slane %v829_v26, 5  ;;  %v835_v36 = vshll.u32 %v607_v15, 16  ;;  %v5792_v39 = vcombine.low %v814_v27, %v824_v7  ;;  %v615_v26 = vld [vmem:[%s7246_s27 + $0x84] sm:$0xf] }
  0x72   : > { %6705 = vmatprep.mubr.msk.bf16.mxu0 %vm336_vm1, %v6089_v31  ;;  %v3350_v9 = vsel %vm7368_vm7, %v3348_v54, %v3349_v20  ;;  %v839_v23 = vshrl.u32 %v607_v15, 16  ;;  %v845_v40 = vshll.u32 %v608_v18, 16  ;;  %v850_v47 = vshrl.u32 %v609_v21, 16  ;;  %v616_v27 = vld [vmem:[%s7246_s27 + $0x88] sm:$0xf] }
  0x73   : > { %v6090_v44 = vcombine.low %v3347_v32, %v3350_v9  ;;  %v832_v45 = vor.u32 %v831_v35, %v828_v33  ;;  %v837_v46 = vrot.slane %v835_v36, 5  ;;  %6558 = vmatmul.mubr.msk.bf16.gmra.mrb[12].mxu1 %vm336_vm1, %v5792_v39  ;;  %v853_v52 = vshll.u32 %v609_v21, 16 }
  0x74   : > { %v841_v50 = vrot.slane %v839_v23, 4  ;;  %v847_v51 = vrot.slane %v845_v40, 5  ;;  %v859_v53 = vshll.u32 %v610_v6, 16  ;;  %v852_v56 = vrot.slane %v850_v47, 4  ;;  %v617_v40 = vld [vmem:[%s7246_s27 + $0x8c] sm:$0x1] }
  0x75   : > { %6706 = vmatmul.mubr.msk.bf16.gmra.mrb[24].mxu0 %vm336_vm1, %v6090_v44  ;;  %v833_v55 = vrot.slane %v832_v45, 4  ;;  %v863_v30 = vshrl.u32 %v610_v6, 16  ;;  %v869_v37 = vshll.u32 %v611_v38, 16  ;;  %v855_v58 = vrot.slane %v853_v52, 5  ;;  %v7124_v38 = vld [vmem:[%s7246_s27 + $0x18] sm:$0xff]  }
  0x76   : > { %v842_v57 = vor.u32 %v841_v50, %v837_v46  ;;  %v861_v59 = vrot.slane %v859_v53, 5  ;;  %v6074_v60 = vrot.slane %v6054_v41, 9  ;;  %v3353_v1 = vrot.slane %v6055_v42, 5  ;;  %v618_v47 = vld [vmem:[%s7246_s27 + $0x90] sm:$0xf] }
  0x77   : > { %v838_v61 = vsel %vm7293_vm4, %v833_v55, %v837_v46  ;;  %v865_v62 = vrot.slane %v863_v30, 4  ;;  %v871_v63 = vrot.slane %v869_v37, 5  ;;  %v856_v8 = vor.u32 %v855_v58, %v852_v56  ;;  %v619_v56 = vld [vmem:[%s7246_s27 + $0x94] sm:$0xf]  ;;  %v621_v58 = vld [vmem:[%s7246_s27 + $0x9c] sm:$0xf] }
  0x78   : > { %v843_v2 = vrot.slane %v842_v57, 4  ;;  %v3356_v3 = vrot.slane %v6056_v48, 5  ;;  %v6075_v5 = vrot.slane %v6057_v49, 9  ;;  %v3354_v10 = vsel %vm7368_vm7, %v6074_v60, %v3353_v1 }
  0x79   : > { %v866_v15 = vor.u32 %v865_v62, %v861_v59  ;;  %v3355_v11 = vrot.slane %v3353_v1, 4  ;;  %v3360_v13 = vrot.slane %v6058_v12, 5  ;;  %v857_v29 = vrot.slane %v856_v8, 4 }
  0x7a   : > { %v848_v18 = vsel %vm7293_vm4, %v843_v2, %v847_v51  ;;  %v3363_v34 = vrot.slane %v6059_v28, 5  ;;  %v874_v20 = vshrl.u32 %v612_v14, 16  ;;  %v877_v33 = vshll.u32 %v612_v14, 16  ;;  %v620_v28 = vld [vmem:[%s7246_s27 + $0x98] sm:$0x1] }
  0x7b   : > { %v5793_v21 = vcombine.low %v838_v61, %v848_v18  ;;  %v867_v22 = vrot.slane %v866_v15, 4  ;;  %v3357_v24 = vsel %vm7368_vm7, %v3355_v11, %v3356_v3  ;;  %v3361_v25 = vsel %vm7368_vm7, %v6075_v5, %v3360_v13  ;;  %v7125_v11 = vld [vmem:[%s7246_s27 + $0x24] sm:$0xff]  }
  0x7c   : > { %v862_v31 = vsel %vm7293_vm4, %v857_v29, %v861_v59  ;;  %v6091_v32 = vcombine.low %v3354_v10, %v3357_v24  ;;  %v3362_v54 = vrot.slane %v3360_v13, 4  ;;  %v876_v6 = vrot.slane %v874_v20, 4  ;;  %v623_v24 = vld [vmem:[%s7246_s27 + $0xa4] sm:$0x1] }
  0x7d   : > { %6561 = vmatprep.mubr.msk.bf16.mxu1 %vm336_vm1, %v5793_v21  ;;  %v872_v7 = vsel %vm7293_vm4, %v867_v22, %v871_v63  ;;  %v883_v35 = vshll.u32 %v613_v17, 16  ;;  %v887_v36 = vshrl.u32 %v613_v17, 16  ;;  %v893_v23 = vshll.u32 %v614_v19, 16  ;;  %v622_v63 = vld [vmem:[%s7246_s27 + $0xa0] sm:$0xf]  ;;  %v7126_v19 = vld [vmem:[%s7246_s27 + $0x30] sm:$0xff]  }
  0x7e   : > { %v5794_v39 = vcombine.low %v862_v31, %v872_v7  ;;  %6709 = vmatprep.mubr.msk.bf16.mxu0 %vm336_vm1, %v6091_v32  ;;  %v3364_v9 = vsel %vm7368_vm7, %v3362_v54, %v3363_v34  ;;  %v898_v41 = vshrl.u32 %v615_v26, 16  ;;  %v879_v44 = vrot.slane %v877_v33, 5  ;;  %v624_v54 = vld [vmem:[%s7246_s27 + $0xa8] sm:$0xf] }
  0x7f   : > { %v6092_v42 = vcombine.low %v3361_v25, %v3364_v9  ;;  %v885_v45 = vrot.slane %v883_v35, 5  ;;  %v889_v46 = vrot.slane %v887_v36, 4  ;;  %v895_v48 = vrot.slane %v893_v23, 5  ;;  %v625_v36 = vld [vmem:[%s7246_s27 + $0xac] sm:$0xf] }
  0x80   : > { %6562 = vmatmul.mubr.msk.bf16.gmra.mrb[16].mxu1 %vm336_vm1, %v5794_v39  ;;  %v900_v49 = vrot.slane %v898_v41, 4  ;;  %v901_v50 = vshll.u32 %v615_v26, 16  ;;  %v907_v51 = vshll.u32 %v616_v27, 16  ;;  %v880_v52 = vor.u32 %v879_v44, %v876_v6  ;;  %v627_v41 = vld [vmem:[%s7246_s27 + $0xb4] sm:$0xf] }
  0x81   : > { %6710 = vmatmul.mubr.msk.bf16.gmra.mrb[28].mxu0 %vm336_vm1, %v6092_v42  ;;  %v890_v53 = vor.u32 %v889_v46, %v885_v45  ;;  %v911_v12 = vshrl.u32 %v616_v27, 16  ;;  %v917_v55 = vshll.u32 %v617_v40, 16  ;;  %v922_v14 = vshrl.u32 %v618_v47, 16  ;;  %v626_v40 = vld [vmem:[%s7246_s27 + $0xb0] sm:$0x1] }
  0x82   : > { %v903_v30 = vrot.slane %v901_v50, 5  ;;  %v909_v37 = vrot.slane %v907_v51, 5  ;;  %6715 = vmatprep.mubr.msk.bf16.mxu0 %vm336_vm1, %v7124_v38  ;;  %v925_v57 = vshll.u32 %v618_v47, 16  ;;  %v881_v59 = vrot.slane %v880_v52, 4  ;;  %v7679_v42 = vld [vmem:[%s8573_s1 + $0xc] sm:$0xf] }
  0x83   : > { %v891_v60 = vrot.slane %v890_v53, 4  ;;  %v913_v61 = vrot.slane %v911_v12, 4  ;;  %v919_v62 = vrot.slane %v917_v55, 5  ;;  %v924_v2 = vrot.slane %v922_v14, 4  ;;  %7076 = vmatprep.subr.msk.bf16.mxu1 %vm385_vm0, %v7679_v42  ;;  %v7127_v55 = vld [vmem:[%s7246_s27 + $0x3c] sm:$0xff]  }
  0x84   : > { %v904_v1 = vor.u32 %v903_v30, %v900_v49  ;;  %v927_v8 = vrot.slane %v925_v57, 5  ;;  %v931_v3 = vshll.u32 %v619_v56, 16  ;;  %v886_v5 = vsel %vm7293_vm4, %v881_v59, %v885_v45  ;;  %v629_v57 = vld [vmem:[%s7246_s27 + $0xbc] sm:$0x1] }
  0x85   : > { %v896_v15 = vsel %vm7293_vm4, %v891_v60, %v895_v48  ;;  %v914_v10 = vor.u32 %v913_v61, %v909_v37  ;;  %v935_v13 = vshrl.u32 %v619_v56, 16  ;;  %v941_v22 = vshll.u32 %v620_v28, 16 }
  0x86   : > { %v5795_v17 = vcombine.low %v886_v5, %v896_v15  ;;  %v905_v18 = vrot.slane %v904_v1, 4  ;;  %v928_v29 = vor.u32 %v927_v8, %v924_v2  ;;  %v933_v34 = vrot.slane %v931_v3, 5  ;;  %v1376_v5 = vld [vmem:[%s7246_s27 + $0x4] sm:$0xf]  ;;  %v1377_v15 = vld [vmem:[%s7246_s27 + $0x8] sm:$0x1] }
  0x87   : > { %v915_v20 = vrot.slane %v914_v10, 4  ;;  %v937_v21 = vrot.slane %v935_v13, 4  ;;  %v946_v25 = vshrl.u32 %v621_v58, 16  ;;  %v949_v31 = vshll.u32 %v621_v58, 16  ;;  %v7128_v58 = vld [vmem:[%s7246_s27 + $0x48] sm:$0xff]  }
  0x88   : > { %6565 = vmatprep.mubr.msk.bf16.mxu1 %vm336_vm1, %v5795_v17  ;;  %v910_v26 = vsel %vm7293_vm4, %v905_v18, %v909_v37  ;;  %v929_v27 = vrot.slane %v928_v29, 4  ;;  %v955_v32 = vshll.u32 %v622_v63, 16  ;;  %v943_v33 = vrot.slane %v941_v22, 5  ;;  %v1378_v18 = vld [vmem:[%s7246_s27 + $0xc] sm:$0xe] }
  0x89   : > { %v920_v6 = vsel %vm7293_vm4, %v915_v20, %v919_v62  ;;  %6716 = vmatmul.mubr.msk.bf16.vlgmr.msra.gmra.mrb[0].mxu0 %vm336_vm1, %v7125_v11  ;;  %v938_v7 = vor.u32 %v937_v21, %v933_v34  ;;  %v948_v35 = vrot.slane %v946_v25, 4  ;;  %v951_v9 = vrot.slane %v949_v31, 5  ;;  %v1379_v21 = vld [vmem:[%s7246_s27 + $0x10] sm:$0xf]  ;;  %v1380_v22 = vld [vmem:[%s7246_s27 + $0x14] sm:$0x1] }
  0x8a   : > { %v5796_v38 = vcombine.low %v910_v26, %v920_v6  ;;  %6748 = vmatpush3.bf16.msra.mxu0 %v7279_v16  ;;  %v934_v39 = vsel %vm7293_vm4, %v929_v27, %v933_v34  ;;  %v957_v23 = vrot.slane %v955_v32, 5  ;;  %6719 = vmatprep.mubr.msk.bf16.mxu0 %vm336_vm1, %v7126_v19  ;;  %v959_v45 = vshrl.u32 %v622_v63, 16  ;;  %v628_v16 = vld [vmem:[%s7246_s27 + $0xb8] sm:$0xf]  ;;  %v1375_v63 = vld [vmem:[%s7246_s27] sm:$0xe] }
  0x8b   : > { %v939_v44 = vrot.slane %v938_v7, 4  ;;  %v965_v46 = vshll.u32 %v623_v24, 16  ;;  %v970_v47 = vshrl.u32 %v624_v54, 16  ;;  %v952_v48 = vor.u32 %v951_v9, %v948_v35  ;;  %v1381_v31 = vld [vmem:[%s7246_s27 + $0x18] sm:$0xe] }
  0x8c   : > { %6566 = vmatmul.mubr.msk.bf16.gmra.mrb[20].mxu1 %vm336_vm1, %v5796_v38  ;;  %v973_v49 = vshll.u32 %v624_v54, 16  ;;  %v979_v50 = vshll.u32 %v625_v36, 16  ;;  %v983_v51 = vshrl.u32 %v625_v36, 16  ;;  %v961_v53 = vrot.slane %v959_v45, 4  ;;  %v1382_v32 = vld [vmem:[%s7246_s27 + $0x1c] sm:$0xf] }
  0x8d   : > { %v944_v52 = vsel %vm7293_vm4, %v939_v44, %v943_v33  ;;  %v967_v12 = vrot.slane %v965_v46, 5  ;;  %v972_v56 = vrot.slane %v970_v47, 4  ;;  %v953_v37 = vrot.slane %v952_v48, 4  ;;  %v7129_v35 = vld [vmem:[%s7246_s27 + $0x54] sm:$0xff]   ;;  %v1383_v36 = vld [vmem:[%s7246_s27 + $0x20] sm:$0x1] }
  0x8e   : > { %v5797_v30 = vcombine.low %v934_v39, %v944_v52  ;;  %v975_v28 = vrot.slane %v973_v49, 5  ;;  %v981_v14 = vrot.slane %v979_v50, 5  ;;  %v962_v59 = vor.u32 %v961_v53, %v957_v23  ;;  %v1384_v47 = vld [vmem:[%s7246_s27 + $0x24] sm:$0xe]  ;;  %v1386_v52 = vld [vmem:[%s7246_s27 + $0x2c] sm:$0x1] }
  0x8f   : > { %v985_v60 = vrot.slane %v983_v51, 4  ;;  %v989_v61 = vshll.u32 %v626_v40, 16  ;;  %v994_v62 = vshrl.u32 %v627_v41, 16  ;;  %v958_v1 = vsel %vm7293_vm4, %v953_v37, %v957_v23  ;;  %v7130_v40 = vld [vmem:[%s7246_s27 + $0x60] sm:$0xff]  }
  0x90   : > { %6569 = vmatprep.mubr.msk.bf16.mxu1 %vm336_vm1, %v5797_v30  ;;  %v976_v2 = vor.u32 %v975_v28, %v972_v56  ;;  %v997_v8 = vshll.u32 %v627_v41, 16  ;;  %v1003_v3 = vshll.u32 %v628_v16, 16  ;;  %v963_v10 = vrot.slane %v962_v59, 4  ;;  %v1387_v30 = vld [vmem:[%s7246_s27 + $0x30] sm:$0xe] }
  0x91   : > { %6720 = vmatmul.mubr.msk.bf16.gmra.mrb[4].mxu0 %vm336_vm1, %v7127_v55  ;;  %v986_v11 = vor.u32 %v985_v60, %v981_v14  ;;  %v991_v13 = vrot.slane %v989_v61, 5  ;;  %v996_v17 = vrot.slane %v994_v62, 4  ;;  %v1007_v20 = vshrl.u32 %v628_v16, 16  ;;  %v1385_v16 = vld [vmem:[%s7246_s27 + $0x28] sm:$0xf] }
  0x92   : > { %v977_v29 = vrot.slane %v976_v2, 4  ;;  %v999_v34 = vrot.slane %v997_v8, 5  ;;  %v1005_v19 = vrot.slane %v1003_v3, 5  ;;  %6723 = vmatprep.mubr.msk.bf16.mxu0 %vm336_vm1, %v7128_v58  ;;  %v968_v24 = vsel %vm7293_vm4, %v963_v10, %v967_v12  ;;  %v1388_v58 = vld [vmem:[%s7246_s27 + $0x34] sm:$0xf]  ;;  %v7131_v10 = vld [vmem:[%s7246_s27 + $0x6c] sm:$0xff]  }
  0x93   : > { %v987_v25 = vrot.slane %v986_v11, 4  ;;  %v1013_v26 = vshll.u32 %v629_v57, 16  ;;  %v5817_v27 = vrot.slane %v1375_v63, 9  ;;  %v5798_v54 = vcombine.low %v958_v1, %v968_v24  ;;  %v1389_v59 = vld [vmem:[%s7246_s27 + $0x38] sm:$0x1] }
  0x94   : > { %v982_v6 = vsel %vm7293_vm4, %v977_v29, %v981_v14  ;;  %v1000_v7 = vor.u32 %v999_v34, %v996_v17  ;;  %v1009_v33 = vrot.slane %v1007_v20, 4  ;;  %v1476_v9 = vrot.slane %v1376_v5, 5  ;;  %v1390_v60 = vld [vmem:[%s7246_s27 + $0x3c] sm:$0xe]  ;;  %v1391_v61 = vld [vmem:[%s7246_s27 + $0x40] sm:$0xf] }
  0x95   : > { %v992_v38 = vsel %vm7293_vm4, %v987_v25, %v991_v13  ;;  %v1015_v39 = vrot.slane %v1013_v26, 5  ;;  %v1479_v23 = vrot.slane %v1377_v15, 5  ;;  %6570 = vmatmul.mubr.msk.bf16.gmra.mrb[24].mxu1 %vm336_vm1, %v5798_v54  ;;  %v5818_v46 = vrot.slane %v1378_v18, 9  ;;  %v1392_v8 = vld [vmem:[%s7246_s27 + $0x44] sm:$0x1]  ;;  %v7132_v34 = vld [vmem:[%s7246_s27 + $0x78] sm:$0xff]  }
  0x96   : > { %v5799_v41 = vcombine.low %v982_v6, %v992_v38  ;;  %v1001_v44 = vrot.slane %v1000_v7, 4  ;;  %v1010_v45 = vor.u32 %v1009_v33, %v1005_v19  ;;  %v1477_v48 = vsel %vm7368_vm7, %v5817_v27, %v1476_v9  ;;  %v1393_v3 = vld [vmem:[%s7246_s27 + $0x48] sm:$0xe]  ;;  %v1394_v20 = vld [vmem:[%s7246_s27 + $0x4c] sm:$0xf] }
  0x97   : > { %v1478_v49 = vrot.slane %v1476_v9, 4  ;;  %v1483_v50 = vrot.slane %v1379_v21, 5  ;;  %v1486_v51 = vrot.slane %v1380_v22, 5  ;;  %v5819_v55 = vrot.slane %v1381_v31, 9  ;;  %v1395_v21 = vld [vmem:[%s7246_s27 + $0x50] sm:$0x1] }
  0x98   : > { %6573 = vmatprep.mubr.msk.bf16.mxu1 %vm336_vm1, %v5799_v41  ;;  %v1006_v53 = vsel %vm7293_vm4, %v1001_v44, %v1005_v19  ;;  %v1011_v12 = vrot.slane %v1010_v45, 4  ;;  %v1490_v56 = vrot.slane %v1382_v32, 5  ;;  %v1493_v57 = vrot.slane %v1383_v36, 5  ;;  %v1396_v27 = vld [vmem:[%s7246_s27 + $0x54] sm:$0xe] }
  0x99   : > { %6724 = vmatmul.mubr.msk.bf16.gmra.mrb[8].mxu0 %vm336_vm1, %v7129_v35  ;;  %v1480_v37 = vsel %vm7368_vm7, %v1478_v49, %v1479_v23  ;;  %v7727_v28 = vsel %vm7368_vm7, %v5818_v46, %v1483_v50  ;;  %v1485_v14 = vrot.slane %v1483_v50, 4  ;;  %v5820_v11 = vrot.slane %v1384_v47, 9  ;;  %v1397_v31 = vld [vmem:[%s7246_s27 + $0x58] sm:$0xf]  ;;  %v1398_v7 = vld [vmem:[%s7246_s27 + $0x5c] sm:$0x1] }
  0x9a   : > { %v1016_v62 = vsel %vm7293_vm4, %v1011_v12, %v1015_v39  ;;  %v5834_v63 = vcombine.low %v1477_v48, %v1480_v37  ;;  %6727 = vmatprep.mubr.msk.bf16.mxu0 %vm336_vm1, %v7130_v40  ;;  %v7738_v1 = vsel %vm7368_vm7, %v5819_v55, %v1490_v56  ;;  %v1492_v2 = vrot.slane %v1490_v56, 4  ;;  %v1399_v39 = vld [vmem:[%s7246_s27 + $0x60] sm:$0xe]  ;;  %v1400_v44 = vld [vmem:[%s7246_s27 + $0x64] sm:$0xf] }
  0x9b   : > { %v5800_v5 = vcombine.low %v1006_v53, %v1016_v62  ;;  %v7744_v15 = vsel %vm7368_vm7, %v1485_v14, %v1486_v51  ;;  %v1497_v13 = vrot.slane %v1385_v16, 5  ;;  %v1500_v29 = vrot.slane %v1386_v52, 5  ;;  %v1401_v45 = vld [vmem:[%s7246_s27 + $0x68] sm:$0x1]  ;;  %v1402_v46 = vld [vmem:[%s7246_s27 + $0x6c] sm:$0xe] }
  0x9c   : > { %v5835_v17 = vcombine.low %v7727_v28, %v7744_v15  ;;  %v7751_v18 = vsel %vm7368_vm7, %v1492_v2, %v1493_v57  ;;  %v7756_v19 = vsel %vm385_vm0, %v7679_v42, 0  ;;  %v5821_v26 = vrot.slane %v1387_v30, 9  ;;  %v1403_v47 = vld [vmem:[%s7246_s27 + $0x70] sm:$0xf]  ;;  %v1404_v51 = vld [vmem:[%s7246_s27 + $0x74] sm:$0x1] }
  0x9d   : > { %v5836_v22 = vcombine.low %v7738_v1, %v7751_v18  ;;  %v7764_v24 = vsel %vm7368_vm7, %v5820_v11, %v1497_v13  ;;  %v1499_v25 = vrot.slane %v1497_v13, 4  ;;  %6574 = vmatmul.mubr.msk.bf16.gmra.mrb[28].mxu1 %vm336_vm1, %v5800_v5  ;;  %v1504_v32 = vrot.slane %v1388_v58, 5  ;;  %v1405_v14 = vld [vmem:[%s7246_s27 + $0x78] sm:$0xe]  ;;  %v1406_v57 = vld [vmem:[%s7246_s27 + $0x7c] sm:$0xf] }
  0x9e   : > { %v1507_v42 = vrot.slane %v1389_v59, 5  ;;  %v5822_v54 = vrot.slane %v1390_v60, 9  ;;  %v1511_v6 = vrot.slane %v1391_v61, 5  ;;  %6579 = vmatprep.mubr.msk.bf16.mxu1 %vm336_vm1, %v5834_v63  ;;  %v1514_v35 = vrot.slane %v1392_v8, 5  ;;  %v7133_v58 = vld [vmem:[%s7246_s27 + $0x84] sm:$0xff]  }
  0x9f   : > { %v7773_v33 = vsel %vm7368_vm7, %v1499_v25, %v1500_v29  ;;  %v5823_v36 = vrot.slane %v1393_v3, 9  ;;  %v1518_v38 = vrot.slane %v1394_v20, 5  ;;  %v7780_v23 = vsel %vm7368_vm7, %v5821_v26, %v1504_v32  ;;  %v1407_v63 = vld [vmem:[%s7246_s27 + $0x80] sm:$0x1]  ;;  %v1408_v1 = vld [vmem:[%s7246_s27 + $0x84] sm:$0xe] }
  0xa0   : > { %v5837_v9 = vcombine.low %v7764_v24, %v7773_v33  ;;  %v1506_v40 = vrot.slane %v1504_v32, 4  ;;  %v7784_v41 = vsel %vm7368_vm7, %v5822_v54, %v1511_v6  ;;  %v1513_v16 = vrot.slane %v1511_v6, 4  ;;  %v1409_v15 = vld [vmem:[%s7246_s27 + $0x88] sm:$0xf]  ;;  %v6174_v26 = vld [vmem:[%s7246_s27 + $0x18] sm:$0xf] }
  0xa1   : > { %6728 = vmatmul.mubr.msk.bf16.gmra.mrb[12].mxu0 %vm336_vm1, %v7131_v10  ;;  %v7793_v48 = vsel %vm7368_vm7, %v5823_v36, %v1518_v38  ;;  %v1520_v49 = vrot.slane %v1518_v38, 4  ;;  %v1521_v50 = vrot.slane %v1395_v21, 5  ;;  %v5824_v53 = vrot.slane %v1396_v27, 9  ;;  %v7134_v10 = vld [vmem:[%s7246_s27 + $0x90] sm:$0xff]   ;;  %v6175_v32 = vld [vmem:[%s7246_s27 + $0x1c] sm:$0xf] }
  0xa2   : > { %6731 = vmatprep.mubr.msk.bf16.mxu0 %vm336_vm1, %v7132_v34  ;;  %v7799_v52 = vsel %vm7368_vm7, %v1506_v40, %v1507_v42  ;;  %v1525_v12 = vrot.slane %v1397_v31, 5  ;;  %v1528_v55 = vrot.slane %v1398_v7, 5  ;;  %v7805_v30 = vsel %vm7368_vm7, %v1513_v16, %v1514_v35  ;;  %v1410_v34 = vld [vmem:[%s7246_s27 + $0x8c] sm:$0x1]  ;;  %v7156_v42 = vld [vmem:[%s8573_s1 + $0x10] sm:$0xf] }
  0xa3   : > { %v5838_v56 = vcombine.low %v7780_v23, %v7799_v52  ;;  %v7809_v37 = vsel %vm7368_vm7, %v1520_v49, %v1521_v50  ;;  %v5825_v28 = vrot.slane %v1399_v39, 9  ;;  %v5839_v59 = vcombine.low %v7784_v41, %v7805_v30  ;;  %v6319_v36 = vld [vmem:[%s8573_s1 + $0x20] sm:$0xf] }
  0xa4   : > { %v5840_v60 = vcombine.low %v7793_v48, %v7809_v37  ;;  %v7820_v61 = vsel %vm7368_vm7, %v5824_v53, %v1525_v12  ;;  %v1527_v62 = vrot.slane %v1525_v12, 4  ;;  %v1532_v2 = vrot.slane %v1400_v44, 5  ;;  %v6176_v44 = vld [vmem:[%s7246_s27 + $0x20] sm:$0x1]  ;;  %7082 = vmatprep.subr.msk.bf16.mxu0 %vm385_vm0, %v6319_v36 }
  0xa5   : > { %v1535_v8 = vrot.slane %v1401_v45, 5  ;;  %v5826_v3 = vrot.slane %v1402_v46, 9  ;;  %v1539_v5 = vrot.slane %v1403_v47, 5  ;;  %6580 = vmatmul.mubr.msk.bf16.vlgmr.msra.gmra.mrb[0].mxu1 %vm336_vm1, %v5835_v17  ;;  %v1542_v13 = vrot.slane %v1404_v51, 5  ;;  %v6177_v46 = vld [vmem:[%s7246_s27 + $0x24] sm:$0xf] }
  0xa6   : > { %v7829_v11 = vsel %vm7368_vm7, %v1527_v62, %v1528_v55  ;;  %v5827_v18 = vrot.slane %v1405_v14, 9  ;;  %v1546_v29 = vrot.slane %v1406_v57, 5  ;;  %6583 = vmatprep.mubr.msk.bf16.mxu1 %vm336_vm1, %v5836_v22  ;;  %6612 = vmatpush3.bf16.msra.mxu1 %v7756_v19  ;;  %v7838_v17 = vsel %vm7368_vm7, %v5825_v28, %v1532_v2  ;;  %v6178_v28 = vld [vmem:[%s7246_s27 + $0x28] sm:$0xf]  ;;  %v7135_v14 = vld [vmem:[%s7246_s27 + $0x9c] sm:$0xff]  }
  0xa7   : > { %v5841_v20 = vcombine.low %v7820_v61, %v7829_v11  ;;  %v1534_v21 = vrot.slane %v1532_v2, 4  ;;  %v7842_v25 = vsel %vm7368_vm7, %v5826_v3, %v1539_v5  ;;  %v1541_v27 = vrot.slane %v1539_v5, 4  ;;  %7078 = vmatprep.subr.msk.bf16.mxu1 %vm385_vm0, %v7156_v42  ;;  %v6179_v62 = vld [vmem:[%s7246_s27 + $0x2c] sm:$0x1] }
  0xa8   : > { %v7847_v31 = vsel %vm7368_vm7, %v5827_v18, %v1546_v29  ;;  %v1548_v19 = vrot.slane %v1546_v29, 4  ;;  %v1549_v22 = vrot.slane %v1407_v63, 5  ;;  %v5828_v6 = vrot.slane %v1408_v1, 9  ;;  %v7136_v2 = vld [vmem:[%s7246_s27 + $0xa8] sm:$0xff]   ;;  %v1412_v18 = vld [vmem:[%s7246_s27 + $0x94] sm:$0xf] }
  0xa9   : > { %6732 = vmatmul.mubr.msk.bf16.gmra.mrb[16].mxu0 %vm336_vm1, %v7133_v58  ;;  %v7857_v54 = vsel %vm7368_vm7, %v1534_v21, %v1535_v8  ;;  %v1553_v7 = vrot.slane %v1409_v15, 5  ;;  %v1556_v35 = vrot.slane %v1410_v34, 5  ;;  %v7867_v39 = vsel %vm7368_vm7, %v1541_v27, %v1542_v13  ;;  %v1413_v27 = vld [vmem:[%s7246_s27 + $0x98] sm:$0x1] }
  0xaa   : > { %6735 = vmatprep.mubr.msk.bf16.mxu0 %vm336_vm1, %v7134_v10  ;;  %v5842_v38 = vcombine.low %v7838_v17, %v7857_v54  ;;  %v7871_v40 = vsel %vm7368_vm7, %v1548_v19, %v1549_v22  ;;  %v4195_v45 = vshrl.u32 %v6174_v26, 16  ;;  %v5843_v47 = vcombine.low %v7842_v25, %v7867_v39  ;;  %v1411_v10 = vld [vmem:[%s7246_s27 + $0x90] sm:$0xe]  ;;  %v1414_v19 = vld [vmem:[%s7246_s27 + $0x9c] sm:$0xe] }
  0xab   : > { %v5844_v16 = vcombine.low %v7847_v31, %v7871_v40  ;;  %v7882_v49 = vsel %vm7368_vm7, %v5828_v6, %v1553_v7  ;;  %v1555_v50 = vrot.slane %v1553_v7, 4  ;;  %v4198_v53 = vshll.u32 %v6174_v26, 16  ;;  %v6187_v17 = vld [vmem:[%s7246_s27 + $0x4c] sm:$0xf]  ;;  %v6193_v39 = vld [vmem:[%s7246_s27 + $0x64] sm:$0xf] }
  0xac   : > { %v4197_v51 = vrot.slane %v4195_v45, 4  ;;  %v4204_v12 = vshll.u32 %v6175_v32, 16  ;;  %v4208_v55 = vshrl.u32 %v6175_v32, 16  ;;  %v4214_v58 = vshll.u32 %v6176_v44, 16 }
  0xad   : > { %v7888_v57 = vsel %vm7368_vm7, %v1555_v50, %v1556_v35  ;;  %v4219_v63 = vshrl.u32 %v6177_v46, 16  ;;  %v4222_v1 = vshll.u32 %v6177_v46, 16  ;;  %6584 = vmatmul.mubr.msk.bf16.gmra.mrb[4].mxu1 %vm336_vm1, %v5837_v9  ;;  %v4200_v3 = vrot.slane %v4198_v53, 5  ;;  %v1416_v50 = vld [vmem:[%s7246_s27 + $0xa4] sm:$0x1] }
  0xae   : > { %v5845_v8 = vcombine.low %v7882_v49, %v7888_v57  ;;  %v4206_v5 = vrot.slane %v4204_v12, 5  ;;  %v4210_v15 = vrot.slane %v4208_v55, 4  ;;  %6587 = vmatprep.mubr.msk.bf16.mxu1 %vm336_vm1, %v5838_v56  ;;  %v4216_v13 = vrot.slane %v4214_v58, 5  ;;  %v1415_v56 = vld [vmem:[%s7246_s27 + $0xa0] sm:$0xf]  ;;  %v7137_v58 = vld [vmem:[%s7246_s27 + $0xb4] sm:$0xff]  }
  0xaf   : > { %v4221_v24 = vrot.slane %v4219_v63, 4  ;;  %v4224_v33 = vrot.slane %v4222_v1, 5  ;;  %v4228_v9 = vshll.u32 %v6178_v28, 16  ;;  %v4201_v29 = vor.u32 %v4200_v3, %v4197_v51  ;;  %v7138_v3 = vld [vmem:[%s7246_s27 + $0xc0] sm:$0xff]  }
  0xb0   : > { %v4211_v34 = vor.u32 %v4210_v15, %v4206_v5  ;;  %v4232_v21 = vshrl.u32 %v6178_v28, 16  ;;  %v4238_v26 = vshll.u32 %v6179_v62, 16  ;;  %v7908_v23 = vsel %vm385_vm0, %v6319_v36, 0  ;;  %v6180_v28 = vld [vmem:[%s7246_s27 + $0x30] sm:$0xf] }
  0xb1   : > { %6736 = vmatmul.mubr.msk.bf16.gmra.mrb[20].mxu0 %vm336_vm1, %v7135_v14  ;;  %v4225_v22 = vor.u32 %v4224_v33, %v4221_v24  ;;  %v4230_v32 = vrot.slane %v4228_v9, 5  ;;  %v5829_v52 = vrot.slane %v1411_v10, 9  ;;  %v4202_v42 = vrot.slane %v4201_v29, 4  ;;  %v6181_v14 = vld [vmem:[%s7246_s27 + $0x34] sm:$0xf] }
  0xb2   : > { %6739 = vmatprep.mubr.msk.bf16.mxu0 %vm336_vm1, %v7136_v2  ;;  %v4212_v6 = vrot.slane %v4211_v34, 4  ;;  %v4234_v7 = vrot.slane %v4232_v21, 4  ;;  %v4240_v35 = vrot.slane %v4238_v26, 5  ;;  %v1560_v45 = vrot.slane %v1412_v18, 5  ;;  %v6182_v24 = vld [vmem:[%s7246_s27 + $0x38] sm:$0x1] }
  0xb3   : > { %v4226_v44 = vrot.slane %v4225_v22, 4  ;;  %v1563_v46 = vrot.slane %v1413_v27, 5  ;;  %v5830_v51 = vrot.slane %v1414_v19, 9  ;;  %v4207_v36 = vsel %vm7293_vm4, %v4202_v42, %v4206_v5  ;;  %v6183_v9 = vld [vmem:[%s7246_s27 + $0x3c] sm:$0xf] }
  0xb4   : > { %v4217_v53 = vsel %vm7293_vm4, %v4212_v6, %v4216_v13  ;;  %v4235_v12 = vor.u32 %v4234_v7, %v4230_v32  ;;  %v1567_v55 = vrot.slane %v1415_v56, 5  ;;  %v7926_v1 = vsel %vm7368_vm7, %v5829_v52, %v1560_v45  ;;  %v6185_v34 = vld [vmem:[%s7246_s27 + $0x44] sm:$0x1]  ;;  %v1417_v22 = vld [vmem:[%s7246_s27 + $0xa8] sm:$0xe] }
  0xb5   : > { %v7920_v62 = vcombine.low %v4207_v36, %v4217_v53  ;;  %v4231_v63 = vsel %vm7293_vm4, %v4226_v44, %v4230_v32  ;;  %v1562_v2 = vrot.slane %v1560_v45, 4  ;;  %6588 = vmatmul.mubr.msk.bf16.gmra.mrb[8].mxu1 %vm336_vm1, %v5839_v59  ;;  %v1570_v13 = vrot.slane %v1416_v50, 5  ;;  %v1418_v32 = vld [vmem:[%s7246_s27 + $0xac] sm:$0xf]  ;;  %v1419_v7 = vld [vmem:[%s7246_s27 + $0xb0] sm:$0x1] }
  0xb6   : > { %v4236_v5 = vrot.slane %v4235_v12, 4  ;;  %v7935_v15 = vsel %vm7368_vm7, %v5830_v51, %v1567_v55  ;;  %v1569_v10 = vrot.slane %v1567_v55, 4  ;;  %6591 = vmatprep.mubr.msk.bf16.mxu1 %vm336_vm1, %v5840_v60  ;;  %v4243_v30 = vshrl.u32 %v6180_v28, 16  ;;  %v6184_v60 = vld [vmem:[%s7246_s27 + $0x40] sm:$0xf]  ;;  %v7139_v51 = vld [vmem:[%s7246_s27 + $0xcc] sm:$0xff]  }
  0xb7   : > { %v7944_v41 = vsel %vm7368_vm7, %v1562_v2, %v1563_v46  ;;  %v4246_v59 = vshll.u32 %v6180_v28, 16  ;;  %v4252_v33 = vshll.u32 %v6181_v14, 16  ;;  %v4256_v37 = vshrl.u32 %v6181_v14, 16  ;;  %v1420_v50 = vld [vmem:[%s7246_s27 + $0xb4] sm:$0xe] }
  0xb8   : > { %v4241_v18 = vsel %vm7293_vm4, %v4236_v5, %v4240_v35  ;;  %v5846_v29 = vcombine.low %v7926_v1, %v7944_v41  ;;  %v7953_v48 = vsel %vm7368_vm7, %v1569_v10, %v1570_v13  ;;  %v4245_v27 = vrot.slane %v4243_v30, 4  ;;  %v1421_v28 = vld [vmem:[%s7246_s27 + $0xb8] sm:$0xf]  ;;  %v6186_v5 = vld [vmem:[%s7246_s27 + $0x48] sm:$0xf] }
  0xb9   : > { %6740 = vmatmul.mubr.msk.bf16.gmra.mrb[24].mxu0 %vm336_vm1, %v7137_v58  ;;  %v7958_v21 = vcombine.low %v4231_v63, %v4241_v18  ;;  %v5847_v26 = vcombine.low %v7935_v15, %v7953_v48  ;;  %v4248_v19 = vrot.slane %v4246_v59, 5  ;;  %v4254_v52 = vrot.slane %v4252_v33, 5 }
  0xba   : > { %6743 = vmatprep.mubr.msk.bf16.mxu0 %vm336_vm1, %v7138_v3  ;;  %v4258_v56 = vrot.slane %v4256_v37, 4  ;;  %v4262_v42 = vshll.u32 %v6182_v24, 16  ;;  %v4267_v6 = vshrl.u32 %v6183_v9, 16  ;;  %v4270_v44 = vshll.u32 %v6183_v9, 16  ;;  %v1422_v3 = vld [vmem:[%s7246_s27 + $0xbc] sm:$0x1] }
  0xbb   : > { %v4249_v35 = vor.u32 %v4248_v19, %v4245_v27  ;;  %v4276_v45 = vshll.u32 %v6184_v60, 16  ;;  %v4280_v46 = vshrl.u32 %v6184_v60, 16  ;;  %v4286_v55 = vshll.u32 %v6185_v34, 16  ;;  %v6188_v27 = vld [vmem:[%s7246_s27 + $0x50] sm:$0x1] }
  0xbc   : > { %v4259_v36 = vor.u32 %v4258_v56, %v4254_v52  ;;  %v4264_v53 = vrot.slane %v4262_v42, 5  ;;  %v4269_v12 = vrot.slane %v4267_v6, 4  ;;  %v4272_v58 = vrot.slane %v4270_v44, 5  ;;  %v6189_v56 = vld [vmem:[%s7246_s27 + $0x54] sm:$0xf] }
  0xbd   : > { %v4250_v14 = vrot.slane %v4249_v35, 4  ;;  %v4278_v63 = vrot.slane %v4276_v45, 5  ;;  %v4282_v2 = vrot.slane %v4280_v46, 4  ;;  %6592 = vmatmul.mubr.msk.bf16.gmra.mrb[12].mxu1 %vm336_vm1, %v5841_v20  ;;  %v4288_v13 = vrot.slane %v4286_v55, 5  ;;  %v6190_v35 = vld [vmem:[%s7246_s27 + $0x58] sm:$0xf] }
  0xbe   : > { %v4260_v10 = vrot.slane %v4259_v36, 4  ;;  %v5831_v24 = vrot.slane %v1417_v22, 9  ;;  %v1574_v30 = vrot.slane %v1418_v32, 5  ;;  %6595 = vmatprep.mubr.msk.bf16.mxu1 %vm336_vm1, %v5842_v38  ;;  %v4273_v33 = vor.u32 %v4272_v58, %v4269_v12  ;;  %v6192_v36 = vld [vmem:[%s7246_s27 + $0x60] sm:$0xf] }
  0xbf   : > { %v4255_v59 = vsel %vm7293_vm4, %v4250_v14, %v4254_v52  ;;  %v4283_v9 = vor.u32 %v4282_v2, %v4278_v63  ;;  %v1577_v18 = vrot.slane %v1419_v7, 5  ;;  %v5832_v37 = vrot.slane %v1420_v50, 9 }
  0xc0   : > { %v4265_v61 = vsel %vm7293_vm4, %v4260_v10, %v4264_v53  ;;  %v7985_v11 = vsel %vm7368_vm7, %v5831_v24, %v1574_v30  ;;  %v1576_v20 = vrot.slane %v1574_v30, 4  ;;  %v4274_v38 = vrot.slane %v4273_v33, 4 }
  0xc1   : > { %6744 = vmatmul.mubr.msk.bf16.gmra.mrb[28].mxu0 %vm336_vm1, %v7139_v51  ;;  %v6225_v54 = vcombine.low %v4255_v59, %v4265_v61  ;;  %v4284_v60 = vrot.slane %v4283_v9, 4  ;;  %v1581_v34 = vrot.slane %v1421_v28, 5  ;;  %v1584_v22 = vrot.slane %v1422_v3, 5  ;;  %v6191_v51 = vld [vmem:[%s7246_s27 + $0x5c] sm:$0x1] }
  0xc2   : > { %6749 = vmatprep.mubr.msk.bf16.mxu0 %vm336_vm1, %v7920_v62  ;;  %v7994_v19 = vsel %vm7368_vm7, %v1576_v20, %v1577_v18  ;;  %v4291_v32 = vshrl.u32 %v6186_v5, 16  ;;  %v4294_v52 = vshll.u32 %v6186_v5, 16  ;;  %v4279_v42 = vsel %vm7293_vm4, %v4274_v38, %v4278_v63  ;;  %v6194_v18 = vld [vmem:[%s7246_s27 + $0x68] sm:$0x1] }
  0xc3   : > { %v4289_v6 = vsel %vm7293_vm4, %v4284_v60, %v4288_v13  ;;  %v5848_v7 = vcombine.low %v7985_v11, %v7994_v19  ;;  %v8005_v62 = vsel %vm7368_vm7, %v5832_v37, %v1581_v34  ;;  %v1583_v45 = vrot.slane %v1581_v34, 4  ;;  %v6195_v37 = vld [vmem:[%s7246_s27 + $0x6c] sm:$0xf]  ;;  %v6196_v34 = vld [vmem:[%s7246_s27 + $0x70] sm:$0xf] }
  0xc4   : > { %v8008_v44 = vcombine.low %v4279_v42, %v4289_v6  ;;  %v4293_v46 = vrot.slane %v4291_v32, 4  ;;  %v4296_v50 = vrot.slane %v4294_v52, 5  ;;  %v4300_v53 = vshll.u32 %v6187_v17, 16 }
  0xc5   : > { %v4304_v12 = vshrl.u32 %v6187_v17, 16  ;;  %v4310_v55 = vshll.u32 %v6188_v27, 16  ;;  %v4315_v28 = vshrl.u32 %v6189_v56, 16  ;;  %6596 = vmatmul.mubr.msk.bf16.gmra.mrb[16].mxu1 %vm336_vm1, %v5843_v47  ;;  %v8018_v14 = vsel %vm7368_vm7, %v1583_v45, %v1584_v22 }
  0xc6   : > { %v4297_v58 = vor.u32 %v4296_v50, %v4293_v46  ;;  %v4318_v63 = vshll.u32 %v6189_v56, 16  ;;  %v4324_v2 = vshll.u32 %v6190_v35, 16  ;;  %6599 = vmatprep.mubr.msk.bf16.mxu1 %vm336_vm1, %v5844_v16  ;;  %v5849_v3 = vcombine.low %v8005_v62, %v8018_v14 }
  0xc7   : > { %v4302_v5 = vrot.slane %v4300_v53, 5  ;;  %v4306_v10 = vrot.slane %v4304_v12, 4  ;;  %v4312_v25 = vrot.slane %v4310_v55, 5  ;;  %v4317_v13 = vrot.slane %v4315_v28, 4 }
  0xc8   : > { %v4298_v47 = vrot.slane %v4297_v58, 4  ;;  %v4320_v24 = vrot.slane %v4318_v63, 5  ;;  %v4326_v30 = vrot.slane %v4324_v2, 5  ;;  %v4328_v31 = vshrl.u32 %v6190_v35, 16 }
  0xc9   : > { %6750 = vmatmul.mubr.msk.bf16.vlgmr.msra.gmra.mrb[0].mxu0 %vm336_vm1, %v7958_v21  ;;  %v4307_v59 = vor.u32 %v4306_v10, %v4302_v5  ;;  %v4334_v40 = vshll.u32 %v6191_v51, 16  ;;  %v4339_v16 = vshrl.u32 %v6192_v36, 16  ;;  %v4342_v61 = vshll.u32 %v6192_v36, 16  ;;  %v6198_v51 = vld [vmem:[%s7246_s27 + $0x78] sm:$0xf] }
  0xca   : > { %6782 = vmatpush3.bf16.msra.mxu0 %v7908_v23  ;;  %6753 = vmatprep.mubr.msk.bf16.mxu0 %vm336_vm1, %v6225_v54  ;;  %v4303_v33 = vsel %vm7293_vm4, %v4298_v47, %v4302_v5  ;;  %v4321_v9 = vor.u32 %v4320_v24, %v4317_v13  ;;  %v4348_v20 = vshll.u32 %v6193_v39, 16  ;;  %v4330_v21 = vrot.slane %v4328_v31, 4  ;;  %v6197_v54 = vld [vmem:[%s7246_s27 + $0x74] sm:$0x1]  ;;  %v6201_v47 = vld [vmem:[%s7246_s27 + $0x84] sm:$0xf] }
  0xcb   : > { %v4308_v17 = vrot.slane %v4307_v59, 4  ;;  %v4336_v38 = vrot.slane %v4334_v40, 5  ;;  %v4341_v60 = vrot.slane %v4339_v16, 4  ;;  %v4344_v22 = vrot.slane %v4342_v61, 5  ;;  %v6202_v59 = vld [vmem:[%s7246_s27 + $0x88] sm:$0xf] }
  0xcc   : > { %v4322_v27 = vrot.slane %v4321_v9, 4  ;;  %v4350_v23 = vrot.slane %v4348_v20, 5  ;;  %v4352_v32 = vshrl.u32 %v6193_v39, 16  ;;  %v4331_v56 = vor.u32 %v4330_v21, %v4326_v30  ;;  %v6200_v39 = vld [vmem:[%s7246_s27 + $0x80] sm:$0x1] }
  0xcd   : > { %v4313_v52 = vsel %vm7293_vm4, %v4308_v17, %v4312_v25  ;;  %v4358_v42 = vshll.u32 %v6194_v18, 16  ;;  %v4363_v6 = vshrl.u32 %v6195_v37, 16  ;;  %6600 = vmatmul.mubr.msk.bf16.gmra.mrb[20].mxu1 %vm336_vm1, %v5845_v8  ;;  %v4345_v46 = vor.u32 %v4344_v22, %v4341_v60 }
  0xce   : > { %v6227_v35 = vcombine.low %v4303_v33, %v4313_v52  ;;  %v4327_v45 = vsel %vm7293_vm4, %v4322_v27, %v4326_v30  ;;  %v4354_v50 = vrot.slane %v4352_v32, 4  ;;  %6603 = vmatprep.mubr.msk.bf16.mxu1 %vm336_vm1, %v5846_v29  ;;  %v4332_v36 = vrot.slane %v4331_v56, 4  ;;  %v6199_v29 = vld [vmem:[%s7246_s27 + $0x7c] sm:$0xf]  ;;  %v6205_v52 = vld [vmem:[%s7246_s27 + $0x94] sm:$0xf] }
  0xcf   : > { %v4360_v53 = vrot.slane %v4358_v42, 5  ;;  %v4365_v12 = vrot.slane %v4363_v6, 4  ;;  %v4366_v55 = vshll.u32 %v6195_v37, 16  ;;  %v4346_v49 = vrot.slane %v4345_v46, 4  ;;  %v6206_v42 = vld [vmem:[%s7246_s27 + $0x98] sm:$0x1] }
  0xd0   : > { %v4355_v57 = vor.u32 %v4354_v50, %v4350_v23  ;;  %v4372_v8 = vshll.u32 %v6196_v34, 16  ;;  %v4376_v28 = vshrl.u32 %v6196_v34, 16  ;;  %v4337_v58 = vsel %vm7293_vm4, %v4332_v36, %v4336_v38  ;;  %v6203_v38 = vld [vmem:[%s7246_s27 + $0x8c] sm:$0x1]  ;;  %v6207_v50 = vld [vmem:[%s7246_s27 + $0x9c] sm:$0xf] }
  0xd1   : > { %6754 = vmatmul.mubr.msk.bf16.gmra.mrb[4].mxu0 %vm336_vm1, %v8008_v44  ;;  %v4368_v1 = vrot.slane %v4366_v55, 5  ;;  %v4382_v41 = vshll.u32 %v6197_v54, 16  ;;  %v4387_v63 = vshrl.u32 %v6198_v51, 16  ;;  %v6228_v2 = vcombine.low %v4327_v45, %v4337_v58  ;;  %v6204_v54 = vld [vmem:[%s7246_s27 + $0x90] sm:$0xf] }
  0xd2   : > { %6757 = vmatprep.mubr.msk.bf16.mxu0 %vm336_vm1, %v6227_v35  ;;  %v4351_v5 = vsel %vm7293_vm4, %v4346_v49, %v4350_v23  ;;  %v4356_v10 = vrot.slane %v4355_v57, 4  ;;  %v4374_v25 = vrot.slane %v4372_v8, 5  ;;  %v4378_v44 = vrot.slane %v4376_v28, 4 }
  0xd3   : > { %v4369_v13 = vor.u32 %v4368_v1, %v4365_v12  ;;  %v4384_v24 = vrot.slane %v4382_v41, 5  ;;  %v4389_v30 = vrot.slane %v4387_v63, 4  ;;  %v4390_v40 = vshll.u32 %v6198_v51, 16  ;;  %v7140_v51 = vld [vmem:[%s7246_s27 + $0xc] sm:$0xff]   ;;  %v6208_v63 = vld [vmem:[%s7246_s27 + $0xa0] sm:$0xf] }
  0xd4   : > { %v4361_v31 = vsel %vm7293_vm4, %v4356_v10, %v4360_v53  ;;  %v4396_v16 = vshll.u32 %v6199_v29, 16  ;;  %v4400_v33 = vshrl.u32 %v6199_v29, 16  ;;  %v4379_v61 = vor.u32 %v4378_v44, %v4374_v25 }
  0xd5   : > { %v6229_v9 = vcombine.low %v4351_v5, %v4361_v31  ;;  %v4370_v18 = vrot.slane %v4369_v13, 4  ;;  %v4406_v20 = vshll.u32 %v6200_v39, 16  ;;  %6604 = vmatmul.mubr.msk.bf16.gmra.mrb[24].mxu1 %vm336_vm1, %v5847_v26  ;;  %v4392_v37 = vrot.slane %v4390_v40, 5  ;;  %v6209_v13 = vld [vmem:[%s7246_s27 + $0xa4] sm:$0x1]  ;;  %v7141_v31 = vld [vmem:[%s7246_s27 + $0x18] sm:$0xff]  }
  0xd6   : > { %v4398_v17 = vrot.slane %v4396_v16, 5  ;;  %v4402_v21 = vrot.slane %v4400_v33, 4  ;;  %v4411_v60 = vshrl.u32 %v6201_v47, 16  ;;  %6607 = vmatprep.mubr.msk.bf16.mxu1 %vm336_vm1, %v5848_v7  ;;  %v4380_v27 = vrot.slane %v4379_v61, 4 }
  0xd7   : > { %v4375_v34 = vsel %vm7293_vm4, %v4370_v18, %v4374_v25  ;;  %v4408_v15 = vrot.slane %v4406_v20, 5  ;;  %v4414_v48 = vshll.u32 %v6201_v47, 16  ;;  %v4393_v22 = vor.u32 %v4392_v37, %v4389_v30  ;;  %v6211_v18 = vld [vmem:[%s7246_s27 + $0xac] sm:$0xf] }
  0xd8   : > { %v4403_v26 = vor.u32 %v4402_v21, %v4398_v17  ;;  %v4413_v23 = vrot.slane %v4411_v60, 4  ;;  %v4420_v32 = vshll.u32 %v6202_v59, 16  ;;  %v4385_v11 = vsel %vm7293_vm4, %v4380_v27, %v4384_v24  ;;  %v6212_v21 = vld [vmem:[%s7246_s27 + $0xb0] sm:$0x1] }
  0xd9   : > { %6758 = vmatmul.mubr.msk.bf16.gmra.mrb[8].mxu0 %vm336_vm1, %v6228_v2  ;;  %v4416_v19 = vrot.slane %v4414_v48, 5  ;;  %v4424_v7 = vshrl.u32 %v6202_v59, 16  ;;  %v4430_v56 = vshll.u32 %v6203_v38, 16  ;;  %v6230_v6 = vcombine.low %v4375_v34, %v4385_v11  ;;  %v6210_v59 = vld [vmem:[%s7246_s27 + $0xa8] sm:$0xf] }
  0xda   : > { %6761 = vmatprep.mubr.msk.bf16.mxu0 %vm336_vm1, %v6229_v9  ;;  %v4394_v35 = vrot.slane %v4393_v22, 4  ;;  %v4404_v45 = vrot.slane %v4403_v26, 4  ;;  %v4422_v46 = vrot.slane %v4420_v32, 5  ;;  %v4435_v55 = vshrl.u32 %v6204_v54, 16  ;;  %v7142_v38 = vld [vmem:[%s7246_s27 + $0x24] sm:$0xff]  }
  0xdb   : > { %v4417_v36 = vor.u32 %v4416_v19, %v4413_v23  ;;  %v4426_v53 = vrot.slane %v4424_v7, 4  ;;  %v4432_v12 = vrot.slane %v4430_v56, 5  ;;  %v4438_v8 = vshll.u32 %v6204_v54, 16  ;;  %v6213_v48 = vld [vmem:[%s7246_s27 + $0xb4] sm:$0xf] }
  0xdc   : > { %v4399_v49 = vsel %vm7293_vm4, %v4394_v35, %v4398_v17  ;;  %v4409_v57 = vsel %vm7293_vm4, %v4404_v45, %v4408_v15  ;;  %v4444_v28 = vshll.u32 %v6205_v52, 16  ;;  %v4437_v29 = vrot.slane %v4435_v55, 4  ;;  %v6214_v35 = vld [vmem:[%s7246_s27 + $0xb8] sm:$0xf]  ;;  %v6215_v55 = vld [vmem:[%s7246_s27 + $0xbc] sm:$0x1] }
  0xdd   : > { %v6231_v58 = vcombine.low %v4399_v49, %v4409_v57  ;;  %v4418_v1 = vrot.slane %v4417_v36, 4  ;;  %v4427_v41 = vor.u32 %v4426_v53, %v4422_v46  ;;  %6608 = vmatmul.mubr.msk.bf16.gmra.mrb[28].mxu1 %vm336_vm1, %v5849_v3  ;;  %v4440_v2 = vrot.slane %v4438_v8, 5  ;;  %v7143_v36 = vld [vmem:[%s7246_s27 + $0x30] sm:$0xff]   ;;  %v7144_v8 = vld [vmem:[%s7246_s27 + $0x3c] sm:$0xff]  }
  0xde   : > { %v4446_v5 = vrot.slane %v4444_v28, 5  ;;  %v4448_v10 = vshrl.u32 %v6205_v52, 16  ;;  %v4454_v25 = vshll.u32 %v6206_v42, 16  ;;  %6613 = vmatprep.mubr.msk.bf16.mxu1 %vm336_vm1, %v7140_v51  ;;  %v4459_v44 = vshrl.u32 %v6207_v50, 16 }
  0xdf   : > { %v4423_v39 = vsel %vm7293_vm4, %v4418_v1, %v4422_v46  ;;  %v4428_v47 = vrot.slane %v4427_v41, 4  ;;  %v4462_v24 = vshll.u32 %v6207_v50, 16  ;;  %v4441_v30 = vor.u32 %v4440_v2, %v4437_v29  ;;  %v6216_v41 = vld [vmem:[%s7246_s27 + $0xc0] sm:$0xf] }
  0xe0   : > { %v4450_v62 = vrot.slane %v4448_v10, 4  ;;  %v4456_v14 = vrot.slane %v4454_v25, 5  ;;  %v4468_v3 = vshll.u32 %v6208_v63, 16  ;;  %v4461_v16 = vrot.slane %v4459_v44, 4  ;;  %v6217_v10 = vld [vmem:[%s7246_s27 + $0xc4] sm:$0xf] }
  0xe1   : > { %6762 = vmatmul.mubr.msk.bf16.gmra.mrb[12].mxu0 %vm336_vm1, %v6230_v6  ;;  %v4433_v40 = vsel %vm7293_vm4, %v4428_v47, %v4432_v12  ;;  %v4464_v33 = vrot.slane %v4462_v24, 5  ;;  %v4472_v9 = vshrl.u32 %v6208_v63, 16  ;;  %v4442_v20 = vrot.slane %v4441_v30, 4  ;;  %v6218_v44 = vld [vmem:[%s7246_s27 + $0xc8] sm:$0x1] }
  0xe2   : > { %6765 = vmatprep.mubr.msk.bf16.mxu0 %vm336_vm1, %v6231_v58  ;;  %v6232_v61 = vcombine.low %v4423_v39, %v4433_v40  ;;  %v4451_v37 = vor.u32 %v4450_v62, %v4446_v5  ;;  %v4470_v17 = vrot.slane %v4468_v3, 5  ;;  %v4478_v27 = vshll.u32 %v6209_v13, 16 }
  0xe3   : > { %v4465_v60 = vor.u32 %v4464_v33, %v4461_v16  ;;  %v4474_v34 = vrot.slane %v4472_v9, 4  ;;  %v4483_v15 = vshrl.u32 %v6210_v59, 16  ;;  %v4447_v22 = vsel %vm7293_vm4, %v4442_v20, %v4446_v5  ;;  %v6219_v16 = vld [vmem:[%s7246_s27 + $0xcc] sm:$0xf]  ;;  %v6220_v20 = vld [vmem:[%s7246_s27 + $0xd0] sm:$0xf] }
  0xe4   : > { %v4452_v26 = vrot.slane %v4451_v37, 4  ;;  %v4486_v23 = vshll.u32 %v6210_v59, 16  ;;  %v4492_v32 = vshll.u32 %v6211_v18, 16  ;;  %v4480_v11 = vrot.slane %v4478_v27, 5 }
  0xe5   : > { %v4466_v54 = vrot.slane %v4465_v60, 4  ;;  %v4475_v52 = vor.u32 %v4474_v34, %v4470_v17  ;;  %v4485_v19 = vrot.slane %v4483_v15, 4  ;;  %6614 = vmatmul.mubr.msk.bf16.vlgmr.msra.gmra.mrb[0].mxu1 %vm336_vm1, %v7141_v31  ;;  %v4496_v6 = vshrl.u32 %v6211_v18, 16  ;;  %v6221_v60 = vld [vmem:[%s7246_s27 + $0xd4] sm:$0x1]  ;;  %v7145_v34 = vld [vmem:[%s7246_s27 + $0x48] sm:$0xff]  }
  0xe6   : > { %v4457_v7 = vsel %vm7293_vm4, %v4452_v26, %v4456_v14  ;;  %v4488_v56 = vrot.slane %v4486_v23, 5  ;;  %v4494_v42 = vrot.slane %v4492_v32, 5  ;;  %6617 = vmatprep.mubr.msk.bf16.mxu1 %vm336_vm1, %v7142_v38  ;;  %6816 = vmatpush3.bf16.msra.mxu1 %v7234_v4  ;;  %v4502_v51 = vshll.u32 %v6212_v21, 16  ;;  %v6255_v26 = vld [vmem:[%s7246_s27 + $0x18] sm:$0xe] }
  0xe7   : > { %v6233_v45 = vcombine.low %v4447_v22, %v4457_v7  ;;  %v4471_v46 = vsel %vm7293_vm4, %v4466_v54, %v4470_v17  ;;  %v4476_v50 = vrot.slane %v4475_v52, 4  ;;  %v4498_v12 = vrot.slane %v4496_v6, 4  ;;  %v6256_v23 = vld [vmem:[%s7246_s27 + $0x1c] sm:$0xf]  ;;  %v7146_v32 = vld [vmem:[%s7246_s27 + $0x54] sm:$0xff]  }
  0xe8   : > { %v4489_v53 = vor.u32 %v4488_v56, %v4485_v19  ;;  %v4507_v49 = vshrl.u32 %v6213_v48, 16  ;;  %v4510_v57 = vshll.u32 %v6213_v48, 16  ;;  %v4504_v28 = vrot.slane %v4502_v51, 5  ;;  %v6257_v7 = vld [vmem:[%s7246_s27 + $0x20] sm:$0x1] }
  0xe9   : > { %6766 = vmatmul.mubr.msk.bf16.gmra.mrb[16].mxu0 %vm336_vm1, %v6232_v61  ;;  %v4481_v4 = vsel %vm7293_vm4, %v4476_v50, %v4480_v11  ;;  %v4516_v58 = vshll.u32 %v6214_v35, 16  ;;  %v4520_v1 = vshrl.u32 %v6214_v35, 16  ;;  %v4499_v2 = vor.u32 %v4498_v12, %v4494_v42  ;;  %v6259_v56 = vld [vmem:[%s7246_s27 + $0x28] sm:$0xf] }
  0xea   : > { %6769 = vmatprep.mubr.msk.bf16.mxu0 %vm336_vm1, %v6233_v45  ;;  %v6234_v29 = vcombine.low %v4471_v46, %v4481_v4  ;;  %v4490_v63 = vrot.slane %v4489_v53, 4  ;;  %v4509_v5 = vrot.slane %v4507_v49, 4  ;;  %v4512_v25 = vrot.slane %v4510_v57, 5  ;;  %v6258_v45 = vld [vmem:[%s7246_s27 + $0x24] sm:$0xe] }
  0xeb   : > { %v4518_v39 = vrot.slane %v4516_v58, 5  ;;  %v4522_v47 = vrot.slane %v4520_v1, 4  ;;  %v4526_v13 = vshll.u32 %v6215_v55, 16  ;;  %v4500_v30 = vrot.slane %v4499_v2, 4  ;;  %v6260_v57 = vld [vmem:[%s7246_s27 + $0x2c] sm:$0x1] }
  0xec   : > { %v4495_v24 = vsel %vm7293_vm4, %v4490_v63, %v4494_v42  ;;  %v4531_v62 = vshrl.u32 %v6216_v41, 16  ;;  %v4534_v14 = vshll.u32 %v6216_v41, 16  ;;  %v4513_v3 = vor.u32 %v4512_v25, %v4509_v5  ;;  %v6261_v1 = vld [vmem:[%s7246_s27 + $0x30] sm:$0xe]  ;;  %v6262_v5 = vld [vmem:[%s7246_s27 + $0x34] sm:$0xf] }
  0xed   : > { %v4523_v59 = vor.u32 %v4522_v47, %v4518_v39  ;;  %v4528_v31 = vrot.slane %v4526_v13, 5  ;;  %v4540_v40 = vshll.u32 %v6217_v10, 16  ;;  %6618 = vmatmul.mubr.msk.bf16.gmra.mrb[4].mxu1 %vm336_vm1, %v7143_v36  ;;  %v4505_v33 = vsel %vm7293_vm4, %v4500_v30, %v4504_v28  ;;  %v6263_v13 = vld [vmem:[%s7246_s27 + $0x38] sm:$0x1] }
  0xee   : > { %v4533_v9 = vrot.slane %v4531_v62, 4  ;;  %v4536_v18 = vrot.slane %v4534_v14, 5  ;;  %v4544_v61 = vshrl.u32 %v6217_v10, 16  ;;  %6621 = vmatprep.mubr.msk.bf16.mxu1 %vm336_vm1, %v7144_v8  ;;  %v6235_v37 = vcombine.low %v4495_v24, %v4505_v33  ;;  %v6264_v62 = vld [vmem:[%s7246_s27 + $0x3c] sm:$0xe]  ;;  %v7147_v14 = vld [vmem:[%s7246_s27 + $0x60] sm:$0xff]  }
  0xef   : > { %v4514_v17 = vrot.slane %v4513_v3, 4  ;;  %v4524_v21 = vrot.slane %v4523_v59, 4  ;;  %v4542_v38 = vrot.slane %v4540_v40, 5  ;;  %v4550_v48 = vshll.u32 %v6218_v44, 16  ;;  %v7148_v33 = vld [vmem:[%s7246_s27 + $0x6c] sm:$0xff]  }
  0xf0   : > { %v4537_v27 = vor.u32 %v4536_v18, %v4533_v9  ;;  %v4546_v15 = vrot.slane %v4544_v61, 4  ;;  %v4555_v22 = vshrl.u32 %v6219_v16, 16  ;;  %v4558_v11 = vshll.u32 %v6219_v16, 16  ;;  %v6265_v16 = vld [vmem:[%s7246_s27 + $0x40] sm:$0xf] }
  0xf1   : > { %6770 = vmatmul.mubr.msk.bf16.gmra.mrb[20].mxu0 %vm336_vm1, %v6234_v29  ;;  %v4519_v54 = vsel %vm7293_vm4, %v4514_v17, %v4518_v39  ;;  %v4529_v52 = vsel %vm7293_vm4, %v4524_v21, %v4528_v31  ;;  %v4564_v19 = vshll.u32 %v6220_v20, 16  ;;  %v4552_v35 = vrot.slane %v4550_v48, 5 }
  0xf2   : > { %6773 = vmatprep.mubr.msk.bf16.mxu0 %vm336_vm1, %v6235_v37  ;;  %v4538_v42 = vrot.slane %v4537_v27, 4  ;;  %v4547_v6 = vor.u32 %v4546_v15, %v4542_v38  ;;  %v4557_v46 = vrot.slane %v4555_v22, 4  ;;  %v4560_v50 = vrot.slane %v4558_v11, 5  ;;  %v6268_v37 = vld [vmem:[%s7246_s27 + $0x4c] sm:$0xf] }
  0xf3   : > { %v4566_v51 = vrot.slane %v4564_v19, 5  ;;  %v4568_v36 = vshrl.u32 %v6220_v20, 16  ;;  %v6236_v53 = vcombine.low %v4519_v54, %v4529_v52  ;;  %v4574_v49 = vshll.u32 %v6221_v60, 16  ;;  %v6267_v20 = vld [vmem:[%s7246_s27 + $0x48] sm:$0xe] }
  0xf4   : > { %v4543_v12 = vsel %vm7293_vm4, %v4538_v42, %v4542_v38  ;;  %v4548_v55 = vrot.slane %v4547_v6, 4  ;;  %v4561_v8 = vor.u32 %v4560_v50, %v4557_v46  ;;  %v6303_v28 = vrot.slane %v6255_v26, 9  ;;  %v6266_v60 = vld [vmem:[%s7246_s27 + $0x44] sm:$0x1]  ;;  %v6270_v27 = vld [vmem:[%s7246_s27 + $0x54] sm:$0xe] }
  0xf5   : > { %v4570_v4 = vrot.slane %v4568_v36, 4  ;;  %v5034_v58 = vrot.slane %v6256_v23, 5  ;;  %6622 = vmatmul.mubr.msk.bf16.gmra.mrb[8].mxu1 %vm336_vm1, %v7145_v34  ;;  %v4576_v29 = vrot.slane %v4574_v49, 5  ;;  %v5037_v63 = vrot.slane %v6257_v7, 5  ;;  %v6269_v34 = vld [vmem:[%s7246_s27 + $0x50] sm:$0x1] }
  0xf6   : > { %v4553_v41 = vsel %vm7293_vm4, %v4548_v55, %v4552_v35  ;;  %v5041_v2 = vrot.slane %v6259_v56, 5  ;;  %6625 = vmatprep.mubr.msk.bf16.mxu1 %vm336_vm1, %v7146_v32  ;;  %v4562_v25 = vrot.slane %v4561_v8, 4  ;;  %v6304_v47 = vrot.slane %v6258_v45, 9  ;;  %v6271_v23 = vld [vmem:[%s7246_s27 + $0x58] sm:$0xf] }
  0xf7   : > { %v6237_v10 = vcombine.low %v4543_v12, %v4553_v41  ;;  %v4571_v39 = vor.u32 %v4570_v4, %v4566_v51  ;;  %v5036_v44 = vrot.slane %v5034_v58, 4  ;;  %v5044_v30 = vrot.slane %v6260_v57, 5  ;;  %v6272_v19 = vld [vmem:[%s7246_s27 + $0x5c] sm:$0x1]  ;;  %v5955_v7 = vld [vmem:[%s7246_s27 + $0x6c] sm:$0xf] }
  0xf8   : > { %v5043_v24 = vrot.slane %v5041_v2, 4  ;;  %v5035_v59 = vsel %vm7368_vm7, %v6303_v28, %v5034_v58  ;;  %v6305_v31 = vrot.slane %v6261_v1, 9  ;;  %v5048_v40 = vrot.slane %v6262_v5, 5  ;;  %v5956_v45 = vld [vmem:[%s7246_s27 + $0x70] sm:$0xf]  ;;  %v7149_v41 = vld [vmem:[%s7246_s27 + $0x78] sm:$0xff]  }
  0xf9   : > { %6774 = vmatmul.mubr.msk.bf16.gmra.mrb[24].mxu0 %vm336_vm1, %v6236_v53  ;;  %v4572_v3 = vrot.slane %v4571_v39, 4  ;;  %v4567_v9 = vsel %vm7293_vm4, %v4562_v25, %v4566_v51  ;;  %v5038_v18 = vsel %vm7368_vm7, %v5036_v44, %v5037_v63  ;;  %v5051_v61 = vrot.slane %v6263_v13, 5  ;;  %v5957_v55 = vld [vmem:[%s7246_s27 + $0x74] sm:$0x1]  ;;  %v5958_v57 = vld [vmem:[%s7246_s27 + $0x78] sm:$0xf] }
  0xfa   : > { %6777 = vmatprep.mubr.msk.bf16.mxu0 %vm336_vm1, %v6237_v10  ;;  %v8176_v21 = vsel %vm7368_vm7, %v6304_v47, %v5041_v2  ;;  %v8180_v38 = vsel %vm7368_vm7, %v5043_v24, %v5044_v30  ;;  %v6320_v15 = vcombine.low %v5035_v59, %v5038_v18  ;;  %v5050_v48 = vrot.slane %v5048_v40, 4  ;;  %v5959_v1 = vld [vmem:[%s7246_s27 + $0x7c] sm:$0xf]  ;;  %v7150_v10 = vld [vmem:[%s7246_s27 + $0x84] sm:$0xff]   ;;  %v5960_v24 = vld [vmem:[%s7246_s27 + $0x80] sm:$0x1] }
  0xfb   : > { %v4577_v17 = vsel %vm7293_vm4, %v4572_v3, %v4576_v29  ;;  %v6306_v22 = vrot.slane %v6264_v62, 9  ;;  %v5055_v26 = vrot.slane %v6265_v16, 5  ;;  %v8188_v54 = vsel %vm7368_vm7, %v6305_v31, %v5048_v40  ;;  %v6273_v16 = vld [vmem:[%s7246_s27 + $0x60] sm:$0xe] }
  0xfc   : > { %v6238_v32 = vcombine.low %v4567_v9, %v4577_v17  ;;  %v6307_v52 = vrot.slane %v6267_v20, 9  ;;  %v5062_v11 = vrot.slane %v6268_v37, 5  ;;  %v8195_v56 = vsel %vm7368_vm7, %v5050_v48, %v5051_v61  ;;  %v6277_v37 = vld [vmem:[%s7246_s27 + $0x70] sm:$0xf]  ;;  %v6275_v48 = vld [vmem:[%s7246_s27 + $0x68] sm:$0x1] }
  0xfd   : > { %6626 = vmatmul.mubr.msk.bf16.gmra.mrb[12].mxu1 %vm336_vm1, %v7147_v14  ;;  %v5057_v42 = vrot.slane %v5055_v26, 4  ;;  %v5058_v6 = vrot.slane %v6266_v60, 5  ;;  %v6308_v35 = vrot.slane %v6270_v27, 9  ;;  %v6321_v46 = vcombine.low %v8176_v21, %v8180_v38 }
  0xfe   : > { %6629 = vmatprep.mubr.msk.bf16.mxu1 %vm336_vm1, %v7148_v33  ;;  %v5065_v50 = vrot.slane %v6269_v34, 5  ;;  %v5069_v51 = vrot.slane %v6271_v23, 5  ;;  %v6322_v36 = vcombine.low %v8188_v54, %v8195_v56  ;;  %v8205_v53 = vsel %vm7368_vm7, %v6306_v22, %v5055_v26  ;;  %v6274_v33 = vld [vmem:[%s7246_s27 + $0x64] sm:$0xf]  ;;  %v6276_v34 = vld [vmem:[%s7246_s27 + $0x6c] sm:$0xe] }
  0xff   : > { %v8209_v12 = vsel %vm7368_vm7, %v6307_v52, %v5062_v11  ;;  %v2608_v49 = vshrl.u32 %v5955_v7, 16  ;;  %v5064_v8 = vrot.slane %v5062_v11, 4  ;;  %v5072_v4 = vrot.slane %v6272_v19, 5  ;;  %v7151_v23 = vld [vmem:[%s7246_s27 + $0x90] sm:$0xff]   ;;  %v5961_v19 = vld [vmem:[%s7246_s27 + $0x84] sm:$0xf] }
 0x100   : > { %v2611_v28 = vshll.u32 %v5955_v7, 16  ;;  %v2617_v58 = vshll.u32 %v5956_v45, 16  ;;  %v8219_v29 = vsel %vm7368_vm7, %v5057_v42, %v5058_v6  ;;  %v8223_v63 = vsel %vm7368_vm7, %v6308_v35, %v5069_v51  ;;  %v6278_v6 = vld [vmem:[%s7246_s27 + $0x74] sm:$0x1] }
 0x101   : > { %6778 = vmatmul.mubr.msk.bf16.gmra.mrb[28].mxu0 %vm336_vm1, %v6238_v32  ;;  %v2610_v2 = vrot.slane %v2608_v49, 4  ;;  %v2621_v5 = vshrl.u32 %v5956_v45, 16  ;;  %v5071_v25 = vrot.slane %v5069_v51, 4  ;;  %v2627_v13 = vshll.u32 %v5957_v55, 16  ;;  %v5962_v45 = vld [vmem:[%s7246_s27 + $0x88] sm:$0xf] }
 0x102   : > { %6783 = vmatprep.mubr.msk.bf16.mxu0 %vm336_vm1, %v6320_v15  ;;  %v2613_v39 = vrot.slane %v2611_v28, 5  ;;  %v2619_v47 = vrot.slane %v2617_v58, 5  ;;  %v2632_v30 = vshrl.u32 %v5958_v57, 16  ;;  %v2635_v62 = vshll.u32 %v5958_v57, 16  ;;  %v5963_v57 = vld [vmem:[%s7246_s27 + $0x8c] sm:$0x1] }
 0x103   : > { %v2623_v44 = vrot.slane %v2621_v5, 4  ;;  %v2641_v14 = vshll.u32 %v5959_v1, 16  ;;  %v8229_v3 = vsel %vm7368_vm7, %v5064_v8, %v5065_v50  ;;  %v2629_v31 = vrot.slane %v2627_v13, 5 }
 0x104   : > { %v2614_v59 = vor.u32 %v2613_v39, %v2610_v2  ;;  %v2645_v40 = vshrl.u32 %v5959_v1, 16  ;;  %v2634_v18 = vrot.slane %v2632_v30, 4  ;;  %v2637_v61 = vrot.slane %v2635_v62, 5  ;;  %v5966_v39 = vld [vmem:[%s7246_s27 + $0x98] sm:$0x1] }
 0x105   : > { %6630 = vmatmul.mubr.msk.bf16.gmra.mrb[16].mxu1 %vm336_vm1, %v7149_v41  ;;  %v2624_v9 = vor.u32 %v2623_v44, %v2619_v47  ;;  %v8234_v20 = vrot.slane %v2641_v14, 5  ;;  %v8240_v17 = vsel %vm7368_vm7, %v5071_v25, %v5072_v4  ;;  %v2651_v60 = vshll.u32 %v5960_v24, 16  ;;  %v5964_v4 = vld [vmem:[%s7246_s27 + $0x90] sm:$0xf]  ;;  %v6279_v30 = vld [vmem:[%s7246_s27 + $0x78] sm:$0xe] }
 0x106   : > { %6633 = vmatprep.mubr.msk.bf16.mxu1 %vm336_vm1, %v7150_v10  ;;  %v2615_v21 = vrot.slane %v2614_v59, 4  ;;  %v2647_v38 = vrot.slane %v2645_v40, 4  ;;  %v2638_v15 = vor.u32 %v2637_v61, %v2634_v18  ;;  %v6309_v22 = vrot.slane %v6273_v16, 9  ;;  %v6281_v18 = vld [vmem:[%s7246_s27 + $0x80] sm:$0x1] }
 0x107   : > { %v2625_v27 = vrot.slane %v2624_v9, 4  ;;  %v5076_v26 = vrot.slane %v6274_v33, 5  ;;  %v6323_v32 = vcombine.low %v8205_v53, %v8219_v29  ;;  %v5083_v11 = vrot.slane %v6277_v37, 5  ;;  %v5965_v29 = vld [vmem:[%s7246_s27 + $0x94] sm:$0xf]  ;;  %v7153_v37 = vld [vmem:[%s7246_s27 + $0xa8] sm:$0xff]  }
 0x108   : > { %v2620_v54 = vsel %vm7293_vm4, %v2615_v21, %v2619_v47  ;;  %v2648_v52 = vor.u32 %v2647_v38, %v8234_v20  ;;  %v6324_v7 = vcombine.low %v8209_v12, %v8229_v3  ;;  %v8257_v42 = vrot.slane %v2638_v15, 4  ;;  %v6282_v61 = vld [vmem:[%s7246_s27 + $0x84] sm:$0xe]  ;;  %v7154_v15 = vld [vmem:[%s7246_s27 + $0xb4] sm:$0xff]  }
 0x109   : > { %6784 = vmatmul.mubr.msk.bf16.vlgmr.msra.gmra.mrb[0].mxu0 %vm336_vm1, %v6321_v46  ;;  %v2630_v56 = vsel %vm7293_vm4, %v2625_v27, %v2629_v31  ;;  %v6310_v35 = vrot.slane %v6276_v34, 9  ;;  %v7152_v46 = vld [vmem:[%s7246_s27 + $0x9c] sm:$0xff]   ;;  %v6325_v50 = vcombine.low %v8223_v63, %v8240_v17  ;;  %v8264_v51 = vrot.slane %v2651_v60, 5  ;;  %v6283_v27 = vld [vmem:[%s7246_s27 + $0x88] sm:$0xf] }
 0x10a   : > { %6787 = vmatprep.mubr.msk.bf16.mxu0 %vm336_vm1, %v6322_v36  ;;  %v5078_v36 = vrot.slane %v5076_v26, 4  ;;  %v5079_v53 = vrot.slane %v6275_v48, 5  ;;  %v8266_v55 = vcombine.low %v2620_v54, %v2630_v56  ;;  %v8268_v12 = vrot.slane %v2648_v52, 4  ;;  %v6280_v31 = vld [vmem:[%s7246_s27 + $0x7c] sm:$0xf] }
 0x10b   : > { %v8272_v49 = vsel %vm7368_vm7, %v6309_v22, %v5076_v26  ;;  %v2656_v8 = vshrl.u32 %v5961_v19, 16  ;;  %v5085_v28 = vrot.slane %v5083_v11, 4  ;;  %v5086_v58 = vrot.slane %v6278_v6, 5  ;;  %v6284_v56 = vld [vmem:[%s7246_s27 + $0x8c] sm:$0x1] }
 0x10c   : > { %v2659_v1 = vshll.u32 %v5961_v19, 16  ;;  %v2665_v41 = vshll.u32 %v5962_v45, 16  ;;  %v2644_v2 = vsel %vm7293_vm4, %v8257_v42, %v8234_v20  ;;  %v8284_v5 = vsel %vm7368_vm7, %v6310_v35, %v5083_v11 }
 0x10d   : > { %6634 = vmatmul.mubr.msk.bf16.gmra.mrb[20].mxu1 %vm336_vm1, %v7151_v23  ;;  %v2658_v10 = vrot.slane %v2656_v8, 4  ;;  %v2669_v25 = vshrl.u32 %v5962_v45, 16  ;;  %v8290_v47 = vsel %vm7368_vm7, %v5078_v36, %v5079_v53  ;;  %v2675_v24 = vshll.u32 %v5963_v57, 16  ;;  %v5967_v45 = vld [vmem:[%s7246_s27 + $0x9c] sm:$0xf] }
 0x10e   : > { %6637 = vmatprep.mubr.msk.bf16.mxu1 %vm336_vm1, %v7152_v46  ;;  %v2661_v13 = vrot.slane %v2659_v1, 5  ;;  %v8292_v44 = vrot.slane %v2665_v41, 5  ;;  %v2680_v14 = vshrl.u32 %v5964_v4, 16  ;;  %v2683_v3 = vshll.u32 %v5964_v4, 16  ;;  %v5968_v8 = vld [vmem:[%s7246_s27 + $0xa0] sm:$0xf] }
 0x10f   : > { %v2671_v62 = vrot.slane %v2669_v25, 4  ;;  %v2689_v59 = vshll.u32 %v5965_v29, 16  ;;  %v8299_v40 = vsel %vm7368_vm7, %v5085_v28, %v5086_v58  ;;  %v2693_v33 = vshrl.u32 %v5965_v29, 16  ;;  %v5970_v25 = vld [vmem:[%s7246_s27 + $0xa8] sm:$0xf] }
 0x110   : > { %v2662_v16 = vor.u32 %v2661_v13, %v2658_v10  ;;  %v2699_v9 = vshll.u32 %v5966_v39, 16  ;;  %v2682_v38 = vrot.slane %v2680_v14, 4  ;;  %v2685_v60 = vrot.slane %v2683_v3, 5 }
 0x111   : > { %6788 = vmatmul.mubr.msk.bf16.gmra.mrb[4].mxu0 %vm336_vm1, %v6323_v32  ;;  %v2672_v21 = vor.u32 %v2671_v62, %v8292_v44  ;;  %v8306_v34 = vrot.slane %v2689_v59, 5  ;;  %v8312_v22 = vrot.slane %v2675_v24, 5  ;;  %v2695_v26 = vrot.slane %v2693_v33, 4  ;;  %v5971_v24 = vld [vmem:[%s7246_s27 + $0xac] sm:$0xf] }
 0x112   : > { %6791 = vmatprep.mubr.msk.bf16.mxu0 %vm336_vm1, %v6324_v7  ;;  %v8310_v48 = vrot.slane %v2662_v16, 4  ;;  %v6311_v23 = vrot.slane %v6279_v30, 9  ;;  %v2686_v54 = vor.u32 %v2685_v60, %v2682_v38  ;;  %v5090_v52 = vrot.slane %v6280_v31, 5  ;;  %v7155_v30 = vld [vmem:[%s7246_s27 + $0xc0] sm:$0xff]  }
 0x113   : > { %v8314_v32 = vrot.slane %v2672_v21, 4  ;;  %v5093_v11 = vrot.slane %v6281_v18, 5  ;;  %v2654_v19 = vsel %vm7293_vm4, %v8268_v12, %v8264_v51  ;;  %v2696_v7 = vor.u32 %v2695_v26, %v8306_v34  ;;  %v5974_v12 = vld [vmem:[%s7246_s27 + $0xb8] sm:$0xf] }
 0x114   : > { %v6312_v6 = vrot.slane %v6282_v61, 9  ;;  %v5097_v35 = vrot.slane %v6283_v27, 5  ;;  %v6326_v46 = vcombine.low %v8272_v49, %v8290_v47  ;;  %v8326_v36 = vrot.slane %v2686_v54, 4  ;;  %v6285_v61 = vld [vmem:[%s7246_s27 + $0x90] sm:$0xe] }
 0x115   : > { %6638 = vmatmul.mubr.msk.bf16.gmra.mrb[24].mxu1 %vm336_vm1, %v7153_v37  ;;  %v8328_v53 = vrot.slane %v2699_v9, 5  ;;  %v5092_v57 = vrot.slane %v5090_v52, 4  ;;  %v6327_v4 = vcombine.low %v8284_v5, %v8299_v40  ;;  %v2668_v28 = vsel %vm7293_vm4, %v8310_v48, %v8292_v44  ;;  %v5969_v5 = vld [vmem:[%s7246_s27 + $0xa4] sm:$0x1]  ;;  %v5972_v40 = vld [vmem:[%s7246_s27 + $0xb0] sm:$0x1] }
 0x116   : > { %6641 = vmatprep.mubr.msk.bf16.mxu1 %vm336_vm1, %v7154_v15  ;;  %v2678_v49 = vsel %vm7293_vm4, %v8314_v32, %v8312_v22  ;;  %v2697_v58 = vrot.slane %v2696_v7, 4  ;;  %v5091_v1 = vsel %vm7368_vm7, %v6311_v23, %v5090_v52  ;;  %v8348_v29 = vsel %vm7368_vm7, %v6312_v6, %v5097_v35  ;;  %v6287_v27 = vld [vmem:[%s7246_s27 + $0x98] sm:$0x1]  ;;  %v6289_v23 = vld [vmem:[%s7246_s27 + $0xa0] sm:$0xf] }
 0x117   : > { %v5094_v41 = vsel %vm7368_vm7, %v5092_v57, %v5093_v11  ;;  %v2704_v10 = vshrl.u32 %v5967_v45, 16  ;;  %v5099_v39 = vrot.slane %v5097_v35, 4  ;;  %v5100_v47 = vrot.slane %v6284_v56, 5  ;;  %v5973_v57 = vld [vmem:[%s7246_s27 + $0xb4] sm:$0xf] }
 0x118   : > { %v2707_v13 = vshll.u32 %v5967_v45, 16  ;;  %v2713_v44 = vshll.u32 %v5968_v8, 16  ;;  %v2692_v62 = vsel %vm7293_vm4, %v8326_v36, %v8306_v34  ;;  %v2702_v63 = vsel %vm7293_vm4, %v2697_v58, %v8328_v53  ;;  %v6286_v34 = vld [vmem:[%s7246_s27 + $0x94] sm:$0xf]  ;;  %v6288_v45 = vld [vmem:[%s7246_s27 + $0x9c] sm:$0xe] }
 0x119   : > { %6792 = vmatmul.mubr.msk.bf16.gmra.mrb[8].mxu0 %vm336_vm1, %v6325_v50  ;;  %v2706_v17 = vrot.slane %v2704_v10, 4  ;;  %v2717_v50 = vshrl.u32 %v5968_v8, 16  ;;  %v6328_v14 = vcombine.low %v5091_v1, %v5094_v41  ;;  %v2723_v31 = vshll.u32 %v5969_v5, 16  ;;  %v5975_v5 = vld [vmem:[%s7246_s27 + $0xbc] sm:$0x1] }
 0x11a   : > { %6795 = vmatprep.mubr.msk.bf16.mxu0 %vm336_vm1, %v6326_v46  ;;  %v2709_v3 = vrot.slane %v2707_v13, 5  ;;  %v2715_v59 = vrot.slane %v2713_v44, 5  ;;  %v2728_v33 = vshrl.u32 %v5970_v25, 16  ;;  %v2731_v9 = vshll.u32 %v5970_v25, 16  ;;  %v5976_v25 = vld [vmem:[%s7246_s27 + $0xc0] sm:$0xf] }
 0x11b   : > { %v2719_v16 = vrot.slane %v2717_v50, 4  ;;  %v2737_v18 = vshll.u32 %v5971_v24, 16  ;;  %v8370_v37 = vsel %vm7368_vm7, %v5099_v39, %v5100_v47  ;;  %v2725_v38 = vrot.slane %v2723_v31, 5 }
 0x11c   : > { %v2710_v21 = vor.u32 %v2709_v3, %v2706_v17  ;;  %v2741_v60 = vshrl.u32 %v5971_v24, 16  ;;  %v2730_v48 = vrot.slane %v2728_v33, 4  ;;  %v2733_v22 = vrot.slane %v2731_v9, 5  ;;  %v6291_v33 = vld [vmem:[%s7246_s27 + $0xa8] sm:$0xe] }
 0x11d   : > { %6642 = vmatmul.mubr.msk.bf16.gmra.mrb[28].mxu1 %vm336_vm1, %v7155_v30  ;;  %v2720_v15 = vor.u32 %v2719_v16, %v2715_v59  ;;  %v8375_v26 = vrot.slane %v2737_v18, 5  ;;  %v2747_v52 = vshll.u32 %v5972_v40, 16  ;;  %v6313_v11 = vrot.slane %v6285_v61, 9 }
 0x11e   : > { %6663 = vmatprep.mubr.msk.bf16.mxu1 %vm336_vm1, %v8266_v55  ;;  %v2711_v32 = vrot.slane %v2710_v21, 4  ;;  %v2743_v54 = vrot.slane %v2741_v60, 4  ;;  %v2734_v56 = vor.u32 %v2733_v22, %v2730_v48  ;;  %v5104_v6 = vrot.slane %v6286_v34, 5  ;;  %v6292_v21 = vld [vmem:[%s7246_s27 + $0xac] sm:$0xf] }
 0x11f   : > { %v2721_v7 = vrot.slane %v2720_v15, 4  ;;  %v5107_v35 = vrot.slane %v6287_v27, 5  ;;  %v5989_v55 = vcombine.low %v2644_v2, %v2654_v19  ;;  %v5111_v53 = vrot.slane %v6289_v23, 5  ;;  %v5978_v27 = vld [vmem:[%s7246_s27 + $0xc8] sm:$0x1] }
 0x120   : > { %v2716_v46 = vsel %vm7293_vm4, %v2711_v32, %v2715_v59  ;;  %v2744_v36 = vor.u32 %v2743_v54, %v8375_v26  ;;  %v5990_v8 = vcombine.low %v2668_v28, %v2678_v49  ;;  %v8396_v51 = vcombine.low %v2692_v62, %v2702_v63  ;;  %v6290_v28 = vld [vmem:[%s7246_s27 + $0xa4] sm:$0x1]  ;;  %v6295_v22 = vld [vmem:[%s7246_s27 + $0xb8] sm:$0xf] }
 0x121   : > { %6796 = vmatmul.mubr.msk.bf16.gmra.mrb[12].mxu0 %vm336_vm1, %v6327_v4  ;;  %v2726_v20 = vsel %vm7293_vm4, %v2721_v7, %v2725_v38  ;;  %v5106_v42 = vrot.slane %v5104_v6, 4  ;;  %v6329_v2 = vcombine.low %v8348_v29, %v8370_v37  ;;  %v8404_v19 = vrot.slane %v2747_v52, 5  ;;  %v5977_v29 = vld [vmem:[%s7246_s27 + $0xc4] sm:$0xf]  ;;  %v6293_v38 = vld [vmem:[%s7246_s27 + $0xb0] sm:$0x1] }
 0x122   : > { %6799 = vmatprep.mubr.msk.bf16.mxu0 %vm336_vm1, %v6328_v14  ;;  %v5105_v4 = vsel %vm7368_vm7, %v6313_v11, %v5104_v6  ;;  %v6314_v49 = vrot.slane %v6288_v45, 9  ;;  %v5992_v58 = vcombine.low %v2716_v46, %v2726_v20  ;;  %v2735_v1 = vrot.slane %v2734_v56, 4  ;;  %v6294_v52 = vld [vmem:[%s7246_s27 + $0xb4] sm:$0xe] }
 0x123   : > { %v5108_v41 = vsel %vm7368_vm7, %v5106_v42, %v5107_v35  ;;  %v2752_v10 = vshrl.u32 %v5973_v57, 16  ;;  %v2745_v39 = vrot.slane %v2744_v36, 4  ;;  %v5113_v47 = vrot.slane %v5111_v53, 4  ;;  %v6297_v36 = vld [vmem:[%s7246_s27 + $0xc0] sm:$0xe] }
 0x124   : > { %v2755_v13 = vshll.u32 %v5973_v57, 16  ;;  %v2761_v44 = vshll.u32 %v5974_v12, 16  ;;  %v6330_v24 = vcombine.low %v5105_v4, %v5108_v41  ;;  %v5114_v30 = vrot.slane %v6290_v28, 5  ;;  %v6298_v42 = vld [vmem:[%s7246_s27 + $0xc4] sm:$0xf] }
 0x125   : > { %6664 = vmatmul.mubr.msk.bf16.vlgmr.msra.gmra.mrb[16].mxu1 %vm336_vm1, %v5989_v55  ;;  %v2754_v62 = vrot.slane %v2752_v10, 4  ;;  %v2765_v63 = vshrl.u32 %v5974_v12, 16  ;;  %v5112_v17 = vsel %vm7368_vm7, %v6314_v49, %v5111_v53  ;;  %v2771_v3 = vshll.u32 %v5975_v5, 16  ;;  %v6296_v55 = vld [vmem:[%s7246_s27 + $0xbc] sm:$0x1] }
 0x126   : > { %6667 = vmatprep.mubr.msk.bf16.mxu1 %vm336_vm1, %v5990_v8  ;;  %v2757_v50 = vrot.slane %v2755_v13, 5  ;;  %v2763_v14 = vrot.slane %v2761_v44, 5  ;;  %v2776_v31 = vshrl.u32 %v5976_v25, 16  ;;  %v2779_v40 = vshll.u32 %v5976_v25, 16  ;;  %v6299_v12 = vld [vmem:[%s7246_s27 + $0xc8] sm:$0x1] }
 0x127   : > { %v2767_v59 = vrot.slane %v2765_v63, 4  ;;  %v2785_v16 = vshll.u32 %v5977_v29, 16  ;;  %v2740_v9 = vsel %vm7293_vm4, %v2735_v1, %v8375_v26  ;;  %v2750_v18 = vsel %vm7293_vm4, %v2745_v39, %v8404_v19  ;;  %v6301_v49 = vld [vmem:[%s7246_s27 + $0xd0] sm:$0xf] }
 0x128   : > { %v2758_v61 = vor.u32 %v2757_v50, %v2754_v62  ;;  %v2789_v37 = vshrl.u32 %v5977_v29, 16  ;;  %v5115_v60 = vsel %vm7368_vm7, %v5113_v47, %v5114_v30  ;;  %v2778_v15 = vrot.slane %v2776_v31, 4  ;;  %v6302_v50 = vld [vmem:[%s7246_s27 + $0xd4] sm:$0x1] }
 0x129   : > { %6800 = vmatmul.mubr.msk.bf16.gmra.mrb[16].mxu0 %vm336_vm1, %v6329_v2  ;;  %v2768_v34 = vor.u32 %v2767_v59, %v2763_v14  ;;  %v2781_v48 = vrot.slane %v2779_v40, 5  ;;  %v2787_v23 = vrot.slane %v2785_v16, 5  ;;  %v6315_v54 = vrot.slane %v6291_v33, 9 }
 0x12a   : > { %6803 = vmatprep.mubr.msk.bf16.mxu0 %vm336_vm1, %v6330_v24  ;;  %v2759_v26 = vrot.slane %v2758_v61, 4  ;;  %v2791_v32 = vrot.slane %v2789_v37, 4  ;;  %v2773_v7 = vrot.slane %v2771_v3, 5  ;;  %v5118_v56 = vrot.slane %v6292_v21, 5 }
 0x12b   : > { %v2769_v11 = vrot.slane %v2768_v34, 4  ;;  %v5121_v6 = vrot.slane %v6293_v38, 5  ;;  %v6331_v35 = vcombine.low %v5112_v17, %v5115_v60  ;;  %v2795_v45 = vshll.u32 %v5978_v27, 16  ;;  %v6300_v17 = vld [vmem:[%s7246_s27 + $0xcc] sm:$0xe] }
 0x12c   : > { %v5125_v46 = vrot.slane %v6295_v22, 5  ;;  %v2782_v53 = vor.u32 %v2781_v48, %v2778_v15  ;;  %v5119_v57 = vsel %vm7368_vm7, %v6315_v54, %v5118_v56  ;;  %v5120_v8 = vrot.slane %v5118_v56, 4 }
 0x12d   : > { %6668 = vmatmul.mubr.msk.bf16.gmra.mrb[20].mxu1 %vm336_vm1, %v8396_v51  ;;  %v6316_v20 = vrot.slane %v6294_v52, 9  ;;  %v5993_v2 = vcombine.low %v2740_v9, %v2750_v18  ;;  %v2764_v19 = vsel %vm7293_vm4, %v2759_v26, %v2763_v14  ;;  %v2792_v4 = vor.u32 %v2791_v32, %v2787_v23 }
 0x12e   : > { %6671 = vmatprep.mubr.msk.bf16.mxu1 %vm336_vm1, %v5992_v58  ;;  %v5127_v28 = vrot.slane %v5125_v46, 4  ;;  %v2774_v51 = vsel %vm7293_vm4, %v2769_v11, %v2773_v7  ;;  %v5122_v1 = vsel %vm7368_vm7, %v5120_v8, %v5121_v6  ;;  %v5128_v41 = vrot.slane %v6296_v55, 5  ;;  %v8487_v6 = vld [vmem:[%s8574_s2] ss:$0 sm:$0xff] }
 0x12f   : > { %v6317_v5 = vrot.slane %v6297_v36, 9  ;;  %v2797_v58 = vrot.slane %v2795_v45, 5  ;;  %v6332_v10 = vcombine.low %v5119_v57, %v5122_v1  ;;  %v5132_v25 = vrot.slane %v6298_v42, 5 }
 0x130   : > { %v5135_v39 = vrot.slane %v6299_v12, 5  ;;  %v2783_v47 = vrot.slane %v2782_v53, 4  ;;  %v5126_v13 = vsel %vm7368_vm7, %v6316_v20, %v5125_v46  ;;  %v5129_v44 = vsel %vm7368_vm7, %v5127_v28, %v5128_v41 }
 0x131   : > { %6804 = vmatmul.mubr.msk.bf16.gmra.mrb[20].mxu0 %vm336_vm1, %v6331_v35  ;;  %v5139_v29 = vrot.slane %v6301_v49, 5  ;;  %v5994_v24 = vcombine.low %v2764_v19, %v2774_v51  ;;  %v2793_v30 = vrot.slane %v2792_v4, 4  ;;  %v5133_v62 = vsel %vm7368_vm7, %v6317_v5, %v5132_v25 }
 0x132   : > { %6807 = vmatprep.mubr.msk.bf16.mxu0 %vm336_vm1, %v6332_v10  ;;  %v5134_v63 = vrot.slane %v5132_v25, 4  ;;  %v6333_v14 = vcombine.low %v5126_v13, %v5129_v44  ;;  %v6318_v31 = vrot.slane %v6300_v17, 9  ;;  %v5142_v16 = vrot.slane %v6302_v50, 5 }
 0x133   : > { %v5141_v40 = vrot.slane %v5139_v29, 4  ;;  %v2788_v33 = vsel %vm7293_vm4, %v2783_v47, %v2787_v23  ;;  %v2798_v9 = vsel %vm7293_vm4, %v2793_v30, %v2797_v58 }
 0x134   : > { %v5136_v3 = vsel %vm7368_vm7, %v5134_v63, %v5135_v39  ;;  %v5995_v18 = vcombine.low %v2788_v33, %v2798_v9  ;;  %v5140_v61 = vsel %vm7368_vm7, %v6318_v31, %v5139_v29 }
 0x135   : > { %6672 = vmatmul.mubr.msk.bf16.gmra.mrb[24].mxu1 %vm336_vm1, %v5993_v2  ;;  %v6334_v59 = vcombine.low %v5133_v62, %v5136_v3  ;;  %v5143_v37 = vsel %vm7368_vm7, %v5141_v40, %v5142_v16 }
 0x136   : > { %6675 = vmatprep.mubr.msk.bf16.mxu1 %vm336_vm1, %v5994_v24  ;;  %v6335_v21 = vcombine.low %v5140_v61, %v5143_v37 }
 0x139   : > { %6808 = vmatmul.mubr.msk.bf16.gmra.mrb[24].mxu0 %vm336_vm1, %v6333_v14 }
 0x13a   : > { %6811 = vmatprep.mubr.msk.bf16.mxu0 %vm336_vm1, %v6334_v59 }
 0x13d   : > { %6676 = vmatmul.mubr.msk.bf16.gmra.mrb[28].mxu1 %vm336_vm1, %v5995_v18 }
 0x141   : > { %6812 = vmatmul.mubr.msk.bf16.gmra.mrb[28].mxu0 %vm336_vm1, %v6335_v21 }
 0x1b8   : > { %v6615_v38 = vpop.f32.mrb[0].mxu1 }
 0x1b9   : > { %v2144_v60 = vpop.f32.mrb[1].mxu1 }
 0x1ba   : > { %v6616_v43 = vpop.f32.mrb[2].mxu1 }
 0x1bb   : > { %v2147_v34 = vpop.f32.mrb[3].mxu1 }
 0x1c0   : > { %v6619_v27 = vpop.f32.mrb[4].mxu1 }
 0x1c1   : > { %v2160_v15 = vpop.f32.mrb[5].mxu1 }
 0x1c2   : > { %v6620_v48 = vpop.f32.mrb[6].mxu1 }
 0x1c3   : > { %v2163_v22 = vpop.f32.mrb[7].mxu1 }
 0x1c8   : > { %v6623_v26 = vpop.f32.mrb[8].mxu1 }
 0x1c9   : > { %v2176_v23 = vpop.f32.mrb[9].mxu1 }
 0x1ca   : > { %v6624_v32 = vpop.f32.mrb[10].mxu1 }
 0x1cb   : > { %v2179_v54 = vpop.f32.mrb[11].mxu1 }
 0x1d0   : > { %v8476_v0 = vpop.f32.mrb[12].mxu1 }
 0x1d1   : > { %v8478_v52 = vpop.f32.mrb[13].mxu1 }
 0x1d2   : > { %v8480_v11 = vpop.f32.mrb[14].mxu1 }
 0x1d3   : > { %v8482_v7 = vpop.f32.mrb[15].mxu1 }
 0x1dc   : > { %v6785_v56 = vpop.f32.mrb[0].mxu0 }
 0x1dd   : > { %v6817_v35 = vadd.f32 %v6785_v56, %v6615_v38  ;;  %v5279_v45 = vpop.f32.mrb[1].mxu0 }
 0x1de   : > { %v6818_v55 = vadd.f32 %v5279_v45, %v2144_v60  ;;  %v6786_v46 = vpop.f32.mrb[2].mxu0 }
 0x1df   : > { %v5543_v36 = vadd.f32 %v6817_v35, %v8487_v6  ;;  %v6819_v53 = vadd.f32 %v6786_v46, %v6616_v43  ;;  %v5282_v57 = vpop.f32.mrb[3].mxu0 }
 0x1e0   : > { %v5541_v8 = vadd.f32 %v6818_v55, %v8487_v6  ;;  %v6820_v20 = vadd.f32 %v5282_v57, %v2147_v34 }
 0x1e1   : > { %v5575_v42 = vmax.f32 %v5543_v36, 0.0  ;;  %v5544_v12 = vadd.f32 %v6819_v53, %v8487_v6 }
 0x1e2   : > { %v5573_v2 = vmax.f32 %v5541_v8, 0.0  ;;  %v5542_v19 = vadd.f32 %v6820_v20, %v8487_v6 }
 0x1e3   : > { %5607 = vst [vmem:[%s8494_s22 + $0x10] sm:$0xff] %v5575_v42  ;;  %v5576_v4 = vmax.f32 %v5544_v12, 0.0 }
 0x1e4   : > { %5605 = vst [vmem:[%s8494_s22] sm:$0xff] %v5573_v2  ;;  %v5574_v28 = vmax.f32 %v5542_v19, 0.0  ;;  %v6789_v49 = vpop.f32.mrb[4].mxu0 }
 0x1e5   : > { %5608 = vst [vmem:[%s8494_s22 + $0x18] sm:$0xff] %v5576_v4  ;;  %v6821_v51 = vadd.f32 %v6789_v49, %v6619_v27  ;;  %v5295_v1 = vpop.f32.mrb[5].mxu0 }
 0x1e6   : > { %5606 = vst [vmem:[%s8494_s22 + $0x8] sm:$0xff] %v5574_v28  ;;  %v6822_v41 = vadd.f32 %v5295_v1, %v2160_v15  ;;  %v6790_v5 = vpop.f32.mrb[6].mxu0 }
 0x1e7   : > { %v5547_v58 = vadd.f32 %v6821_v51, %v8487_v6  ;;  %v6823_v10 = vadd.f32 %v6790_v5, %v6620_v48  ;;  %v5298_v25 = vpop.f32.mrb[7].mxu0 }
 0x1e8   : > { %v5545_v39 = vadd.f32 %v6822_v41, %v8487_v6  ;;  %v6824_v47 = vadd.f32 %v5298_v25, %v2163_v22 }
 0x1e9   : > { %v5579_v13 = vmax.f32 %v5547_v58, 0.0  ;;  %v5548_v44 = vadd.f32 %v6823_v10, %v8487_v6 }
 0x1ea   : > { %v5577_v29 = vmax.f32 %v5545_v39, 0.0  ;;  %v5546_v24 = vadd.f32 %v6824_v47, %v8487_v6 }
 0x1eb   : > { %5611 = vst [vmem:[%s8494_s22 + $0x30] sm:$0xff] %v5579_v13  ;;  %v5580_v30 = vmax.f32 %v5548_v44, 0.0 }
 0x1ec   : > { %5609 = vst [vmem:[%s8494_s22 + $0x20] sm:$0xff] %v5577_v29  ;;  %v5578_v62 = vmax.f32 %v5546_v24, 0.0  ;;  %v6793_v63 = vpop.f32.mrb[8].mxu0 }
 0x1ed   : > { %5612 = vst [vmem:[%s8494_s22 + $0x38] sm:$0xff] %v5580_v30  ;;  %v6825_v17 = vadd.f32 %v6793_v63, %v6623_v26  ;;  %v5311_v50 = vpop.f32.mrb[9].mxu0 }
 0x1ee   : > { %5610 = vst [vmem:[%s8494_s22 + $0x28] sm:$0xff] %v5578_v62  ;;  %v6826_v14 = vadd.f32 %v5311_v50, %v2176_v23  ;;  %v6794_v3 = vpop.f32.mrb[10].mxu0 }
 0x1ef   : > { %v5551_v59 = vadd.f32 %v6825_v17, %v8487_v6  ;;  %v6827_v31 = vadd.f32 %v6794_v3, %v6624_v32  ;;  %v5314_v40 = vpop.f32.mrb[11].mxu0 }
 0x1f0   : > { %v5549_v16 = vadd.f32 %v6826_v14, %v8487_v6  ;;  %v6828_v33 = vadd.f32 %v5314_v40, %v2179_v54 }
 0x1f1   : > { %v5583_v9 = vmax.f32 %v5551_v59, 0.0  ;;  %v5552_v18 = vadd.f32 %v6827_v31, %v8487_v6 }
 0x1f2   : > { %v5581_v61 = vmax.f32 %v5549_v16, 0.0  ;;  %v5550_v37 = vadd.f32 %v6828_v33, %v8487_v6 }
 0x1f3   : > { %5615 = vst [vmem:[%s8494_s22 + $0x50] sm:$0xff] %v5583_v9  ;;  %v5584_v21 = vmax.f32 %v5552_v18, 0.0 }
 0x1f4   : > { %5613 = vst [vmem:[%s8494_s22 + $0x40] sm:$0xff] %v5581_v61  ;;  %v5582_v38 = vmax.f32 %v5550_v37, 0.0  ;;  %v6797_v60 = vpop.f32.mrb[12].mxu0 }
 0x1f5   : > { %5616 = vst [vmem:[%s8494_s22 + $0x58] sm:$0xff] %v5584_v21  ;;  %v6829_v43 = vadd.f32 %v6797_v60, %v8476_v0  ;;  %v5327_v34 = vpop.f32.mrb[13].mxu0 }
 0x1f6   : > { %5614 = vst [vmem:[%s8494_s22 + $0x48] sm:$0xff] %v5582_v38  ;;  %v6830_v27 = vadd.f32 %v5327_v34, %v8478_v52  ;;  %v6798_v15 = vpop.f32.mrb[14].mxu0 }
 0x1f7   : > { %v5555_v48 = vadd.f32 %v6829_v43, %v8487_v6  ;;  %v6831_v22 = vadd.f32 %v6798_v15, %v8480_v11  ;;  %v5330_v26 = vpop.f32.mrb[15].mxu0 }
 0x1f8   : > { %v5553_v23 = vadd.f32 %v6830_v27, %v8487_v6  ;;  %v6832_v32 = vadd.f32 %v5330_v26, %v8482_v7  ;;  %v6665_v54 = vpop.f32.mrb[16].mxu1 }
 0x1f9   : > { %v5587_v0 = vmax.f32 %v5555_v48, 0.0  ;;  %v5556_v56 = vadd.f32 %v6831_v22, %v8487_v6  ;;  %v2998_v35 = vpop.f32.mrb[17].mxu1 }
 0x1fa   : > { %v5585_v45 = vmax.f32 %v5553_v23, 0.0  ;;  %v5554_v52 = vadd.f32 %v6832_v32, %v8487_v6  ;;  %v6666_v55 = vpop.f32.mrb[18].mxu1 }
 0x1fb   : > { %5619 = vst [vmem:[%s8494_s22 + $0x70] sm:$0xff] %v5587_v0  ;;  %v5588_v46 = vmax.f32 %v5556_v56, 0.0  ;;  %v3001_v11 = vpop.f32.mrb[19].mxu1 }
 0x1fc   : > { %5617 = vst [vmem:[%s8494_s22 + $0x60] sm:$0xff] %v5585_v45  ;;  %v5586_v36 = vmax.f32 %v5554_v52, 0.0  ;;  %v6801_v53 = vpop.f32.mrb[16].mxu0 }
 0x1fd   : > { %5620 = vst [vmem:[%s8494_s22 + $0x78] sm:$0xff] %v5588_v46  ;;  %v6833_v57 = vadd.f32 %v6801_v53, %v6665_v54  ;;  %v5343_v7 = vpop.f32.mrb[17].mxu0 }
 0x1fe   : > { %5618 = vst [vmem:[%s8494_s22 + $0x68] sm:$0xff] %v5586_v36  ;;  %v6834_v8 = vadd.f32 %v5343_v7, %v2998_v35  ;;  %v6802_v20 = vpop.f32.mrb[18].mxu0 }
 0x1ff   : > { %v5559_v42 = vadd.f32 %v6833_v57, %v8487_v6  ;;  %v6835_v12 = vadd.f32 %v6802_v20, %v6666_v55  ;;  %v5346_v2 = vpop.f32.mrb[19].mxu0 }
 0x200   : > { %v5557_v19 = vadd.f32 %v6834_v8, %v8487_v6  ;;  %v6836_v4 = vadd.f32 %v5346_v2, %v3001_v11  ;;  %v6669_v28 = vpop.f32.mrb[20].mxu1 }
 0x201   : > { %v5591_v49 = vmax.f32 %v5559_v42, 0.0  ;;  %v5560_v51 = vadd.f32 %v6835_v12, %v8487_v6  ;;  %v3014_v1 = vpop.f32.mrb[21].mxu1 }
 0x202   : > { %v5589_v41 = vmax.f32 %v5557_v19, 0.0  ;;  %v5558_v5 = vadd.f32 %v6836_v4, %v8487_v6  ;;  %v6670_v58 = vpop.f32.mrb[22].mxu1 }
 0x203   : > { %5623 = vst [vmem:[%s8494_s22 + $0x90] sm:$0xff] %v5591_v49  ;;  %v5592_v10 = vmax.f32 %v5560_v51, 0.0  ;;  %v3017_v25 = vpop.f32.mrb[23].mxu1 }
 0x204   : > { %5621 = vst [vmem:[%s8494_s22 + $0x80] sm:$0xff] %v5589_v41  ;;  %v5590_v39 = vmax.f32 %v5558_v5, 0.0  ;;  %v6805_v47 = vpop.f32.mrb[20].mxu0 }
 0x205   : > { %5624 = vst [vmem:[%s8494_s22 + $0x98] sm:$0xff] %v5592_v10  ;;  %v6837_v13 = vadd.f32 %v6805_v47, %v6669_v28  ;;  %v5359_v44 = vpop.f32.mrb[21].mxu0 }
 0x206   : > { %5622 = vst [vmem:[%s8494_s22 + $0x88] sm:$0xff] %v5590_v39  ;;  %v6838_v29 = vadd.f32 %v5359_v44, %v3014_v1  ;;  %v6806_v24 = vpop.f32.mrb[22].mxu0 }
 0x207   : > { %v5563_v30 = vadd.f32 %v6837_v13, %v8487_v6  ;;  %v6839_v62 = vadd.f32 %v6806_v24, %v6670_v58  ;;  %v5362_v63 = vpop.f32.mrb[23].mxu0 }
 0x208   : > { %v5561_v17 = vadd.f32 %v6838_v29, %v8487_v6  ;;  %v6840_v50 = vadd.f32 %v5362_v63, %v3017_v25  ;;  %v6673_v14 = vpop.f32.mrb[24].mxu1 }
 0x209   : > { %v5595_v3 = vmax.f32 %v5563_v30, 0.0  ;;  %v5564_v59 = vadd.f32 %v6839_v62, %v8487_v6  ;;  %v3030_v31 = vpop.f32.mrb[25].mxu1 }
 0x20a   : > { %v5593_v40 = vmax.f32 %v5561_v17, 0.0  ;;  %v5562_v16 = vadd.f32 %v6840_v50, %v8487_v6  ;;  %v6674_v33 = vpop.f32.mrb[26].mxu1 }
 0x20b   : > { %5627 = vst [vmem:[%s8494_s22 + $0xb0] sm:$0xff] %v5595_v3  ;;  %v5596_v9 = vmax.f32 %v5564_v59, 0.0  ;;  %v3033_v18 = vpop.f32.mrb[27].mxu1 }
 0x20c   : > { %5625 = vst [vmem:[%s8494_s22 + $0xa0] sm:$0xff] %v5593_v40  ;;  %v5594_v61 = vmax.f32 %v5562_v16, 0.0  ;;  %v6809_v37 = vpop.f32.mrb[24].mxu0 }
 0x20d   : > { %5628 = vst [vmem:[%s8494_s22 + $0xb8] sm:$0xff] %v5596_v9  ;;  %v6841_v21 = vadd.f32 %v6809_v37, %v6673_v14  ;;  %v5375_v38 = vpop.f32.mrb[25].mxu0 }
 0x20e   : > { %5626 = vst [vmem:[%s8494_s22 + $0xa8] sm:$0xff] %v5594_v61  ;;  %v6842_v60 = vadd.f32 %v5375_v38, %v3030_v31  ;;  %v6810_v43 = vpop.f32.mrb[26].mxu0 }
 0x20f   : > { %v5567_v34 = vadd.f32 %v6841_v21, %v8487_v6  ;;  %v6843_v27 = vadd.f32 %v6810_v43, %v6674_v33  ;;  %v5378_v15 = vpop.f32.mrb[27].mxu0 }
 0x210   : > { %v5565_v48 = vadd.f32 %v6842_v60, %v8487_v6  ;;  %v6844_v22 = vadd.f32 %v5378_v15, %v3033_v18  ;;  %v6677_v26 = vpop.f32.mrb[28].mxu1 }
 0x211   : > { %v5599_v23 = vmax.f32 %v5567_v34, 0.0  ;;  %v5568_v32 = vadd.f32 %v6843_v27, %v8487_v6  ;;  %v3046_v54 = vpop.f32.mrb[29].mxu1 }
 0x212   : > { %v5597_v0 = vmax.f32 %v5565_v48, 0.0  ;;  %v5566_v56 = vadd.f32 %v6844_v22, %v8487_v6  ;;  %v6678_v35 = vpop.f32.mrb[30].mxu1 }
 0x213   : > { %5631 = vst [vmem:[%s8494_s22 + $0xd0] sm:$0xff] %v5599_v23  ;;  %v5600_v45 = vmax.f32 %v5568_v32, 0.0  ;;  %v3049_v52 = vpop.f32.mrb[31].mxu1 }
 0x214   : > { %5629 = vst [vmem:[%s8494_s22 + $0xc0] sm:$0xff] %v5597_v0  ;;  %v5598_v55 = vmax.f32 %v5566_v56, 0.0  ;;  %v6813_v46 = vpop.f32.mrb[28].mxu0 }
 0x215   : > { %5632 = vst [vmem:[%s8494_s22 + $0xd8] sm:$0xff] %v5600_v45  ;;  %v6845_v11 = vadd.f32 %v6813_v46, %v6677_v26  ;;  %v5391_v36 = vpop.f32.mrb[29].mxu0 }
 0x216   : > { %5630 = vst [vmem:[%s8494_s22 + $0xc8] sm:$0xff] %v5598_v55  ;;  %v6846_v53 = vadd.f32 %v5391_v36, %v3046_v54  ;;  %v6814_v57 = vpop.f32.mrb[30].mxu0 }
 0x217   : > { %v5571_v7 = vadd.f32 %v6845_v11, %v8487_v6  ;;  %v6847_v8 = vadd.f32 %v6814_v57, %v6678_v35  ;;  %v5394_v20 = vpop.f32.mrb[31].mxu0 }
 0x218   : > { %v5569_v42 = vadd.f32 %v6846_v53, %v8487_v6  ;;  %v6848_v12 = vadd.f32 %v5394_v20, %v3049_v52 }
 0x219   : > { %v5603_v2 = vmax.f32 %v5571_v7, 0.0  ;;  %v5572_v19 = vadd.f32 %v6847_v8, %v8487_v6 }
 0x21a   : > { %v5601_v4 = vmax.f32 %v5569_v42, 0.0  ;;  %v5570_v28 = vadd.f32 %v6848_v12, %v8487_v6 }
 0x21b   : > { %5635 = vst [vmem:[%s8494_s22 + $0xf0] sm:$0xff] %v5603_v2  ;;  %v5604_v49 = vmax.f32 %v5572_v19, 0.0 }
 0x21c   : > { %5633 = vst [vmem:[%s8494_s22 + $0xe0] sm:$0xff] %v5601_v4  ;;  %v5602_v51 = vmax.f32 %v5570_v28, 0.0 }
 0x21d   : > { %5636 = vst [vmem:[%s8494_s22 + $0xf8] sm:$0xff] %v5604_v49 }
 0x21e   : > { %5634 = vst [vmem:[%s8494_s22 + $0xe8] sm:$0xff] %v5602_v51 }
 0x21f PF: > { %s13_s14 = sadd.s32 1, %s7179_s14   ;;  %s8580_s12 = smov %s7175_s13 }
 0x220   : > { %p10_p5 = scmp.ge.s32.totalorder %s13_s14, 4   ;;  %s8581_s13 = smov %s8583_s15 }
 0x222   :  { %12 = sbr.rel (!%p10_p5) target bundleno = 2 (0x2), region = 78 }

</bundles_post_ra>
